<compile_context>
chip_gen: v7x
topology: tpu7x:2x2x1
jax: 0.10.0
libtpu: 0.0.40
codegen_flags: <defaults>
</compile_context>

<pallas_src>
import functools

import jax
import jax.numpy as jnp
from jax.experimental import pallas as pl
from jax.experimental.pallas import tpu as pltpu


def _round_up(n, m):
    return (n + m - 1) // m * m


# ----------------------------------------------------------------------------
# Kernel
# ----------------------------------------------------------------------------
def _make_kernel(*, Hp, Op, Tc, T_total, use_h, use_lang, mm_dtype, needs_mask):
    """One grid step = one (batch_tile x Tc-timestep) block of the decode loop."""
    G = 3 * Hp

    def kernel(x_ref, h0_ref, wx_ref, wh_ref, brz_ref, bin_ref, bhn_ref,
               wtp_ref, btp_ref, *rest):
        if use_lang:
            blin_ref, y_ref, hout_ref = rest
        else:
            y_ref, hout_ref = rest

        ti = pl.program_id(1)

        # Initialize the VMEM-resident hidden-state carry.  hout's block index
        # is constant along the time axis, so the same VMEM buffer persists
        # across all time blocks of this batch tile (carry-in-output pattern).
        @pl.when(ti == 0)
        def _():
            hout_ref[...] = h0_ref[...]

        TB = hout_ref.shape[0]

        # Hoist weight/bias reads and bias broadcasts out of the time loop.
        wx = wx_ref[...]                                    # (Op, 3Hp [+ Op])
        wh = wh_ref[...]                                    # (Hp, [3Hp +] 3Hp)
        wtp = wtp_ref[...]                                  # (Hp, Op)
        b_rz = jnp.broadcast_to(brz_ref[...], (TB, 2 * Hp))
        b_in = jnp.broadcast_to(bin_ref[...], (TB, Hp))
        b_hn = jnp.broadcast_to(bhn_ref[...], (TB, Hp))
        b_tp = jnp.broadcast_to(btp_ref[...], (TB, Op))
        b_lin = jnp.broadcast_to(blin_ref[...], (TB, Op)) if use_lang else None

        t_base = ti * Tc
        h = hout_ref[...]                                   # (TB, Hp) f32

        # Unrolled in-kernel time loop (static indices, full LLO visibility).
        for tt in range(Tc):
            x = x_ref[tt].astype(jnp.float32)               # (TB, Op)
            # Fused same-LHS matmuls: one dot on x, one dot on h per step.
            gx = jnp.dot(x.astype(mm_dtype), wx,
                         preferred_element_type=jnp.float32)
            gh = jnp.dot(h.astype(mm_dtype), wh,
                         preferred_element_type=jnp.float32)
            gi = (gx[:, :G] + gh[:, :G]) if use_h else gx[:, :G]
            gg = gh[:, G:2 * G] if use_h else gh
            # torch GRUCell gate order: r, z, n  (r/z biases pre-folded).
            rz = jax.nn.sigmoid(gi[:, :2 * Hp] + gg[:, :2 * Hp] + b_rz)
            r = rz[:, :Hp]
            z = rz[:, Hp:]
            n = jnp.tanh(gi[:, 2 * Hp:] + b_in + r * (gg[:, 2 * Hp:] + b_hn))
            h_n = n + z * (h - n)
            tp = jnp.dot(h_n.astype(mm_dtype), wtp,
                         preferred_element_type=jnp.float32) + b_tp
            skip = (gx[:, G:] + b_lin) if use_lang else x
            y_ref[tt] = (skip + tp).astype(y_ref.dtype)
            if needs_mask:
                # Padded timesteps must not advance the recurrent state.
                h = jnp.where(t_base + tt < T_total, h_n, h)
            else:
                h = h_n

        hout_ref[...] = h

    return kernel


# ----------------------------------------------------------------------------
# Parameter packing (pad to lane-aligned shapes, fuse same-LHS weights, cast)
# ----------------------------------------------------------------------------
def _pack_params(params, *, hidden_size, output_size, use_h, use_lang,
                 weight_dtype):
    H, O = hidden_size, output_size
    Hp, Op = _round_up(H, 128), _round_up(O, 128)

    def pad_gate_cols(w, rows):
        # (rows, 3H) -> (rows, 3Hp) with every gate lane-aligned.
        w = w.reshape(rows, 3, H)
        w = jnp.pad(w, ((0, 0), (0, 0), (0, Hp - H)))
        return w.reshape(rows, 3 * Hp)

    w_ih = params["w_ih"]                                   # (O [+ H], 3H)

    # x-side fused weight: [W_ih_x | W_lin]  -> (Op, 3Hp [+ Op])
    w_ih_x = jnp.pad(pad_gate_cols(w_ih[:O], O), ((0, Op - O), (0, 0)))
    wx_parts = [w_ih_x]
    if use_lang:
        wx_parts.append(jnp.pad(params["w_lin"], ((0, Op - O), (0, Op - O))))
    wx = jnp.concatenate(wx_parts, axis=1).astype(weight_dtype)

    # h-side fused weight: [W_ih_h | W_hh]   -> (Hp, [3Hp +] 3Hp)
    wh_parts = []
    if use_h:
        wh_parts.append(jnp.pad(pad_gate_cols(w_ih[O:O + H], H),
                                ((0, Hp - H), (0, 0))))
    wh_parts.append(jnp.pad(pad_gate_cols(params["w_hh"], H),
                            ((0, Hp - H), (0, 0))))
    wh = jnp.concatenate(wh_parts, axis=1).astype(weight_dtype)

    # Biases: fold b_ih + b_hh for the r/z gates; keep the n-gate biases apart
    # because gh_n is scaled by r before the add.
    b_ih = pad_gate_cols(params["b_ih"], 1)                 # (1, 3Hp) f32
    b_hh = pad_gate_cols(params["b_hh"], 1)
    packed = {
        "wx": wx,
        "wh": wh,
        "b_rz": b_ih[:, :2 * Hp] + b_hh[:, :2 * Hp],
        "b_in": b_ih[:, 2 * Hp:],
        "b_hn": b_hh[:, 2 * Hp:],
        "w_tp": jnp.pad(params["w_tp"],
                        ((0, Hp - H), (0, Op - O))).astype(weight_dtype),
        "b_tp": jnp.pad(params["b_tp"], ((0, 0), (0, Op - O))),
    }
    if use_lang:
        packed["b_lin"] = jnp.pad(params["b_lin"], ((0, 0), (0, Op - O)))
    return packed


# ----------------------------------------------------------------------------
# Wrappers
# ----------------------------------------------------------------------------
def decoder_cell_sequence(xs, h0, params, *, hidden_size, output_size,
                          use_h=False, use_lang=False,
                          batch_tile=256, time_block=32, min_batch_tiles=2,
                          weight_dtype=jnp.bfloat16, stream_dtype=jnp.float32,
                          single_buffer_weights=False,
                          vmem_budget_bytes=40 << 20):
    """Applies DecoderCell.forward for T timesteps in ONE pallas_call.

    xs : (T, B, output_size)   per-step inputs
    h0 : (B, hidden_size)      initial hidden state
    Returns (ys, h_T) with ys: (T, B, output_size), h_T: (B, hidden_size).

    Tuning knobs (see module docstring): time_block (Tc), batch_tile /
    min_batch_tiles (v7x dual-TC), stream_dtype (bf16 x streaming for v5e),
    single_buffer_weights (pl.Buffered(1) weights for very large H on v7x).
    """
    xs = xs.astype(jnp.float32)
    h0 = h0.astype(jnp.float32)
    T, B, O = xs.shape
    H = hidden_size
    assert O == output_size and h0.shape == (B, H)

    Hp, Op = _round_up(H, 128), _round_up(O, 128)

    # ---- batch tiling (min_batch_tiles=2 keeps both v7x TCs busy when B allows)
    TB = min(_round_up(batch_tile, 8), _round_up(B, 8))
    if min_batch_tiles > 1:
        TB = min(TB, max(8, _round_up(pl.cdiv(B, min_batch_tiles), 8)))
    Bp = _round_up(B, TB)
    nb = Bp // TB

    # ---- pack weights (fused, lane-aligned, cast)
    packed = _pack_params(params, hidden_size=H, output_size=O,
                          use_h=use_h, use_lang=use_lang,
                          weight_dtype=weight_dtype)
    weights = [packed["wx"], packed["wh"], packed["b_rz"], packed["b_in"],
               packed["b_hn"], packed["w_tp"], packed["b_tp"]]
    if use_lang:
        weights.append(packed["b_lin"])
    weight_bytes = int(sum(int(w.size) * w.dtype.itemsize for w in weights))

    gx_w = 3 * Hp + (Op if use_lang else 0)
    gh_w = (6 if use_h else 3) * Hp
    x_item = jnp.dtype(stream_dtype).itemsize

    # ---- time blocking, sized to the VMEM budget (incl. temporaries)
    def vmem_estimate(tc):
        wb = weight_bytes * (1 if single_buffer_weights else 2)
        act = 2 * tc * TB * Op * (x_item + 4)               # dbl-buffered x + y
        hbuf = 2 * 2 * TB * Hp * 4                          # h0 in + h out
        temps = 4 * TB * (gx_w + gh_w + 6 * max(Hp, Op))    # gi/gh + gate temps
        return wb + act + hbuf + temps + (2 << 20)

    Tc = max(1, min(time_block, T))
    while Tc > 1 and vmem_estimate(Tc) > vmem_budget_bytes:
        Tc = max(1, Tc // 2)
    nt = pl.cdiv(T, Tc)
    Tp = nt * Tc
    needs_mask = (Tp != T)
    vmem_limit = int(min(max(vmem_estimate(Tc), 16 << 20), 128 << 20))

    # ---- pad activations to sublane/lane aligned shapes
    xs_p = jnp.pad(xs, ((0, Tp - T), (0, Bp - B), (0, Op - O))).astype(stream_dtype)
    h0_p = jnp.pad(h0, ((0, Bp - B), (0, Hp - H)))

    # ---- specs
    def wspec(arr):
        # Full-array block, constant index map -> DMA'd once, VMEM-resident.
        if single_buffer_weights:
            return pl.BlockSpec(arr.shape, lambda i, t: (0, 0),
                                pipeline_mode=pl.Buffered(1))
        return pl.BlockSpec(arr.shape, lambda i, t: (0, 0))

    in_specs = ([pl.BlockSpec((Tc, TB, Op), lambda i, t: (t, i, 0)),
                 pl.BlockSpec((TB, Hp), lambda i, t: (i, 0))]
                + [wspec(w) for w in weights])
    out_specs = (pl.BlockSpec((Tc, TB, Op), lambda i, t: (t, i, 0)),
                 pl.BlockSpec((TB, Hp), lambda i, t: (i, 0)))
    out_shape = (jax.ShapeDtypeStruct((Tp, Bp, Op), jnp.float32),
                 jax.ShapeDtypeStruct((Bp, Hp), jnp.float32))

    # ---- cost estimate
    flops = 2 * Tp * Bp * (Op * gx_w + Hp * gh_w + Hp * Op)
    transc = 3 * Tp * Bp * Hp
    bytes_acc = weight_bytes + Tp * Bp * Op * (x_item + 4) + 2 * Bp * Hp * 4

    kernel = _make_kernel(Hp=Hp, Op=Op, Tc=Tc, T_total=T, use_h=use_h,
                          use_lang=use_lang, mm_dtype=weight_dtype,
                          needs_mask=needs_mask)

    grid_spec = pltpu.PrefetchScalarGridSpec(
        num_scalar_prefetch=0,
        grid=(nb, nt),
        in_specs=in_specs,
        out_specs=out_specs,
    )

    ys_p, h_out = pl.pallas_call(
        kernel,
        out_shape=out_shape,
        grid_spec=grid_spec,
        input_output_aliases={1: 1},        # h0 buffer becomes h_T
        compiler_params=pltpu.CompilerParams(
            dimension_semantics=("parallel", "arbitrary"),
            vmem_limit_bytes=vmem_limit),
        cost_estimate=pl.CostEstimate(
            flops=int(flops), transcendentals=int(transc),
            bytes_accessed=int(bytes_acc)),
    )(xs_p, h0_p, *weights)

    return ys_p[:T, :B, :O], h_out[:B, :H]


def decoder_cell_forward(x, h, params, *, hidden_size, output_size,
                         use_h=False, use_lang=False, **kwargs):
    """Single-step DecoderCell.forward (exact module semantics): y, h_n."""
    ys, h_n = decoder_cell_sequence(x[None], h, params,
                                    hidden_size=hidden_size,
                                    output_size=output_size,
                                    use_h=use_h, use_lang=use_lang, **kwargs)
    return ys[0], h_n


# ----------------------------------------------------------------------------
# Init + pure-JAX reference (mirrors the bf16 weight/activation rounding)
# ----------------------------------------------------------------------------
def init_params(key, hidden_size, output_size, use_h=False, use_lang=False):
    """PyTorch-style uniform(-1/sqrt(fan), 1/sqrt(fan)); weights stored (in, out)."""
    in_size = output_size + (hidden_size if use_h else 0)
    k = 1.0 / jnp.sqrt(jnp.float32(hidden_size))
    keys = jax.random.split(key, 8)

    def u(kk, shape, bound):
        return jax.random.uniform(kk, shape, jnp.float32, -bound, bound)

    params = {
        "w_ih": u(keys[0], (in_size, 3 * hidden_size), k),
        "w_hh": u(keys[1], (hidden_size, 3 * hidden_size), k),
        "b_ih": u(keys[2], (1, 3 * hidden_size), k),
        "b_hh": u(keys[3], (1, 3 * hidden_size), k),
        "w_tp": u(keys[4], (hidden_size, output_size), k),
        "b_tp": u(keys[5], (1, output_size), k),
    }
    if use_lang:
        k_lin = 1.0 / jnp.sqrt(jnp.float32(output_size))
        params["w_lin"] = u(keys[6], (output_size, output_size), k_lin)
        params["b_lin"] = u(keys[7], (1, output_size), k_lin)
    return params


def _reference_step(x, h, params, hidden_size, use_h, use_lang,
                    weight_dtype=jnp.bfloat16):
    """Pure-JAX torch.nn.GRUCell + Linear, with the same bf16 matmul rounding."""
    def q(w):
        return w.astype(weight_dtype).astype(jnp.float32)

    def a(v):
        return v.astype(weight_dtype).astype(jnp.float32)

    H = hidden_size
    x = x.astype(jnp.float32)
    h = h.astype(jnp.float32)
    x_ = jnp.concatenate([x, h], axis=-1) if use_h else x
    gi = a(x_) @ q(params["w_ih"]) + params["b_ih"]
    gh = a(h) @ q(params["w_hh"]) + params["b_hh"]
    r = jax.nn.sigmoid(gi[:, :H] + gh[:, :H])
    z = jax.nn.sigmoid(gi[:, H:2 * H] + gh[:, H:2 * H])
    n = jnp.tanh(gi[:, 2 * H:] + r * gh[:, 2 * H:])
    h_n = (1.0 - z) * n + z * h
    tp = a(h_n) @ q(params["w_tp"]) + params["b_tp"]
    skip = (a(x) @ q(params["w_lin"]) + params["b_lin"]) if use_lang else x
    return skip + tp, h_n


# ----------------------------------------------------------------------------
# Demo / correctness check
# ----------------------------------------------------------------------------
if __name__ == "__main__":
    B, T = 8, 12
    hidden_size = 32
    output_size = 32
    key = jax.random.PRNGKey(0)

    for use_h, use_lang in ((False, False), (True, True)):
        key, kx, kh, kp = jax.random.split(key, 4)
        xs = jax.random.normal(kx, (T, B, output_size), jnp.float32)
        h0 = jax.random.normal(kh, (B, hidden_size), jnp.float32)
        params = init_params(kp, hidden_size, output_size, use_h, use_lang)

        # Multi-step: T=12 with time_block=8 -> 2 time blocks, masked tail.
        seq_fn = jax.jit(functools.partial(
            decoder_cell_sequence, hidden_size=hidden_size,
            output_size=output_size, use_h=use_h, use_lang=use_lang,
            time_block=8))
        ys, h_T = seq_fn(xs, h0, params)
        jax.block_until_ready((ys, h_T))

        h_ref = h0
        ys_ref = []
        for t in range(T):
            y_r, h_ref = _reference_step(xs[t], h_ref, params, hidden_size,
                                         use_h, use_lang)
            ys_ref.append(y_r)
        ys_ref = jnp.stack(ys_ref)
        assert jnp.allclose(ys, ys_ref, atol=2e-3, rtol=2e-3), (
            use_h, use_lang, float(jnp.max(jnp.abs(ys - ys_ref))))
        assert jnp.allclose(h_T, h_ref, atol=2e-3, rtol=2e-3), (
            use_h, use_lang, float(jnp.max(jnp.abs(h_T - h_ref))))

        # Single-step (exact DecoderCell.forward signature).
        step_fn = jax.jit(functools.partial(
            decoder_cell_forward, hidden_size=hidden_size,
            output_size=output_size, use_h=use_h, use_lang=use_lang))
        y1, h1 = step_fn(xs[0], h0, params)
        jax.block_until_ready((y1, h1))
        y1_ref, h1_ref = _reference_step(xs[0], h0, params, hidden_size,
                                         use_h, use_lang)
        assert jnp.allclose(y1, y1_ref, atol=2e-3, rtol=2e-3)
        assert jnp.allclose(h1, h1_ref, atol=2e-3, rtol=2e-3)

    print("KERNEL_OK")
</pallas_src>

<mosaic_0001>
module attributes {stable_mosaic.version = 11 : i64} {
  func.func @kernel(%arg0: i32, %arg1: i32, %arg2: memref<8x8x128xf32, #tpu.memory_space<vmem>>, %arg3: memref<8x128xf32, #tpu.memory_space<vmem>>, %arg4: memref<128x384xbf16, #tpu.memory_space<vmem>>, %arg5: memref<128x384xbf16, #tpu.memory_space<vmem>>, %arg6: memref<1x256xf32, #tpu.memory_space<vmem>>, %arg7: memref<1x128xf32, #tpu.memory_space<vmem>>, %arg8: memref<1x128xf32, #tpu.memory_space<vmem>>, %arg9: memref<128x128xbf16, #tpu.memory_space<vmem>>, %arg10: memref<1x128xf32, #tpu.memory_space<vmem>>, %arg11: memref<8x8x128xf32, #tpu.memory_space<vmem>>, %arg12: memref<8x128xf32, #tpu.memory_space<vmem>>) attributes {dimension_semantics = [#tpu.dimension_semantics<parallel>, #tpu.dimension_semantics<arbitrary>], iteration_bounds = array<i64: 1, 2>, scalar_prefetch = 0 : i64, scratch_operands = 0 : i64, tpu.core_type = #tpu.core_type<tc>, window_params = [{transform_indices = @transform_0, window_bounds = array<i64: 8, 8, 128>}, {transform_indices = @transform_1, window_bounds = array<i64: 8, 128>}, {pipeline_mode = #tpu.pipeline_mode<synchronous>, transform_indices = @transform_2, window_bounds = array<i64: 128, 384>}, {pipeline_mode = #tpu.pipeline_mode<synchronous>, transform_indices = @transform_3, window_bounds = array<i64: 128, 384>}, {pipeline_mode = #tpu.pipeline_mode<synchronous>, transform_indices = @transform_4, window_bounds = array<i64: 1, 256>}, {pipeline_mode = #tpu.pipeline_mode<synchronous>, transform_indices = @transform_5, window_bounds = array<i64: 1, 128>}, {pipeline_mode = #tpu.pipeline_mode<synchronous>, transform_indices = @transform_6, window_bounds = array<i64: 1, 128>}, {pipeline_mode = #tpu.pipeline_mode<synchronous>, transform_indices = @transform_7, window_bounds = array<i64: 128, 128>}, {pipeline_mode = #tpu.pipeline_mode<synchronous>, transform_indices = @transform_8, window_bounds = array<i64: 1, 128>}, {transform_indices = @transform_9, window_bounds = array<i64: 8, 8, 128>}, {transform_indices = @transform_10, window_bounds = array<i64: 8, 128>}]} {
    %c0_i32 = arith.constant 0 : i32
    %0 = arith.cmpi eq, %arg1, %c0_i32 : i32
    %1 = arith.extui %0 : i1 to i32
    %c0_i32_0 = arith.constant 0 : i32
    %2 = arith.cmpi ne, %1, %c0_i32_0 : i32
    scf.if %2 {
      %c0_98 = arith.constant 0 : index
      %c0_99 = arith.constant 0 : index
      %317 = vector.load %arg3[%c0_98, %c0_99] : memref<8x128xf32, #tpu.memory_space<vmem>>, vector<8x128xf32>
      %c0_100 = arith.constant 0 : index
      %c0_101 = arith.constant 0 : index
      %318 = vector.load %arg12[%c0_100, %c0_101] : memref<8x128xf32, #tpu.memory_space<vmem>>, vector<8x128xf32>
      tpu.vector_store %arg12[%c0_100, %c0_101], %317 {strides = array<i32>} : memref<8x128xf32, #tpu.memory_space<vmem>>, vector<8x128xf32>,
    } else {
    }
    %c0 = arith.constant 0 : index
    %c0_1 = arith.constant 0 : index
    %3 = vector.load %arg4[%c0, %c0_1] : memref<128x384xbf16, #tpu.memory_space<vmem>>, vector<128x384xbf16>
    %c0_2 = arith.constant 0 : index
    %c0_3 = arith.constant 0 : index
    %4 = vector.load %arg5[%c0_2, %c0_3] : memref<128x384xbf16, #tpu.memory_space<vmem>>, vector<128x384xbf16>
    %c0_4 = arith.constant 0 : index
    %c0_5 = arith.constant 0 : index
    %5 = vector.load %arg9[%c0_4, %c0_5] : memref<128x128xbf16, #tpu.memory_space<vmem>>, vector<128x128xbf16>
    %c0_6 = arith.constant 0 : index
    %c0_7 = arith.constant 0 : index
    %6 = vector.load %arg6[%c0_6, %c0_7] : memref<1x256xf32, #tpu.memory_space<vmem>>, vector<1x256xf32>
    %7 = vector.shape_cast %6 : vector<1x256xf32> to vector<1x256xf32>
    %8 = vector.broadcast %7 : vector<1x256xf32> to vector<8x256xf32>
    %c0_8 = arith.constant 0 : index
    %c0_9 = arith.constant 0 : index
    %9 = vector.load %arg7[%c0_8, %c0_9] : memref<1x128xf32, #tpu.memory_space<vmem>>, vector<1x128xf32>
    %10 = vector.shape_cast %9 : vector<1x128xf32> to vector<1x128xf32>
    %11 = vector.broadcast %10 : vector<1x128xf32> to vector<8x128xf32>
    %c0_10 = arith.constant 0 : index
    %c0_11 = arith.constant 0 : index
    %12 = vector.load %arg8[%c0_10, %c0_11] : memref<1x128xf32, #tpu.memory_space<vmem>>, vector<1x128xf32>
    %13 = vector.shape_cast %12 : vector<1x128xf32> to vector<1x128xf32>
    %14 = vector.broadcast %13 : vector<1x128xf32> to vector<8x128xf32>
    %c0_12 = arith.constant 0 : index
    %c0_13 = arith.constant 0 : index
    %15 = vector.load %arg10[%c0_12, %c0_13] : memref<1x128xf32, #tpu.memory_space<vmem>>, vector<1x128xf32>
    %16 = vector.shape_cast %15 : vector<1x128xf32> to vector<1x128xf32>
    %17 = vector.broadcast %16 : vector<1x128xf32> to vector<8x128xf32>
    %c8_i32 = arith.constant 8 : i32
    %18 = arith.muli %arg1, %c8_i32 : i32
    %c0_14 = arith.constant 0 : index
    %c0_15 = arith.constant 0 : index
    %19 = vector.load %arg12[%c0_14, %c0_15] : memref<8x128xf32, #tpu.memory_space<vmem>>, vector<8x128xf32>
    %c0_16 = arith.constant 0 : index
    %c0_17 = arith.constant 0 : index
    %c0_18 = arith.constant 0 : index
    %20 = vector.load %arg2[%c0_16, %c0_17, %c0_18] : memref<8x8x128xf32, #tpu.memory_space<vmem>>, vector<1x8x128xf32>
    %21 = vector.shape_cast %20 : vector<1x8x128xf32> to vector<8x128xf32>
    %22 = arith.truncf %21 : vector<8x128xf32> to vector<8x128xbf16>
    %cst = arith.constant dense<0.000000e+00> : vector<8x384xf32>
    %23 = tpu.matmul %22, %3, %cst {dimension_numbers = #tpu.dot_dimension_numbers<[1], [0], [0], [1], [0, 0, 1, 1], [], []>} : vector<8x128xbf16>, vector<128x384xbf16>, vector<8x384xf32> -> vector<8x384xf32>
    %24 = arith.truncf %19 : vector<8x128xf32> to vector<8x128xbf16>
    %cst_19 = arith.constant dense<0.000000e+00> : vector<8x384xf32>
    %25 = tpu.matmul %24, %4, %cst_19 {dimension_numbers = #tpu.dot_dimension_numbers<[1], [0], [0], [1], [0, 0, 1, 1], [], []>} : vector<8x128xbf16>, vector<128x384xbf16>, vector<8x384xf32> -> vector<8x384xf32>
    %26 = vector.extract_strided_slice %23 {offsets = [0, 0], sizes = [8, 256], strides = [1, 1]} : vector<8x384xf32> to vector<8x256xf32>
    %27 = vector.extract_strided_slice %25 {offsets = [0, 0], sizes = [8, 256], strides = [1, 1]} : vector<8x384xf32> to vector<8x256xf32>
    %28 = arith.addf %26, %27 : vector<8x256xf32>
    %29 = arith.addf %28, %8 : vector<8x256xf32>
    %30 = arith.negf %29 : vector<8x256xf32>
    %31 = math.exp %30 : vector<8x256xf32>
    %cst_20 = arith.constant 1.000000e+00 : f32
    %32 = vector.broadcast %cst_20 : f32 to vector<8x256xf32>
    %33 = arith.addf %32, %31 : vector<8x256xf32>
    %34 = arith.divf %32, %33 : vector<8x256xf32>
    %35 = vector.extract_strided_slice %34 {offsets = [0, 0], sizes = [8, 128], strides = [1, 1]} : vector<8x256xf32> to vector<8x128xf32>
    %36 = vector.extract_strided_slice %34 {offsets = [0, 128], sizes = [8, 128], strides = [1, 1]} : vector<8x256xf32> to vector<8x128xf32>
    %37 = vector.extract_strided_slice %23 {offsets = [0, 256], sizes = [8, 128], strides = [1, 1]} : vector<8x384xf32> to vector<8x128xf32>
    %38 = arith.addf %37, %11 : vector<8x128xf32>
    %39 = vector.extract_strided_slice %25 {offsets = [0, 256], sizes = [8, 128], strides = [1, 1]} : vector<8x384xf32> to vector<8x128xf32>
    %40 = arith.addf %39, %14 : vector<8x128xf32>
    %41 = arith.mulf %35, %40 : vector<8x128xf32>
    %42 = arith.addf %38, %41 : vector<8x128xf32>
    %43 = math.tanh %42 : vector<8x128xf32>
    %44 = arith.subf %19, %43 : vector<8x128xf32>
    %45 = arith.mulf %36, %44 : vector<8x128xf32>
    %46 = arith.addf %43, %45 : vector<8x128xf32>
    %47 = arith.truncf %46 : vector<8x128xf32> to vector<8x128xbf16>
    %cst_21 = arith.constant dense<0.000000e+00> : vector<8x128xf32>
    %48 = tpu.matmul %47, %5, %cst_21 {dimension_numbers = #tpu.dot_dimension_numbers<[1], [0], [0], [1], [0, 0, 1, 1], [], []>} : vector<8x128xbf16>, vector<128x128xbf16>, vector<8x128xf32> -> vector<8x128xf32>
    %49 = arith.addf %48, %17 : vector<8x128xf32>
    %50 = arith.addf %21, %49 : vector<8x128xf32>
    %c0_22 = arith.constant 0 : index
    %c0_23 = arith.constant 0 : index
    %c0_24 = arith.constant 0 : index
    %51 = vector.load %arg11[%c0_22, %c0_23, %c0_24] : memref<8x8x128xf32, #tpu.memory_space<vmem>>, vector<1x8x128xf32>
    %52 = vector.shape_cast %51 : vector<1x8x128xf32> to vector<8x128xf32>
    %53 = vector.shape_cast %50 : vector<8x128xf32> to vector<1x8x128xf32>
    tpu.vector_store %arg11[%c0_22, %c0_23, %c0_24], %53 {strides = array<i32>} : memref<8x8x128xf32, #tpu.memory_space<vmem>>, vector<1x8x128xf32>,
    %c0_i32_25 = arith.constant 0 : i32
    %54 = arith.addi %18, %c0_i32_25 : i32
    %c12_i32 = arith.constant 12 : i32
    %55 = arith.cmpi slt, %54, %c12_i32 : i32
    %56 = arith.select %55, %46, %19 : vector<8x128xf32>
    %c1 = arith.constant 1 : index
    %c0_26 = arith.constant 0 : index
    %c0_27 = arith.constant 0 : index
    %57 = vector.load %arg2[%c1, %c0_26, %c0_27] : memref<8x8x128xf32, #tpu.memory_space<vmem>>, vector<1x8x128xf32>
    %58 = vector.shape_cast %57 : vector<1x8x128xf32> to vector<8x128xf32>
    %59 = arith.truncf %58 : vector<8x128xf32> to vector<8x128xbf16>
    %cst_28 = arith.constant dense<0.000000e+00> : vector<8x384xf32>
    %60 = tpu.matmul %59, %3, %cst_28 {dimension_numbers = #tpu.dot_dimension_numbers<[1], [0], [0], [1], [0, 0, 1, 1], [], []>} : vector<8x128xbf16>, vector<128x384xbf16>, vector<8x384xf32> -> vector<8x384xf32>
    %61 = arith.truncf %56 : vector<8x128xf32> to vector<8x128xbf16>
    %cst_29 = arith.constant dense<0.000000e+00> : vector<8x384xf32>
    %62 = tpu.matmul %61, %4, %cst_29 {dimension_numbers = #tpu.dot_dimension_numbers<[1], [0], [0], [1], [0, 0, 1, 1], [], []>} : vector<8x128xbf16>, vector<128x384xbf16>, vector<8x384xf32> -> vector<8x384xf32>
    %63 = vector.extract_strided_slice %60 {offsets = [0, 0], sizes = [8, 256], strides = [1, 1]} : vector<8x384xf32> to vector<8x256xf32>
    %64 = vector.extract_strided_slice %62 {offsets = [0, 0], sizes = [8, 256], strides = [1, 1]} : vector<8x384xf32> to vector<8x256xf32>
    %65 = arith.addf %63, %64 : vector<8x256xf32>
    %66 = arith.addf %65, %8 : vector<8x256xf32>
    %67 = arith.negf %66 : vector<8x256xf32>
    %68 = math.exp %67 : vector<8x256xf32>
    %cst_30 = arith.constant 1.000000e+00 : f32
    %69 = vector.broadcast %cst_30 : f32 to vector<8x256xf32>
    %70 = arith.addf %69, %68 : vector<8x256xf32>
    %71 = arith.divf %69, %70 : vector<8x256xf32>
    %72 = vector.extract_strided_slice %71 {offsets = [0, 0], sizes = [8, 128], strides = [1, 1]} : vector<8x256xf32> to vector<8x128xf32>
    %73 = vector.extract_strided_slice %71 {offsets = [0, 128], sizes = [8, 128], strides = [1, 1]} : vector<8x256xf32> to vector<8x128xf32>
    %74 = vector.extract_strided_slice %60 {offsets = [0, 256], sizes = [8, 128], strides = [1, 1]} : vector<8x384xf32> to vector<8x128xf32>
    %75 = arith.addf %74, %11 : vector<8x128xf32>
    %76 = vector.extract_strided_slice %62 {offsets = [0, 256], sizes = [8, 128], strides = [1, 1]} : vector<8x384xf32> to vector<8x128xf32>
    %77 = arith.addf %76, %14 : vector<8x128xf32>
    %78 = arith.mulf %72, %77 : vector<8x128xf32>
    %79 = arith.addf %75, %78 : vector<8x128xf32>
    %80 = math.tanh %79 : vector<8x128xf32>
    %81 = arith.subf %56, %80 : vector<8x128xf32>
    %82 = arith.mulf %73, %81 : vector<8x128xf32>
    %83 = arith.addf %80, %82 : vector<8x128xf32>
    %84 = arith.truncf %83 : vector<8x128xf32> to vector<8x128xbf16>
    %cst_31 = arith.constant dense<0.000000e+00> : vector<8x128xf32>
    %85 = tpu.matmul %84, %5, %cst_31 {dimension_numbers = #tpu.dot_dimension_numbers<[1], [0], [0], [1], [0, 0, 1, 1], [], []>} : vector<8x128xbf16>, vector<128x128xbf16>, vector<8x128xf32> -> vector<8x128xf32>
    %86 = arith.addf %85, %17 : vector<8x128xf32>
    %87 = arith.addf %58, %86 : vector<8x128xf32>
    %c1_32 = arith.constant 1 : index
    %c0_33 = arith.constant 0 : index
    %c0_34 = arith.constant 0 : index
    %88 = vector.load %arg11[%c1_32, %c0_33, %c0_34] : memref<8x8x128xf32, #tpu.memory_space<vmem>>, vector<1x8x128xf32>
    %89 = vector.shape_cast %88 : vector<1x8x128xf32> to vector<8x128xf32>
    %90 = vector.shape_cast %87 : vector<8x128xf32> to vector<1x8x128xf32>
    tpu.vector_store %arg11[%c1_32, %c0_33, %c0_34], %90 {strides = array<i32>} : memref<8x8x128xf32, #tpu.memory_space<vmem>>, vector<1x8x128xf32>,
    %c1_i32 = arith.constant 1 : i32
    %91 = arith.addi %18, %c1_i32 : i32
    %c12_i32_35 = arith.constant 12 : i32
    %92 = arith.cmpi slt, %91, %c12_i32_35 : i32
    %93 = arith.select %92, %83, %56 : vector<8x128xf32>
    %c2 = arith.constant 2 : index
    %c0_36 = arith.constant 0 : index
    %c0_37 = arith.constant 0 : index
    %94 = vector.load %arg2[%c2, %c0_36, %c0_37] : memref<8x8x128xf32, #tpu.memory_space<vmem>>, vector<1x8x128xf32>
    %95 = vector.shape_cast %94 : vector<1x8x128xf32> to vector<8x128xf32>
    %96 = arith.truncf %95 : vector<8x128xf32> to vector<8x128xbf16>
    %cst_38 = arith.constant dense<0.000000e+00> : vector<8x384xf32>
    %97 = tpu.matmul %96, %3, %cst_38 {dimension_numbers = #tpu.dot_dimension_numbers<[1], [0], [0], [1], [0, 0, 1, 1], [], []>} : vector<8x128xbf16>, vector<128x384xbf16>, vector<8x384xf32> -> vector<8x384xf32>
    %98 = arith.truncf %93 : vector<8x128xf32> to vector<8x128xbf16>
    %cst_39 = arith.constant dense<0.000000e+00> : vector<8x384xf32>
    %99 = tpu.matmul %98, %4, %cst_39 {dimension_numbers = #tpu.dot_dimension_numbers<[1], [0], [0], [1], [0, 0, 1, 1], [], []>} : vector<8x128xbf16>, vector<128x384xbf16>, vector<8x384xf32> -> vector<8x384xf32>
    %100 = vector.extract_strided_slice %97 {offsets = [0, 0], sizes = [8, 256], strides = [1, 1]} : vector<8x384xf32> to vector<8x256xf32>
    %101 = vector.extract_strided_slice %99 {offsets = [0, 0], sizes = [8, 256], strides = [1, 1]} : vector<8x384xf32> to vector<8x256xf32>
    %102 = arith.addf %100, %101 : vector<8x256xf32>
    %103 = arith.addf %102, %8 : vector<8x256xf32>
    %104 = arith.negf %103 : vector<8x256xf32>
    %105 = math.exp %104 : vector<8x256xf32>
    %cst_40 = arith.constant 1.000000e+00 : f32
    %106 = vector.broadcast %cst_40 : f32 to vector<8x256xf32>
    %107 = arith.addf %106, %105 : vector<8x256xf32>
    %108 = arith.divf %106, %107 : vector<8x256xf32>
    %109 = vector.extract_strided_slice %108 {offsets = [0, 0], sizes = [8, 128], strides = [1, 1]} : vector<8x256xf32> to vector<8x128xf32>
    %110 = vector.extract_strided_slice %108 {offsets = [0, 128], sizes = [8, 128], strides = [1, 1]} : vector<8x256xf32> to vector<8x128xf32>
    %111 = vector.extract_strided_slice %97 {offsets = [0, 256], sizes = [8, 128], strides = [1, 1]} : vector<8x384xf32> to vector<8x128xf32>
    %112 = arith.addf %111, %11 : vector<8x128xf32>
    %113 = vector.extract_strided_slice %99 {offsets = [0, 256], sizes = [8, 128], strides = [1, 1]} : vector<8x384xf32> to vector<8x128xf32>
    %114 = arith.addf %113, %14 : vector<8x128xf32>
    %115 = arith.mulf %109, %114 : vector<8x128xf32>
    %116 = arith.addf %112, %115 : vector<8x128xf32>
    %117 = math.tanh %116 : vector<8x128xf32>
    %118 = arith.subf %93, %117 : vector<8x128xf32>
    %119 = arith.mulf %110, %118 : vector<8x128xf32>
    %120 = arith.addf %117, %119 : vector<8x128xf32>
    %121 = arith.truncf %120 : vector<8x128xf32> to vector<8x128xbf16>
    %cst_41 = arith.constant dense<0.000000e+00> : vector<8x128xf32>
    %122 = tpu.matmul %121, %5, %cst_41 {dimension_numbers = #tpu.dot_dimension_numbers<[1], [0], [0], [1], [0, 0, 1, 1], [], []>} : vector<8x128xbf16>, vector<128x128xbf16>, vector<8x128xf32> -> vector<8x128xf32>
    %123 = arith.addf %122, %17 : vector<8x128xf32>
    %124 = arith.addf %95, %123 : vector<8x128xf32>
    %c2_42 = arith.constant 2 : index
    %c0_43 = arith.constant 0 : index
    %c0_44 = arith.constant 0 : index
    %125 = vector.load %arg11[%c2_42, %c0_43, %c0_44] : memref<8x8x128xf32, #tpu.memory_space<vmem>>, vector<1x8x128xf32>
    %126 = vector.shape_cast %125 : vector<1x8x128xf32> to vector<8x128xf32>
    %127 = vector.shape_cast %124 : vector<8x128xf32> to vector<1x8x128xf32>
    tpu.vector_store %arg11[%c2_42, %c0_43, %c0_44], %127 {strides = array<i32>} : memref<8x8x128xf32, #tpu.memory_space<vmem>>, vector<1x8x128xf32>,
    %c2_i32 = arith.constant 2 : i32
    %128 = arith.addi %18, %c2_i32 : i32
    %c12_i32_45 = arith.constant 12 : i32
    %129 = arith.cmpi slt, %128, %c12_i32_45 : i32
    %130 = arith.select %129, %120, %93 : vector<8x128xf32>
    %c3 = arith.constant 3 : index
    %c0_46 = arith.constant 0 : index
    %c0_47 = arith.constant 0 : index
    %131 = vector.load %arg2[%c3, %c0_46, %c0_47] : memref<8x8x128xf32, #tpu.memory_space<vmem>>, vector<1x8x128xf32>
    %132 = vector.shape_cast %131 : vector<1x8x128xf32> to vector<8x128xf32>
    %133 = arith.truncf %132 : vector<8x128xf32> to vector<8x128xbf16>
    %cst_48 = arith.constant dense<0.000000e+00> : vector<8x384xf32>
    %134 = tpu.matmul %133, %3, %cst_48 {dimension_numbers = #tpu.dot_dimension_numbers<[1], [0], [0], [1], [0, 0, 1, 1], [], []>} : vector<8x128xbf16>, vector<128x384xbf16>, vector<8x384xf32> -> vector<8x384xf32>
    %135 = arith.truncf %130 : vector<8x128xf32> to vector<8x128xbf16>
    %cst_49 = arith.constant dense<0.000000e+00> : vector<8x384xf32>
    %136 = tpu.matmul %135, %4, %cst_49 {dimension_numbers = #tpu.dot_dimension_numbers<[1], [0], [0], [1], [0, 0, 1, 1], [], []>} : vector<8x128xbf16>, vector<128x384xbf16>, vector<8x384xf32> -> vector<8x384xf32>
    %137 = vector.extract_strided_slice %134 {offsets = [0, 0], sizes = [8, 256], strides = [1, 1]} : vector<8x384xf32> to vector<8x256xf32>
    %138 = vector.extract_strided_slice %136 {offsets = [0, 0], sizes = [8, 256], strides = [1, 1]} : vector<8x384xf32> to vector<8x256xf32>
    %139 = arith.addf %137, %138 : vector<8x256xf32>
    %140 = arith.addf %139, %8 : vector<8x256xf32>
    %141 = arith.negf %140 : vector<8x256xf32>
    %142 = math.exp %141 : vector<8x256xf32>
    %cst_50 = arith.constant 1.000000e+00 : f32
    %143 = vector.broadcast %cst_50 : f32 to vector<8x256xf32>
    %144 = arith.addf %143, %142 : vector<8x256xf32>
    %145 = arith.divf %143, %144 : vector<8x256xf32>
    %146 = vector.extract_strided_slice %145 {offsets = [0, 0], sizes = [8, 128], strides = [1, 1]} : vector<8x256xf32> to vector<8x128xf32>
    %147 = vector.extract_strided_slice %145 {offsets = [0, 128], sizes = [8, 128], strides = [1, 1]} : vector<8x256xf32> to vector<8x128xf32>
    %148 = vector.extract_strided_slice %134 {offsets = [0, 256], sizes = [8, 128], strides = [1, 1]} : vector<8x384xf32> to vector<8x128xf32>
    %149 = arith.addf %148, %11 : vector<8x128xf32>
    %150 = vector.extract_strided_slice %136 {offsets = [0, 256], sizes = [8, 128], strides = [1, 1]} : vector<8x384xf32> to vector<8x128xf32>
    %151 = arith.addf %150, %14 : vector<8x128xf32>
    %152 = arith.mulf %146, %151 : vector<8x128xf32>
    %153 = arith.addf %149, %152 : vector<8x128xf32>
    %154 = math.tanh %153 : vector<8x128xf32>
    %155 = arith.subf %130, %154 : vector<8x128xf32>
    %156 = arith.mulf %147, %155 : vector<8x128xf32>
    %157 = arith.addf %154, %156 : vector<8x128xf32>
    %158 = arith.truncf %157 : vector<8x128xf32> to vector<8x128xbf16>
    %cst_51 = arith.constant dense<0.000000e+00> : vector<8x128xf32>
    %159 = tpu.matmul %158, %5, %cst_51 {dimension_numbers = #tpu.dot_dimension_numbers<[1], [0], [0], [1], [0, 0, 1, 1], [], []>} : vector<8x128xbf16>, vector<128x128xbf16>, vector<8x128xf32> -> vector<8x128xf32>
    %160 = arith.addf %159, %17 : vector<8x128xf32>
    %161 = arith.addf %132, %160 : vector<8x128xf32>
    %c3_52 = arith.constant 3 : index
    %c0_53 = arith.constant 0 : index
    %c0_54 = arith.constant 0 : index
    %162 = vector.load %arg11[%c3_52, %c0_53, %c0_54] : memref<8x8x128xf32, #tpu.memory_space<vmem>>, vector<1x8x128xf32>
    %163 = vector.shape_cast %162 : vector<1x8x128xf32> to vector<8x128xf32>
    %164 = vector.shape_cast %161 : vector<8x128xf32> to vector<1x8x128xf32>
    tpu.vector_store %arg11[%c3_52, %c0_53, %c0_54], %164 {strides = array<i32>} : memref<8x8x128xf32, #tpu.memory_space<vmem>>, vector<1x8x128xf32>,
    %c3_i32 = arith.constant 3 : i32
    %165 = arith.addi %18, %c3_i32 : i32
    %c12_i32_55 = arith.constant 12 : i32
    %166 = arith.cmpi slt, %165, %c12_i32_55 : i32
    %167 = arith.select %166, %157, %130 : vector<8x128xf32>
    %c4 = arith.constant 4 : index
    %c0_56 = arith.constant 0 : index
    %c0_57 = arith.constant 0 : index
    %168 = vector.load %arg2[%c4, %c0_56, %c0_57] : memref<8x8x128xf32, #tpu.memory_space<vmem>>, vector<1x8x128xf32>
    %169 = vector.shape_cast %168 : vector<1x8x128xf32> to vector<8x128xf32>
    %170 = arith.truncf %169 : vector<8x128xf32> to vector<8x128xbf16>
    %cst_58 = arith.constant dense<0.000000e+00> : vector<8x384xf32>
    %171 = tpu.matmul %170, %3, %cst_58 {dimension_numbers = #tpu.dot_dimension_numbers<[1], [0], [0], [1], [0, 0, 1, 1], [], []>} : vector<8x128xbf16>, vector<128x384xbf16>, vector<8x384xf32> -> vector<8x384xf32>
    %172 = arith.truncf %167 : vector<8x128xf32> to vector<8x128xbf16>
    %cst_59 = arith.constant dense<0.000000e+00> : vector<8x384xf32>
    %173 = tpu.matmul %172, %4, %cst_59 {dimension_numbers = #tpu.dot_dimension_numbers<[1], [0], [0], [1], [0, 0, 1, 1], [], []>} : vector<8x128xbf16>, vector<128x384xbf16>, vector<8x384xf32> -> vector<8x384xf32>
    %174 = vector.extract_strided_slice %171 {offsets = [0, 0], sizes = [8, 256], strides = [1, 1]} : vector<8x384xf32> to vector<8x256xf32>
    %175 = vector.extract_strided_slice %173 {offsets = [0, 0], sizes = [8, 256], strides = [1, 1]} : vector<8x384xf32> to vector<8x256xf32>
    %176 = arith.addf %174, %175 : vector<8x256xf32>
    %177 = arith.addf %176, %8 : vector<8x256xf32>
    %178 = arith.negf %177 : vector<8x256xf32>
    %179 = math.exp %178 : vector<8x256xf32>
    %cst_60 = arith.constant 1.000000e+00 : f32
    %180 = vector.broadcast %cst_60 : f32 to vector<8x256xf32>
    %181 = arith.addf %180, %179 : vector<8x256xf32>
    %182 = arith.divf %180, %181 : vector<8x256xf32>
    %183 = vector.extract_strided_slice %182 {offsets = [0, 0], sizes = [8, 128], strides = [1, 1]} : vector<8x256xf32> to vector<8x128xf32>
    %184 = vector.extract_strided_slice %182 {offsets = [0, 128], sizes = [8, 128], strides = [1, 1]} : vector<8x256xf32> to vector<8x128xf32>
    %185 = vector.extract_strided_slice %171 {offsets = [0, 256], sizes = [8, 128], strides = [1, 1]} : vector<8x384xf32> to vector<8x128xf32>
    %186 = arith.addf %185, %11 : vector<8x128xf32>
    %187 = vector.extract_strided_slice %173 {offsets = [0, 256], sizes = [8, 128], strides = [1, 1]} : vector<8x384xf32> to vector<8x128xf32>
    %188 = arith.addf %187, %14 : vector<8x128xf32>
    %189 = arith.mulf %183, %188 : vector<8x128xf32>
    %190 = arith.addf %186, %189 : vector<8x128xf32>
    %191 = math.tanh %190 : vector<8x128xf32>
    %192 = arith.subf %167, %191 : vector<8x128xf32>
    %193 = arith.mulf %184, %192 : vector<8x128xf32>
    %194 = arith.addf %191, %193 : vector<8x128xf32>
    %195 = arith.truncf %194 : vector<8x128xf32> to vector<8x128xbf16>
    %cst_61 = arith.constant dense<0.000000e+00> : vector<8x128xf32>
    %196 = tpu.matmul %195, %5, %cst_61 {dimension_numbers = #tpu.dot_dimension_numbers<[1], [0], [0], [1], [0, 0, 1, 1], [], []>} : vector<8x128xbf16>, vector<128x128xbf16>, vector<8x128xf32> -> vector<8x128xf32>
    %197 = arith.addf %196, %17 : vector<8x128xf32>
    %198 = arith.addf %169, %197 : vector<8x128xf32>
    %c4_62 = arith.constant 4 : index
    %c0_63 = arith.constant 0 : index
    %c0_64 = arith.constant 0 : index
    %199 = vector.load %arg11[%c4_62, %c0_63, %c0_64] : memref<8x8x128xf32, #tpu.memory_space<vmem>>, vector<1x8x128xf32>
    %200 = vector.shape_cast %199 : vector<1x8x128xf32> to vector<8x128xf32>
    %201 = vector.shape_cast %198 : vector<8x128xf32> to vector<1x8x128xf32>
    tpu.vector_store %arg11[%c4_62, %c0_63, %c0_64], %201 {strides = array<i32>} : memref<8x8x128xf32, #tpu.memory_space<vmem>>, vector<1x8x128xf32>,
    %c4_i32 = arith.constant 4 : i32
    %202 = arith.addi %18, %c4_i32 : i32
    %c12_i32_65 = arith.constant 12 : i32
    %203 = arith.cmpi slt, %202, %c12_i32_65 : i32
    %204 = arith.select %203, %194, %167 : vector<8x128xf32>
    %c5 = arith.constant 5 : index
    %c0_66 = arith.constant 0 : index
    %c0_67 = arith.constant 0 : index
    %205 = vector.load %arg2[%c5, %c0_66, %c0_67] : memref<8x8x128xf32, #tpu.memory_space<vmem>>, vector<1x8x128xf32>
    %206 = vector.shape_cast %205 : vector<1x8x128xf32> to vector<8x128xf32>
    %207 = arith.truncf %206 : vector<8x128xf32> to vector<8x128xbf16>
    %cst_68 = arith.constant dense<0.000000e+00> : vector<8x384xf32>
    %208 = tpu.matmul %207, %3, %cst_68 {dimension_numbers = #tpu.dot_dimension_numbers<[1], [0], [0], [1], [0, 0, 1, 1], [], []>} : vector<8x128xbf16>, vector<128x384xbf16>, vector<8x384xf32> -> vector<8x384xf32>
    %209 = arith.truncf %204 : vector<8x128xf32> to vector<8x128xbf16>
    %cst_69 = arith.constant dense<0.000000e+00> : vector<8x384xf32>
    %210 = tpu.matmul %209, %4, %cst_69 {dimension_numbers = #tpu.dot_dimension_numbers<[1], [0], [0], [1], [0, 0, 1, 1], [], []>} : vector<8x128xbf16>, vector<128x384xbf16>, vector<8x384xf32> -> vector<8x384xf32>
    %211 = vector.extract_strided_slice %208 {offsets = [0, 0], sizes = [8, 256], strides = [1, 1]} : vector<8x384xf32> to vector<8x256xf32>
    %212 = vector.extract_strided_slice %210 {offsets = [0, 0], sizes = [8, 256], strides = [1, 1]} : vector<8x384xf32> to vector<8x256xf32>
    %213 = arith.addf %211, %212 : vector<8x256xf32>
    %214 = arith.addf %213, %8 : vector<8x256xf32>
    %215 = arith.negf %214 : vector<8x256xf32>
    %216 = math.exp %215 : vector<8x256xf32>
    %cst_70 = arith.constant 1.000000e+00 : f32
    %217 = vector.broadcast %cst_70 : f32 to vector<8x256xf32>
    %218 = arith.addf %217, %216 : vector<8x256xf32>
    %219 = arith.divf %217, %218 : vector<8x256xf32>
    %220 = vector.extract_strided_slice %219 {offsets = [0, 0], sizes = [8, 128], strides = [1, 1]} : vector<8x256xf32> to vector<8x128xf32>
    %221 = vector.extract_strided_slice %219 {offsets = [0, 128], sizes = [8, 128], strides = [1, 1]} : vector<8x256xf32> to vector<8x128xf32>
    %222 = vector.extract_strided_slice %208 {offsets = [0, 256], sizes = [8, 128], strides = [1, 1]} : vector<8x384xf32> to vector<8x128xf32>
    %223 = arith.addf %222, %11 : vector<8x128xf32>
    %224 = vector.extract_strided_slice %210 {offsets = [0, 256], sizes = [8, 128], strides = [1, 1]} : vector<8x384xf32> to vector<8x128xf32>
    %225 = arith.addf %224, %14 : vector<8x128xf32>
    %226 = arith.mulf %220, %225 : vector<8x128xf32>
    %227 = arith.addf %223, %226 : vector<8x128xf32>
    %228 = math.tanh %227 : vector<8x128xf32>
    %229 = arith.subf %204, %228 : vector<8x128xf32>
    %230 = arith.mulf %221, %229 : vector<8x128xf32>
    %231 = arith.addf %228, %230 : vector<8x128xf32>
    %232 = arith.truncf %231 : vector<8x128xf32> to vector<8x128xbf16>
    %cst_71 = arith.constant dense<0.000000e+00> : vector<8x128xf32>
    %233 = tpu.matmul %232, %5, %cst_71 {dimension_numbers = #tpu.dot_dimension_numbers<[1], [0], [0], [1], [0, 0, 1, 1], [], []>} : vector<8x128xbf16>, vector<128x128xbf16>, vector<8x128xf32> -> vector<8x128xf32>
    %234 = arith.addf %233, %17 : vector<8x128xf32>
    %235 = arith.addf %206, %234 : vector<8x128xf32>
    %c5_72 = arith.constant 5 : index
    %c0_73 = arith.constant 0 : index
    %c0_74 = arith.constant 0 : index
    %236 = vector.load %arg11[%c5_72, %c0_73, %c0_74] : memref<8x8x128xf32, #tpu.memory_space<vmem>>, vector<1x8x128xf32>
    %237 = vector.shape_cast %236 : vector<1x8x128xf32> to vector<8x128xf32>
    %238 = vector.shape_cast %235 : vector<8x128xf32> to vector<1x8x128xf32>
    tpu.vector_store %arg11[%c5_72, %c0_73, %c0_74], %238 {strides = array<i32>} : memref<8x8x128xf32, #tpu.memory_space<vmem>>, vector<1x8x128xf32>,
    %c5_i32 = arith.constant 5 : i32
    %239 = arith.addi %18, %c5_i32 : i32
    %c12_i32_75 = arith.constant 12 : i32
    %240 = arith.cmpi slt, %239, %c12_i32_75 : i32
    %241 = arith.select %240, %231, %204 : vector<8x128xf32>
    %c6 = arith.constant 6 : index
    %c0_76 = arith.constant 0 : index
    %c0_77 = arith.constant 0 : index
    %242 = vector.load %arg2[%c6, %c0_76, %c0_77] : memref<8x8x128xf32, #tpu.memory_space<vmem>>, vector<1x8x128xf32>
    %243 = vector.shape_cast %242 : vector<1x8x128xf32> to vector<8x128xf32>
    %244 = arith.truncf %243 : vector<8x128xf32> to vector<8x128xbf16>
    %cst_78 = arith.constant dense<0.000000e+00> : vector<8x384xf32>
    %245 = tpu.matmul %244, %3, %cst_78 {dimension_numbers = #tpu.dot_dimension_numbers<[1], [0], [0], [1], [0, 0, 1, 1], [], []>} : vector<8x128xbf16>, vector<128x384xbf16>, vector<8x384xf32> -> vector<8x384xf32>
    %246 = arith.truncf %241 : vector<8x128xf32> to vector<8x128xbf16>
    %cst_79 = arith.constant dense<0.000000e+00> : vector<8x384xf32>
    %247 = tpu.matmul %246, %4, %cst_79 {dimension_numbers = #tpu.dot_dimension_numbers<[1], [0], [0], [1], [0, 0, 1, 1], [], []>} : vector<8x128xbf16>, vector<128x384xbf16>, vector<8x384xf32> -> vector<8x384xf32>
    %248 = vector.extract_strided_slice %245 {offsets = [0, 0], sizes = [8, 256], strides = [1, 1]} : vector<8x384xf32> to vector<8x256xf32>
    %249 = vector.extract_strided_slice %247 {offsets = [0, 0], sizes = [8, 256], strides = [1, 1]} : vector<8x384xf32> to vector<8x256xf32>
    %250 = arith.addf %248, %249 : vector<8x256xf32>
    %251 = arith.addf %250, %8 : vector<8x256xf32>
    %252 = arith.negf %251 : vector<8x256xf32>
    %253 = math.exp %252 : vector<8x256xf32>
    %cst_80 = arith.constant 1.000000e+00 : f32
    %254 = vector.broadcast %cst_80 : f32 to vector<8x256xf32>
    %255 = arith.addf %254, %253 : vector<8x256xf32>
    %256 = arith.divf %254, %255 : vector<8x256xf32>
    %257 = vector.extract_strided_slice %256 {offsets = [0, 0], sizes = [8, 128], strides = [1, 1]} : vector<8x256xf32> to vector<8x128xf32>
    %258 = vector.extract_strided_slice %256 {offsets = [0, 128], sizes = [8, 128], strides = [1, 1]} : vector<8x256xf32> to vector<8x128xf32>
    %259 = vector.extract_strided_slice %245 {offsets = [0, 256], sizes = [8, 128], strides = [1, 1]} : vector<8x384xf32> to vector<8x128xf32>
    %260 = arith.addf %259, %11 : vector<8x128xf32>
    %261 = vector.extract_strided_slice %247 {offsets = [0, 256], sizes = [8, 128], strides = [1, 1]} : vector<8x384xf32> to vector<8x128xf32>
    %262 = arith.addf %261, %14 : vector<8x128xf32>
    %263 = arith.mulf %257, %262 : vector<8x128xf32>
    %264 = arith.addf %260, %263 : vector<8x128xf32>
    %265 = math.tanh %264 : vector<8x128xf32>
    %266 = arith.subf %241, %265 : vector<8x128xf32>
    %267 = arith.mulf %258, %266 : vector<8x128xf32>
    %268 = arith.addf %265, %267 : vector<8x128xf32>
    %269 = arith.truncf %268 : vector<8x128xf32> to vector<8x128xbf16>
    %cst_81 = arith.constant dense<0.000000e+00> : vector<8x128xf32>
    %270 = tpu.matmul %269, %5, %cst_81 {dimension_numbers = #tpu.dot_dimension_numbers<[1], [0], [0], [1], [0, 0, 1, 1], [], []>} : vector<8x128xbf16>, vector<128x128xbf16>, vector<8x128xf32> -> vector<8x128xf32>
    %271 = arith.addf %270, %17 : vector<8x128xf32>
    %272 = arith.addf %243, %271 : vector<8x128xf32>
    %c6_82 = arith.constant 6 : index
    %c0_83 = arith.constant 0 : index
    %c0_84 = arith.constant 0 : index
    %273 = vector.load %arg11[%c6_82, %c0_83, %c0_84] : memref<8x8x128xf32, #tpu.memory_space<vmem>>, vector<1x8x128xf32>
    %274 = vector.shape_cast %273 : vector<1x8x128xf32> to vector<8x128xf32>
    %275 = vector.shape_cast %272 : vector<8x128xf32> to vector<1x8x128xf32>
    tpu.vector_store %arg11[%c6_82, %c0_83, %c0_84], %275 {strides = array<i32>} : memref<8x8x128xf32, #tpu.memory_space<vmem>>, vector<1x8x128xf32>,
    %c6_i32 = arith.constant 6 : i32
    %276 = arith.addi %18, %c6_i32 : i32
    %c12_i32_85 = arith.constant 12 : i32
    %277 = arith.cmpi slt, %276, %c12_i32_85 : i32
    %278 = arith.select %277, %268, %241 : vector<8x128xf32>
    %c7 = arith.constant 7 : index
    %c0_86 = arith.constant 0 : index
    %c0_87 = arith.constant 0 : index
    %279 = vector.load %arg2[%c7, %c0_86, %c0_87] : memref<8x8x128xf32, #tpu.memory_space<vmem>>, vector<1x8x128xf32>
    %280 = vector.shape_cast %279 : vector<1x8x128xf32> to vector<8x128xf32>
    %281 = arith.truncf %280 : vector<8x128xf32> to vector<8x128xbf16>
    %cst_88 = arith.constant dense<0.000000e+00> : vector<8x384xf32>
    %282 = tpu.matmul %281, %3, %cst_88 {dimension_numbers = #tpu.dot_dimension_numbers<[1], [0], [0], [1], [0, 0, 1, 1], [], []>} : vector<8x128xbf16>, vector<128x384xbf16>, vector<8x384xf32> -> vector<8x384xf32>
    %283 = arith.truncf %278 : vector<8x128xf32> to vector<8x128xbf16>
    %cst_89 = arith.constant dense<0.000000e+00> : vector<8x384xf32>
    %284 = tpu.matmul %283, %4, %cst_89 {dimension_numbers = #tpu.dot_dimension_numbers<[1], [0], [0], [1], [0, 0, 1, 1], [], []>} : vector<8x128xbf16>, vector<128x384xbf16>, vector<8x384xf32> -> vector<8x384xf32>
    %285 = vector.extract_strided_slice %282 {offsets = [0, 0], sizes = [8, 256], strides = [1, 1]} : vector<8x384xf32> to vector<8x256xf32>
    %286 = vector.extract_strided_slice %284 {offsets = [0, 0], sizes = [8, 256], strides = [1, 1]} : vector<8x384xf32> to vector<8x256xf32>
    %287 = arith.addf %285, %286 : vector<8x256xf32>
    %288 = arith.addf %287, %8 : vector<8x256xf32>
    %289 = arith.negf %288 : vector<8x256xf32>
    %290 = math.exp %289 : vector<8x256xf32>
    %cst_90 = arith.constant 1.000000e+00 : f32
    %291 = vector.broadcast %cst_90 : f32 to vector<8x256xf32>
    %292 = arith.addf %291, %290 : vector<8x256xf32>
    %293 = arith.divf %291, %292 : vector<8x256xf32>
    %294 = vector.extract_strided_slice %293 {offsets = [0, 0], sizes = [8, 128], strides = [1, 1]} : vector<8x256xf32> to vector<8x128xf32>
    %295 = vector.extract_strided_slice %293 {offsets = [0, 128], sizes = [8, 128], strides = [1, 1]} : vector<8x256xf32> to vector<8x128xf32>
    %296 = vector.extract_strided_slice %282 {offsets = [0, 256], sizes = [8, 128], strides = [1, 1]} : vector<8x384xf32> to vector<8x128xf32>
    %297 = arith.addf %296, %11 : vector<8x128xf32>
    %298 = vector.extract_strided_slice %284 {offsets = [0, 256], sizes = [8, 128], strides = [1, 1]} : vector<8x384xf32> to vector<8x128xf32>
    %299 = arith.addf %298, %14 : vector<8x128xf32>
    %300 = arith.mulf %294, %299 : vector<8x128xf32>
    %301 = arith.addf %297, %300 : vector<8x128xf32>
    %302 = math.tanh %301 : vector<8x128xf32>
    %303 = arith.subf %278, %302 : vector<8x128xf32>
    %304 = arith.mulf %295, %303 : vector<8x128xf32>
    %305 = arith.addf %302, %304 : vector<8x128xf32>
    %306 = arith.truncf %305 : vector<8x128xf32> to vector<8x128xbf16>
    %cst_91 = arith.constant dense<0.000000e+00> : vector<8x128xf32>
    %307 = tpu.matmul %306, %5, %cst_91 {dimension_numbers = #tpu.dot_dimension_numbers<[1], [0], [0], [1], [0, 0, 1, 1], [], []>} : vector<8x128xbf16>, vector<128x128xbf16>, vector<8x128xf32> -> vector<8x128xf32>
    %308 = arith.addf %307, %17 : vector<8x128xf32>
    %309 = arith.addf %280, %308 : vector<8x128xf32>
    %c7_92 = arith.constant 7 : index
    %c0_93 = arith.constant 0 : index
    %c0_94 = arith.constant 0 : index
    %310 = vector.load %arg11[%c7_92, %c0_93, %c0_94] : memref<8x8x128xf32, #tpu.memory_space<vmem>>, vector<1x8x128xf32>
    %311 = vector.shape_cast %310 : vector<1x8x128xf32> to vector<8x128xf32>
    %312 = vector.shape_cast %309 : vector<8x128xf32> to vector<1x8x128xf32>
    tpu.vector_store %arg11[%c7_92, %c0_93, %c0_94], %312 {strides = array<i32>} : memref<8x8x128xf32, #tpu.memory_space<vmem>>, vector<1x8x128xf32>,
    %c7_i32 = arith.constant 7 : i32
    %313 = arith.addi %18, %c7_i32 : i32
    %c12_i32_95 = arith.constant 12 : i32
    %314 = arith.cmpi slt, %313, %c12_i32_95 : i32
    %315 = arith.select %314, %305, %278 : vector<8x128xf32>
    %c0_96 = arith.constant 0 : index
    %c0_97 = arith.constant 0 : index
    %316 = vector.load %arg12[%c0_96, %c0_97] : memref<8x128xf32, #tpu.memory_space<vmem>>, vector<8x128xf32>
    tpu.vector_store %arg12[%c0_96, %c0_97], %315 {strides = array<i32>} : memref<8x128xf32, #tpu.memory_space<vmem>>, vector<8x128xf32>,
    return
  }
  func.func @transform_0(%arg0: i32, %arg1: i32) -> (i32, i32, i32) {
    %c0_i32 = arith.constant 0 : i32
    %c0_i32_0 = arith.constant 0 : i32
    return %arg1, %arg0, %c0_i32 : i32, i32, i32
  }
  func.func @transform_1(%arg0: i32, %arg1: i32) -> (i32, i32) {
    %c0_i32 = arith.constant 0 : i32
    %c0_i32_0 = arith.constant 0 : i32
    return %arg0, %c0_i32 : i32, i32
  }
  func.func @transform_2(%arg0: i32, %arg1: i32) -> (i32, i32) {
    %c0_i32 = arith.constant 0 : i32
    %c0_i32_0 = arith.constant 0 : i32
    %c0_i32_1 = arith.constant 0 : i32
    return %c0_i32, %c0_i32_0 : i32, i32
  }
  func.func @transform_3(%arg0: i32, %arg1: i32) -> (i32, i32) {
    %c0_i32 = arith.constant 0 : i32
    %c0_i32_0 = arith.constant 0 : i32
    %c0_i32_1 = arith.constant 0 : i32
    return %c0_i32, %c0_i32_0 : i32, i32
  }
  func.func @transform_4(%arg0: i32, %arg1: i32) -> (i32, i32) {
    %c0_i32 = arith.constant 0 : i32
    %c0_i32_0 = arith.constant 0 : i32
    %c0_i32_1 = arith.constant 0 : i32
    return %c0_i32, %c0_i32_0 : i32, i32
  }
  func.func @transform_5(%arg0: i32, %arg1: i32) -> (i32, i32) {
    %c0_i32 = arith.constant 0 : i32
    %c0_i32_0 = arith.constant 0 : i32
    %c0_i32_1 = arith.constant 0 : i32
    return %c0_i32, %c0_i32_0 : i32, i32
  }
  func.func @transform_6(%arg0: i32, %arg1: i32) -> (i32, i32) {
    %c0_i32 = arith.constant 0 : i32
    %c0_i32_0 = arith.constant 0 : i32
    %c0_i32_1 = arith.constant 0 : i32
    return %c0_i32, %c0_i32_0 : i32, i32
  }
  func.func @transform_7(%arg0: i32, %arg1: i32) -> (i32, i32) {
    %c0_i32 = arith.constant 0 : i32
    %c0_i32_0 = arith.constant 0 : i32
    %c0_i32_1 = arith.constant 0 : i32
    return %c0_i32, %c0_i32_0 : i32, i32
  }
  func.func @transform_8(%arg0: i32, %arg1: i32) -> (i32, i32) {
    %c0_i32 = arith.constant 0 : i32
    %c0_i32_0 = arith.constant 0 : i32
    %c0_i32_1 = arith.constant 0 : i32
    return %c0_i32, %c0_i32_0 : i32, i32
  }
  func.func @transform_9(%arg0: i32, %arg1: i32) -> (i32, i32, i32) {
    %c0_i32 = arith.constant 0 : i32
    %c0_i32_0 = arith.constant 0 : i32
    return %arg1, %arg0, %c0_i32 : i32, i32, i32
  }
  func.func @transform_10(%arg0: i32, %arg1: i32) -> (i32, i32) {
    %c0_i32 = arith.constant 0 : i32
    %c0_i32_0 = arith.constant 0 : i32
    return %arg0, %c0_i32 : i32, i32
  }
}

</mosaic_0001>

<bundles_post_ra>
// kernel: decoder_cell_sequence.1
= control target key start
LH: loop header
LB: loop body
LE: loop exit
PB: predicated region body
PF: predicated region fallthrough
CT: control target
= control target key end

     0   :  { %s4023_s13 = smov 0   ;;  %s4025_s14 = smov 0   ;;  %s5631_s0 = inlined_call_operand.vmem [shape: f32[16,8,128], index: 0, kind: input, shape index: {}]   ;;  %s5632_s1 = inlined_call_operand.vmem [shape: f32[8,128], index: 1, kind: input, shape index: {}, may-alias: {1,10}]   ;;  %s5633_s2 = inlined_call_operand.vmem [shape: bf16[128,384], index: 2, kind: input, shape index: {}]   ;;  %s5634_s3 = inlined_call_operand.vmem [shape: bf16[128,384], index: 3, kind: input, shape index: {}]   ;;  %s5635_s4 = inlined_call_operand.vmem [shape: f32[1,256], index: 4, kind: input, shape index: {}]   ;;  %s5636_s5 = inlined_call_operand.vmem [shape: f32[1,128], index: 5, kind: input, shape index: {}]   ;;  %s5637_s6 = inlined_call_operand.vmem [shape: f32[1,128], index: 6, kind: input, shape index: {}]   ;;  %s5638_s7 = inlined_call_operand.vmem [shape: bf16[128,128], index: 7, kind: input, shape index: {}]   ;;  %s5639_s8 = inlined_call_operand.vmem [shape: f32[1,128], index: 8, kind: input, shape index: {}]   ;;  %s5640_s9 = inlined_call_operand.vmem [shape: f32[16,8,128], index: 9, kind: output, shape index: {0}]   ;;  %s5641_s10 = inlined_call_operand.vmem [shape: f32[8,128], index: 10, kind: output, shape index: {1}, may-alias: {1,10}]  }
   0x1   :  { %s4027_s15 = smov 0  }
   0x2 LB: > { %s30_s16 = sadd.s32 1, %s3959_s14  ;;  %p2892_p0 = scmp.ge.s32.totalorder %s3963_s15, 1  ;;  %s3963_s15 = sphi %s4027_s15, %s21_s15   ;;  %s3959_s14 = sphi %s4025_s14, %s5839_s14   ;;  %s3955_s13 = sphi %s4023_s13, %s5838_s13  }
   0x3   : > { %p31_p1 = scmp.ge.s32.totalorder %s30_s16, 2  ;;  %p344_p2 = scmp.lt.s32.totalorder %s3963_s15, 3 }
   0x5   : > { %s5841_s16 = smov (%p31_p1, %s30_s16), 0  ;;  %p345_p3 = pnand %p2892_p0, %p344_p2 }
   0x7   : > { %348 = sbr.rel (%p345_p3) target bundleno = 2678 (0xa76), region = 56 }
   0xe   : > { %s4041_s17 = sshll.u32 %s3955_s13, 3  ;;  %p2897_p5 = scmp.ne.s32.totalorder %s3955_s13, 0 }
   0xf   : > { %p397_p4 = scmp.lt.s32.totalorder %s4041_s17, 15  ;;  %v427_v0 = vld [vmem:[%s5632_s1] sm:$0xff] (!%p2897_p5) }
  0x10   : > { %426 = sbr.rel (%p2897_p5) target bundleno = 23 (0x17), region = 60  ;;  %428 = vst [vmem:[%s5641_s10] sm:$0xff] (!%p2897_p5), %v427_v0 }
  0x11   : > { %s398_s18 = scalar_select %p397_p4, %s4041_s17, 15 }
  0x13   : > { %s2894_s19 = sshll.u32 %s398_s18, 3 }
  0x14   : > { %s4048_s22 = scalar_lea.vmem %s5631_s0, %s2894_s19  ;;  %s4053_s25 = scalar_lea.vmem %s5640_s9, %s2894_s19 }
  0x17 PF: > { %v4064_v1 = vld [vmem:[%s5633_s2 + $0x4] ss:$12 sps:$4 sm:$0xff]   ;;  %v4069_v2 = vld [vmem:[%s5633_s2] ss:$12 sps:$4 sm:$0xff]   ;;  %v5666_v3 = vmov 0.0   ;;  %v5642_v4 = vmov 0  }
  0x18   : > { %3207 = vmatprep.subr.bf16.mxu1 %v5666_v3  ;;  %706 = vmatprep.mubr.bf16.mxu0 %v5642_v4  ;;  %v4077_v5 = vld [vmem:[%s5633_s2 + $0x1c] ss:$12 sps:$4 sm:$0xff]   ;;  %vm3967_vm0 = vmmov 0   ;;  %v4085_v6 = vld [vmem:[%s5633_s2 + $0x18] ss:$12 sps:$4 sm:$0xff]   ;;  %v4432_v59 = vld [vmem:[%s5638_s7 + $0x10] sm:$0xff]  }
  0x19   : > { %674 = vmatprep.subr.bf16.mxu0 %v4064_v1  ;;  %3223 = vmatprep.mubr.msk.bf16.mxu1 %vm3967_vm0, %v5666_v3  ;;  %v4091_v7 = vld [vmem:[%s5633_s2 + $0x34] ss:$12 sps:$4 sm:$0xff]   ;;  %v4097_v8 = vld [vmem:[%s5633_s2 + $0x30] ss:$12 sps:$4 sm:$0xff]   ;;  %v4103_v9 = vld [vmem:[%s5633_s2 + $0x4c] ss:$12 sps:$4 sm:$0xff]  }
  0x1a   : > { %675 = vmatpush1.bf16.msra.mxu0 %v4069_v2  ;;  %v4108_v10 = vld [vmem:[%s5633_s2 + $0x8] ss:$12 sps:$4 sm:$0xff]   ;;  %v4120_v12 = vld [vmem:[%s5633_s2 + $0x64] ss:$12 sps:$4 sm:$0xff]   ;;  %v4126_v13 = vld [vmem:[%s5633_s2 + $0x20] ss:$12 sps:$4 sm:$0xff]  }
  0x1b   : > { %676 = vmatprep.subr.bf16.mxu0 %v4077_v5  ;;  %v4114_v11 = vld [vmem:[%s5633_s2 + $0x48] ss:$12 sps:$4 sm:$0xff]   ;;  %3208 = vmatpush3.bf16.msra.mxu1 %v4108_v10  ;;  %v4133_v14 = vld [vmem:[%s5633_s2 + $0x60] ss:$12 sps:$4 sm:$0xff]   ;;  %v4145_v16 = vld [vmem:[%s5633_s2 + $0x38] ss:$12 sps:$4 sm:$0xff]  }
  0x1c   : > { %3209 = vmatprep.subr.bf16.mxu1 %v5666_v3  ;;  %v4139_v15 = vld [vmem:[%s5633_s2 + $0x7c] ss:$12 sps:$4 sm:$0xff]   ;;  %v4151_v17 = vld [vmem:[%s5633_s2 + $0x78] ss:$12 sps:$4 sm:$0xff]   ;;  %v4157_v18 = vld [vmem:[%s5633_s2 + $0x94] ss:$12 sps:$4 sm:$0xff]  }
  0x1d   : > { %v4164_v19 = vld [vmem:[%s5633_s2 + $0x50] ss:$12 sps:$4 sm:$0xff]   ;;  %v4176_v21 = vld [vmem:[%s5633_s2 + $0xac] ss:$12 sps:$4 sm:$0xff]   ;;  %v4183_v22 = vld [vmem:[%s5633_s2 + $0x68] ss:$12 sps:$4 sm:$0xff]  }
  0x1e   : > { %677 = vmatpush1.bf16.msra.mxu0 %v4085_v6  ;;  %v4171_v20 = vld [vmem:[%s5633_s2 + $0x90] ss:$12 sps:$4 sm:$0xff]   ;;  %v4188_v23 = vld [vmem:[%s5633_s2 + $0xa8] ss:$12 sps:$4 sm:$0xff]   ;;  %v4192_v24 = vld [vmem:[%s4048_s22] sm:$0xff]  ;;  %p1080_p6 = scmp.lt.s32.totalorder %s4041_s17, 12 }
  0x1f   : > { %678 = vmatprep.subr.bf16.mxu0 %v4091_v7  ;;  %3210 = vmatpush3.bf16.msra.mxu1 %v4126_v13  ;;  %5721 = vst [vmem:[#allocation2_spill] sm:$0xff] %v4192_v24  ;;  %v4198_v25 = vld [vmem:[%s5634_s3 + $0x4] ss:$12 sps:$4 sm:$0xff]   ;;  %v4205_v26 = vld [vmem:[%s5633_s2 + $0x80] ss:$12 sps:$4 sm:$0xff]   ;;  %v545_v27 = vpack.c.bf16 %v4192_v24, %v4192_v24  ;;  %v4441_v60 = vld [vmem:[%s5638_s7 + $0x18] sm:$0xff]  }
  0x20   : > { %3211 = vmatprep.subr.bf16.mxu1 %v5666_v3  ;;  %5722 = vst [vmem:[#allocation3_spill] sm:$0xff] %v4198_v25  ;;  %v4214_v28 = vld [vmem:[%s5634_s3] ss:$12 sps:$4 sm:$0xff]   ;;  %v4219_v29 = vld [vmem:[%s5634_s3 + $0x1c] ss:$12 sps:$4 sm:$0xff]   ;;  %v4467_v63 = vld [vmem:[%s5638_s7 + $0x30] sm:$0xff]  }
  0x21   : > { %5723 = vst [vmem:[#allocation4_spill] sm:$0xff] %v4214_v28  ;;  %5724 = vst [vmem:[#allocation5_spill] sm:$0xff] %v4219_v29  ;;  %v4226_v30 = vld [vmem:[%s5633_s2 + $0x98] ss:$12 sps:$4 sm:$0xff]   ;;  %v4238_v32 = vld [vmem:[%s5634_s3 + $0x34] ss:$12 sps:$4 sm:$0xff]  }
  0x22   : > { %679 = vmatpush1.bf16.msra.mxu0 %v4097_v8  ;;  %v4232_v31 = vld [vmem:[%s5634_s3 + $0x18] ss:$12 sps:$4 sm:$0xff]   ;;  %5726 = vst [vmem:[#allocation7_spill] sm:$0xff] %v4238_v32  ;;  %v4246_v33 = vld [vmem:[%s5633_s2 + $0xb0] ss:$12 sps:$4 sm:$0xff]   ;;  %v4410_v56 = vld [vmem:[%s4048_s22 + $0x8] sm:$0xff] }
  0x23   : > { %680 = vmatprep.subr.bf16.mxu0 %v4103_v9  ;;  %3212 = vmatpush3.bf16.msra.mxu1 %v4145_v16  ;;  %5725 = vst [vmem:[#allocation6_spill] sm:$0xff] %v4232_v31  ;;  %v4251_v34 = vld [vmem:[%s5634_s3 + $0x30] ss:$12 sps:$4 sm:$0xff]   ;;  %v4257_v35 = vld [vmem:[%s5634_s3 + $0x4c] ss:$12 sps:$4 sm:$0xff]   ;;  %v4355_v50 = vld [vmem:[%s5641_s10] sm:$0xff]  ;;  %v4415_v57 = vpack.c.bf16 %v4410_v56, %v4410_v56 }
  0x24   : > { %3213 = vmatprep.subr.bf16.mxu1 %v5666_v3  ;;  %5727 = vst [vmem:[#allocation8_spill] sm:$0xff] %v4251_v34  ;;  %5728 = vst [vmem:[#allocation9_spill] sm:$0xff] %v4257_v35  ;;  %v4262_v36 = vld [vmem:[%s5634_s3 + $0x8] ss:$12 sps:$4 sm:$0xff]   ;;  %v4278_v38 = vld [vmem:[%s5634_s3 + $0x64] ss:$12 sps:$4 sm:$0xff]   ;;  %v755_v52 = vpack.c.bf16 %v4355_v50, %v4355_v50 }
  0x25   : > { %v4272_v37 = vld [vmem:[%s5634_s3 + $0x48] ss:$12 sps:$4 sm:$0xff]   ;;  %5730 = vst [vmem:[#allocation11_spill] sm:$0xff] %v4278_v38  ;;  %v4284_v39 = vld [vmem:[%s5634_s3 + $0x20] ss:$12 sps:$4 sm:$0xff]   ;;  %5738 = vst [vmem:[#allocation19_spill] sm:$0xff] %v4410_v56 }
  0x26   : > { %681 = vmatpush1.bf16.msra.mxu0 %v4114_v11  ;;  %5729 = vst [vmem:[#allocation10_spill] sm:$0xff] %v4272_v37  ;;  %v4293_v40 = vld [vmem:[%s5634_s3 + $0x60] ss:$12 sps:$4 sm:$0xff]   ;;  %v4299_v41 = vld [vmem:[%s5634_s3 + $0x7c] ss:$12 sps:$4 sm:$0xff]   ;;  %s1319_s27 = sadd.s32 1, %s4041_s17 }
  0x27   : > { %682 = vmatprep.subr.bf16.mxu0 %v4120_v12  ;;  %3214 = vmatpush3.bf16.msra.mxu1 %v4164_v19  ;;  %5731 = vst [vmem:[#allocation12_spill] sm:$0xff] %v4293_v40  ;;  %5732 = vst [vmem:[#allocation13_spill] sm:$0xff] %v4299_v41  ;;  %v4305_v42 = vld [vmem:[%s5634_s3 + $0x38] ss:$12 sps:$4 sm:$0xff]   ;;  %v4318_v44 = vld [vmem:[%s5634_s3 + $0x94] ss:$12 sps:$4 sm:$0xff]  }
  0x28   : > { %3215 = vmatprep.subr.bf16.mxu1 %v5666_v3  ;;  %v4312_v43 = vld [vmem:[%s5634_s3 + $0x78] ss:$12 sps:$4 sm:$0xff]   ;;  %5734 = vst [vmem:[#allocation15_spill] sm:$0xff] %v4318_v44  ;;  %v4324_v45 = vld [vmem:[%s5634_s3 + $0x50] ss:$12 sps:$4 sm:$0xff]   ;;  %v4422_v58 = vld [vmem:[%s5638_s7 + $0x8] sm:$0xff]  }
  0x29   : > { %5733 = vst [vmem:[#allocation14_spill] sm:$0xff] %v4312_v43  ;;  %v4331_v46 = vld [vmem:[%s5634_s3 + $0x90] ss:$12 sps:$4 sm:$0xff]   ;;  %v4337_v47 = vld [vmem:[%s5634_s3 + $0xac] ss:$12 sps:$4 sm:$0xff]   ;;  %v4407_v55 = vld [vmem:[%s5638_s7] sm:$0xff]  }
  0x2a   : > { %683 = vmatpush1.bf16.msra.mxu0 %v4133_v14  ;;  %5735 = vst [vmem:[#allocation16_spill] sm:$0xff] %v4331_v46  ;;  %5736 = vst [vmem:[#allocation17_spill] sm:$0xff] %v4337_v47  ;;  %v4343_v48 = vld [vmem:[%s5634_s3 + $0x68] ss:$12 sps:$4 sm:$0xff]   ;;  %v4362_v51 = vld [vmem:[%s5634_s3 + $0x80] ss:$12 sps:$4 sm:$0xff]  }
  0x2b   : > { %684 = vmatprep.subr.bf16.mxu0 %v4139_v15  ;;  %3216 = vmatpush3.bf16.msra.mxu1 %v4183_v22  ;;  %v4350_v49 = vld [vmem:[%s5634_s3 + $0xa8] ss:$12 sps:$4 sm:$0xff]   ;;  %v4372_v53 = vld [vmem:[%s5634_s3 + $0x98] ss:$12 sps:$4 sm:$0xff]   ;;  %v4382_v54 = vld [vmem:[%s5634_s3 + $0xb0] ss:$12 sps:$4 sm:$0xff]  }
  0x2c   : > { %3217 = vmatprep.subr.bf16.mxu1 %v5666_v3  ;;  %5737 = vst [vmem:[#allocation18_spill] sm:$0xff] %v4350_v49  ;;  %v4450_v61 = vld [vmem:[%s5638_s7 + $0x20] sm:$0xff]   ;;  %v4458_v62 = vld [vmem:[%s5638_s7 + $0x28] sm:$0xff]   ;;  %v4476_v0 = vld [vmem:[%s5638_s7 + $0x38] sm:$0xff]   ;;  %s1081_s23 = scalar_select %p1080_p6, 1, 0 }
  0x2d   : > { %p1320_p7 = scmp.lt.s32.totalorder %s1319_s27, 12  ;;  %s1559_s29 = sadd.s32 2, %s4041_s17 }
  0x2e   : > { %685 = vmatpush1.bf16.msra.mxu0 %v4151_v17  ;;  %p1560_p8 = scmp.lt.s32.totalorder %s1559_s29, 12  ;;  %s1799_s29 = sadd.s32 3, %s4041_s17 }
  0x2f   : > { %686 = vmatprep.subr.bf16.mxu0 %v4157_v18  ;;  %3218 = vmatpush3.bf16.msra.mxu1 %v4205_v26  ;;  %s1321_s28 = scalar_select %p1320_p7, 1, 0 }
  0x30   : > { %3219 = vmatprep.subr.bf16.mxu1 %v5666_v3  ;;  %s1561_s30 = scalar_select %p1560_p8, 1, 0 }
  0x31   : > { %p1800_p9 = scmp.lt.s32.totalorder %s1799_s29, 12  ;;  %s2039_s21 = sadd.s32 4, %s4041_s17 }
  0x32   : > { %687 = vmatpush1.bf16.msra.mxu0 %v4171_v20  ;;  %p2040_p10 = scmp.lt.s32.totalorder %s2039_s21, 12  ;;  %s2279_s27 = sadd.s32 5, %s4041_s17 }
  0x33   : > { %688 = vmatprep.subr.bf16.mxu0 %v4176_v21  ;;  %3220 = vmatpush3.bf16.msra.mxu1 %v4226_v30  ;;  %p2280_p11 = scmp.lt.s32.totalorder %s2279_s27, 12  ;;  %s2759_s18 = sadd.s32 7, %s4041_s17 }
  0x34   : > { %3221 = vmatprep.subr.bf16.mxu1 %v5666_v3  ;;  %p2760_p13 = scmp.lt.s32.totalorder %s2759_s18, 12 }
  0x36   : > { %689 = vmatpush1.bf16.msra.mxu0 %v4188_v23  ;;  %s2761_s13 = scalar_select %p2760_p13, 1, 0 }
  0x37   : > { %884 = vmatprep.subr.bf16.mxu0 %v4198_v25  ;;  %3222 = vmatpush3.bf16.msra.mxu1 %v4246_v33 }
  0x38   : > { %3227 = vmatprep.subr.bf16.mxu1 %v5666_v3 }
  0x39   : > { %707 = vmatmul.mubr.bf16.vlgmr.msra.gmra.mrb[0].mxu0 %v545_v27 }
  0x3a   : > { %885 = vmatpush1.bf16.msra.mxu0 %v4214_v28  ;;  %916 = vmatprep.mubr.bf16.mxu0 %v5642_v4 }
  0x3b   : > { %886 = vmatprep.subr.bf16.mxu0 %v4219_v29  ;;  %3224 = vmatmul.mubr.bf16.vlgmr.msra.gmra.mrb[0].mxu1 %v545_v27 }
  0x3c   : > { %3228 = vmatpush3.bf16.msra.mxu1 %v4262_v36  ;;  %3243 = vmatprep.mubr.msk.bf16.mxu1 %vm3967_vm0, %v5666_v3 }
  0x3d   : > { %3229 = vmatprep.subr.bf16.mxu1 %v5666_v3 }
  0x3e   : > { %887 = vmatpush1.bf16.msra.mxu0 %v4232_v31 }
  0x3f   : > { %888 = vmatprep.subr.bf16.mxu0 %v4238_v32 }
  0x40   : > { %3230 = vmatpush3.bf16.msra.mxu1 %v4284_v39 }
  0x41   : > { %3231 = vmatprep.subr.bf16.mxu1 %v5666_v3 }
  0x42   : > { %889 = vmatpush1.bf16.msra.mxu0 %v4251_v34 }
  0x43   : > { %890 = vmatprep.subr.bf16.mxu0 %v4257_v35 }
  0x44   : > { %3232 = vmatpush3.bf16.msra.mxu1 %v4305_v42 }
  0x45   : > { %3233 = vmatprep.subr.bf16.mxu1 %v5666_v3 }
  0x46   : > { %891 = vmatpush1.bf16.msra.mxu0 %v4272_v37 }
  0x47   : > { %892 = vmatprep.subr.bf16.mxu0 %v4278_v38 }
  0x48   : > { %3234 = vmatpush3.bf16.msra.mxu1 %v4324_v45 }
  0x49   : > { %3235 = vmatprep.subr.bf16.mxu1 %v5666_v3 }
  0x4a   : > { %893 = vmatpush1.bf16.msra.mxu0 %v4293_v40 }
  0x4b   : > { %894 = vmatprep.subr.bf16.mxu0 %v4299_v41 }
  0x4c   : > { %3236 = vmatpush3.bf16.msra.mxu1 %v4343_v48 }
  0x4d   : > { %3237 = vmatprep.subr.bf16.mxu1 %v5666_v3 }
  0x4e   : > { %895 = vmatpush1.bf16.msra.mxu0 %v4312_v43 }
  0x4f   : > { %896 = vmatprep.subr.bf16.mxu0 %v4318_v44 }
  0x50   : > { %3238 = vmatpush3.bf16.msra.mxu1 %v4362_v51 }
  0x51   : > { %3239 = vmatprep.subr.bf16.mxu1 %v5666_v3 }
  0x52   : > { %897 = vmatpush1.bf16.msra.mxu0 %v4331_v46 }
  0x53   : > { %898 = vmatprep.subr.bf16.mxu0 %v4337_v47 }
  0x54   : > { %3240 = vmatpush3.bf16.msra.mxu1 %v4372_v53 }
  0x55   : > { %3241 = vmatprep.subr.bf16.mxu1 %v5666_v3 }
  0x56   : > { %899 = vmatpush1.bf16.msra.mxu0 %v4350_v49 }
  0x57   : > { %3247 = vmatprep.subr.bf16.mxu0 %v5666_v3 }
  0x58   : > { %3242 = vmatpush3.bf16.msra.mxu1 %v4382_v54 }
  0x59   : > { %917 = vmatmul.mubr.bf16.vlgmr.msra.gmra.mrb[4].mxu0 %v755_v52  ;;  %1088 = vmatprep.subr.bf16.mxu1 %v4064_v1 }
  0x5a   : > { %3263 = vmatprep.mubr.msk.bf16.mxu0 %vm3967_vm0, %v5666_v3  ;;  %3248 = vmatpush3.bf16.msra.mxu0 %v4407_v55 }
  0x5b   : > { %3244 = vmatmul.mubr.bf16.vlgmr.msra.gmra.mrb[4].mxu1 %v755_v52  ;;  %3249 = vmatprep.subr.bf16.mxu0 %v5666_v3 }
  0x5c   : > { %1089 = vmatpush1.bf16.msra.mxu1 %v4069_v2  ;;  %1120 = vmatprep.mubr.bf16.mxu1 %v5642_v4 }
  0x5d   : > { %1090 = vmatprep.subr.bf16.mxu1 %v4077_v5 }
  0x5e   : > { %3250 = vmatpush3.bf16.msra.mxu0 %v4422_v58 }
  0x5f   : > { %3251 = vmatprep.subr.bf16.mxu0 %v5666_v3 }
  0x60   : > { %1091 = vmatpush1.bf16.msra.mxu1 %v4085_v6 }
  0x61   : > { %1092 = vmatprep.subr.bf16.mxu1 %v4091_v7 }
  0x62   : > { %3252 = vmatpush3.bf16.msra.mxu0 %v4432_v59 }
  0x63   : > { %3253 = vmatprep.subr.bf16.mxu0 %v5666_v3 }
  0x64   : > { %1093 = vmatpush1.bf16.msra.mxu1 %v4097_v8 }
  0x65   : > { %1094 = vmatprep.subr.bf16.mxu1 %v4103_v9 }
  0x66   : > { %3254 = vmatpush3.bf16.msra.mxu0 %v4441_v60 }
  0x67   : > { %3255 = vmatprep.subr.bf16.mxu0 %v5666_v3 }
  0x68   : > { %1095 = vmatpush1.bf16.msra.mxu1 %v4114_v11 }
  0x69   : > { %1096 = vmatprep.subr.bf16.mxu1 %v4120_v12 }
  0x6a   : > { %3256 = vmatpush3.bf16.msra.mxu0 %v4450_v61 }
  0x6b   : > { %3257 = vmatprep.subr.bf16.mxu0 %v5666_v3 }
  0x6c   : > { %1097 = vmatpush1.bf16.msra.mxu1 %v4133_v14 }
  0x6d   : > { %1098 = vmatprep.subr.bf16.mxu1 %v4139_v15 }
  0x6e   : > { %3258 = vmatpush3.bf16.msra.mxu0 %v4458_v62 }
  0x6f   : > { %3259 = vmatprep.subr.bf16.mxu0 %v5666_v3 }
  0x70   : > { %1099 = vmatpush1.bf16.msra.mxu1 %v4151_v17 }
  0x71   : > { %1100 = vmatprep.subr.bf16.mxu1 %v4157_v18 }
  0x72   : > { %3260 = vmatpush3.bf16.msra.mxu0 %v4467_v63 }
  0x73   : > { %3261 = vmatprep.subr.bf16.mxu0 %v5666_v3 }
  0x74   : > { %1101 = vmatpush1.bf16.msra.mxu1 %v4171_v20 }
  0x75   : > { %1102 = vmatprep.subr.bf16.mxu1 %v4176_v21 }
  0x76   : > { %3262 = vmatpush3.bf16.msra.mxu0 %v4476_v0 }
  0x77   : > { %3267 = vmatprep.subr.bf16.mxu0 %v5666_v3 }
  0x78   : > { %1103 = vmatpush1.bf16.msra.mxu1 %v4188_v23 }
  0x79   : > { %1170 = vmatprep.subr.bf16.mxu1 %v4198_v25 }
  0x7b   : > { %1121 = vmatmul.mubr.bf16.vlgmr.msra.gmra.mrb[8].mxu1 %v4415_v57 }
  0x7c   : > { %1171 = vmatpush1.bf16.msra.mxu1 %v4214_v28  ;;  %1202 = vmatprep.mubr.bf16.mxu1 %v5642_v4 }
  0x7d   : > { %1172 = vmatprep.subr.bf16.mxu1 %v4219_v29 }
  0x80   : > { %1173 = vmatpush1.bf16.msra.mxu1 %v4232_v31 }
  0x81   : > { %1174 = vmatprep.subr.bf16.mxu1 %v4238_v32 }
  0x84   : > { %1175 = vmatpush1.bf16.msra.mxu1 %v4251_v34 }
  0x85   : > { %1176 = vmatprep.subr.bf16.mxu1 %v4257_v35 }
  0x88   : > { %1177 = vmatpush1.bf16.msra.mxu1 %v4272_v37 }
  0x89   : > { %1178 = vmatprep.subr.bf16.mxu1 %v4278_v38 }
  0x8c   : > { %1179 = vmatpush1.bf16.msra.mxu1 %v4293_v40  ;;  %v511_v40 = vlaneseq }
  0x8d   : > { %1180 = vmatprep.subr.bf16.mxu1 %v4299_v41 }
  0x90   : > { %1181 = vmatpush1.bf16.msra.mxu1 %v4312_v43 }
  0x91   : > { %1182 = vmatprep.subr.bf16.mxu1 %v4318_v44 }
  0x94   : > { %1183 = vmatpush1.bf16.msra.mxu1 %v4331_v46  ;;  %v512_v46 = vshrl.u32 %v511_v40, 7 }
  0x95   : > { %1184 = vmatprep.subr.bf16.mxu1 %v4337_v47  ;;  %v509_v47 = vld [vmem:[%s5635_s4] sm:$0x3] }
  0x96   : > { %v513_v38 = vsub.s32 0, %v512_v46 }
  0x98   : > { %1185 = vmatpush1.bf16.msra.mxu1 %v4350_v49  ;;  %v4488_v37 = vrot.slane %v509_v47, %v513_v38 }
  0x99   : > { %3307 = vmatprep.subr.bf16.mxu1 %v5666_v3 }
 0x10c   : > { %v708_v27 = vpop.f32.mrb[0].mxu0 }
 0x10d   : > { %v710_v52 = vpop.f32.mrb[1].mxu0 }
 0x10e   : > { %v712_v4 = vpop.f32.mrb[2].mxu0  ;;  %v749_v24 = vpop.f32.mrb[0].mxu1 }
 0x10f   : > { %v713_v56 = vpop.f32.mrb[3].mxu0  ;;  %v3225_v44 = vpop.f32.mrb[1].mxu1 }
 0x110   : > { %v752_v43 = vpop.f32.mrb[2].mxu1  ;;  %v517_v56 = vsub.s32 1, %v512_v46 }
 0x111   : > { %v3226_v41 = vpop.f32.mrb[3].mxu1 }
 0x112   : > { %v4491_v41 = vrot.slane %v509_v47, %v517_v56 }
 0x12c   : > { %v918_v49 = vpop.f32.mrb[4].mxu0 }
 0x12d   : > { %v965_v35 = vadd.f32 %v918_v49, %v708_v27  ;;  %v920_v3 = vpop.f32.mrb[5].mxu0 }
 0x12e   : > { %v966_v34 = vadd.f32 %v920_v3, %v710_v52  ;;  %v922_v32 = vpop.f32.mrb[6].mxu0  ;;  %v959_v40 = vpop.f32.mrb[4].mxu1  ;;  %v4497_v3 = vld [vmem:[%s5637_s6] ss:$0 sm:$0xff] }
 0x12f   : > { %v967_v4 = vadd.f32 %v965_v35, %v4488_v37  ;;  %v923_v44 = vpop.f32.mrb[7].mxu0  ;;  %v3245_v31 = vpop.f32.mrb[5].mxu1  ;;  %v982_v32 = vadd.f32 %v4497_v3, %v959_v40 }
 0x130   : > { %v968_v29 = vadd.f32 %v966_v34, %v4491_v41  ;;  %v962_v28 = vpop.f32.mrb[6].mxu1  ;;  %v4503_v31 = vld [vmem:[%s5636_s5] ss:$0 sm:$0xff] }
 0x131   : > { %v2950_v43 = vmul.f32 -1.442695, %v967_v4  ;;  %v3246_v38 = vpop.f32.mrb[7].mxu1  ;;  %v1082_v4 = vstv %s1081_s23  ;;  %s2041_s23 = scalar_select %p2040_p10, 1, 0 }
 0x132   : > { %v2951_v25 = vmul.f32 -1.442695, %v968_v29  ;;  %v981_v29 = vadd.f32 %v4503_v31, %v749_v24  ;;  %vm1083_vm1 = vcmp.eq.s32.totalorder %v1082_v4, 1  ;;  %v5754_v4 = vld [vmem:[#allocation15_spill] sm:$0xff] }
 0x133   : > { %3786 = vpow2.f32 %v2950_v43 }
 0x134   : > { %3788 = vpow2.f32 %v2951_v25 }
 0x13d   : > { %v3787_v49 = vpop.eup %3786 }
 0x13e   : > { %v975_v27 = vadd.f32 1.0, %v3787_v49  ;;  %v3789_v28 = vpop.eup %3788  ;;  %v5739_v49 = vmov 0.0  }
 0x13f   : > { %v976_v46 = vadd.f32 1.0, %v3789_v28  ;;  %v5740_v28 = vmov 0  }
 0x140   : > { %3790 = vrcp.f32 %v975_v27 }
 0x14a   : > { %v3791_v34 = vpop.eup %3790 }
 0x14b   : > { %v983_v35 = vmul.f32 %v3791_v34, %v982_v32  ;;  %v5747_v34 = vld [vmem:[#allocation8_spill] sm:$0xff] }
 0x14d   : > { %v984_v25 = vadd.f32 %v983_v35, %v981_v29  ;;  %v5748_v29 = vld [vmem:[#allocation9_spill] sm:$0xff]  ;;  %v5749_v35 = vld [vmem:[#allocation10_spill] sm:$0xff] }
 0x14f   : > { %3792 = vtanh.f32 %v984_v25  ;;  %v5751_v25 = vld [vmem:[#allocation12_spill] sm:$0xff] }
 0x150   : > { %3794 = vrcp.f32 %v976_v46  ;;  %v5750_v46 = vld [vmem:[#allocation11_spill] sm:$0xff] }
 0x159   : > { %v3793_v47 = vpop.eup %3792 }
 0x15a   : > { %v986_v52 = vsub.f32 %v4355_v50, %v3793_v47  ;;  %v3795_v56 = vpop.eup %3794 }
 0x15c   : > { %v987_v44 = vmul.f32 %v3795_v56, %v986_v52  ;;  %v5753_v52 = vld [vmem:[#allocation14_spill] sm:$0xff]  ;;  %v5755_v56 = vld [vmem:[#allocation16_spill] sm:$0xff] }
 0x15e   : > { %v988_v43 = vadd.f32 %v3793_v47, %v987_v44  ;;  %v5752_v47 = vld [vmem:[#allocation13_spill] sm:$0xff] }
 0x15f   : > { %v5756_v44 = vld [vmem:[#allocation17_spill] sm:$0xff] }
 0x160   : > { %v989_v40 = vpack.c.bf16 %v988_v43, %v988_v43  ;;  %v4509_v38 = vsel %vm1083_vm1, %v988_v43, %v4355_v50  ;;  %v1122_v50 = vpop.f32.mrb[8].mxu1  ;;  %v5757_v43 = vld [vmem:[#allocation18_spill] sm:$0xff] }
 0x161   : > { %v1169_v24 = vpack.c.bf16 %v4509_v38, %v4509_v38 }
 0x162   : > { %3264 = vmatmul.mubr.bf16.vlgmr.msra.gmra.mrb[8].mxu0 %v989_v40  ;;  %v4613_v40 = vld [vmem:[%s5639_s8] ss:$0 sm:$0xff] }
 0x163   : > { %3268 = vmatpush3.bf16.msra.mxu0 %v4108_v10  ;;  %1203 = vmatmul.mubr.bf16.vlgmr.msra.gmra.mrb[12].mxu1 %v1169_v24 }
 0x164   : > { %3269 = vmatprep.subr.bf16.mxu0 %v5739_v49  ;;  %3283 = vmatprep.mubr.msk.bf16.mxu0 %vm3967_vm0, %v5739_v49 }
 0x165   : > { %3308 = vmatpush3.bf16.msra.mxu1 %v4407_v55  ;;  %3323 = vmatprep.mubr.msk.bf16.mxu1 %vm3967_vm0, %v5739_v49 }
 0x166   : > { %3309 = vmatprep.subr.bf16.mxu1 %v5739_v49 }
 0x167   : > { %3270 = vmatpush3.bf16.msra.mxu0 %v4126_v13 }
 0x168   : > { %3271 = vmatprep.subr.bf16.mxu0 %v5739_v49 }
 0x169   : > { %3310 = vmatpush3.bf16.msra.mxu1 %v4422_v58 }
 0x16a   : > { %3311 = vmatprep.subr.bf16.mxu1 %v5739_v49 }
 0x16b   : > { %3272 = vmatpush3.bf16.msra.mxu0 %v4145_v16 }
 0x16c   : > { %3273 = vmatprep.subr.bf16.mxu0 %v5739_v49 }
 0x16d   : > { %3312 = vmatpush3.bf16.msra.mxu1 %v4432_v59 }
 0x16e   : > { %3313 = vmatprep.subr.bf16.mxu1 %v5739_v49 }
 0x16f   : > { %3274 = vmatpush3.bf16.msra.mxu0 %v4164_v19 }
 0x170   : > { %3275 = vmatprep.subr.bf16.mxu0 %v5739_v49 }
 0x171   : > { %3314 = vmatpush3.bf16.msra.mxu1 %v4441_v60 }
 0x172   : > { %3315 = vmatprep.subr.bf16.mxu1 %v5739_v49 }
 0x173   : > { %3276 = vmatpush3.bf16.msra.mxu0 %v4183_v22 }
 0x174   : > { %3277 = vmatprep.subr.bf16.mxu0 %v5739_v49 }
 0x175   : > { %3316 = vmatpush3.bf16.msra.mxu1 %v4450_v61 }
 0x176   : > { %3317 = vmatprep.subr.bf16.mxu1 %v5739_v49 }
 0x177   : > { %3278 = vmatpush3.bf16.msra.mxu0 %v4205_v26 }
 0x178   : > { %3279 = vmatprep.subr.bf16.mxu0 %v5739_v49 }
 0x179   : > { %3318 = vmatpush3.bf16.msra.mxu1 %v4458_v62 }
 0x17a   : > { %3319 = vmatprep.subr.bf16.mxu1 %v5739_v49 }
 0x17b   : > { %3280 = vmatpush3.bf16.msra.mxu0 %v4226_v30 }
 0x17c   : > { %3281 = vmatprep.subr.bf16.mxu0 %v5739_v49 }
 0x17d   : > { %3320 = vmatpush3.bf16.msra.mxu1 %v4467_v63 }
 0x17e   : > { %3321 = vmatprep.subr.bf16.mxu1 %v5739_v49 }
 0x17f   : > { %3282 = vmatpush3.bf16.msra.mxu0 %v4246_v33 }
 0x180   : > { %3287 = vmatprep.subr.bf16.mxu0 %v5739_v49 }
 0x181   : > { %3322 = vmatpush3.bf16.msra.mxu1 %v4476_v0 }
 0x182   : > { %3284 = vmatmul.mubr.bf16.vlgmr.msra.gmra.mrb[12].mxu0 %v4415_v57  ;;  %3327 = vmatprep.subr.bf16.mxu1 %v5739_v49  ;;  %v1124_v57 = vpop.f32.mrb[9].mxu1 }
 0x183   : > { %3288 = vmatpush3.bf16.msra.mxu0 %v4262_v36  ;;  %3303 = vmatprep.mubr.msk.bf16.mxu0 %vm3967_vm0, %v5739_v49  ;;  %v1126_v27 = vpop.f32.mrb[10].mxu1 }
 0x184   : > { %3289 = vmatprep.subr.bf16.mxu0 %v5739_v49  ;;  %v1127_v32 = vpop.f32.mrb[11].mxu1 }
 0x187   : > { %3290 = vmatpush3.bf16.msra.mxu0 %v4284_v39 }
 0x188   : > { %3291 = vmatprep.subr.bf16.mxu0 %v5739_v49 }
 0x18b   : > { %3292 = vmatpush3.bf16.msra.mxu0 %v4305_v42 }
 0x18c   : > { %3293 = vmatprep.subr.bf16.mxu0 %v5739_v49 }
 0x18f   : > { %3294 = vmatpush3.bf16.msra.mxu0 %v4324_v45 }
 0x190   : > { %3295 = vmatprep.subr.bf16.mxu0 %v5739_v49 }
 0x193   : > { %3296 = vmatpush3.bf16.msra.mxu0 %v4343_v48 }
 0x194   : > { %3297 = vmatprep.subr.bf16.mxu0 %v5739_v49 }
 0x197   : > { %3298 = vmatpush3.bf16.msra.mxu0 %v4362_v51 }
 0x198   : > { %3299 = vmatprep.subr.bf16.mxu0 %v5739_v49 }
 0x19b   : > { %3300 = vmatpush3.bf16.msra.mxu0 %v4372_v53 }
 0x19c   : > { %3301 = vmatprep.subr.bf16.mxu0 %v5739_v49 }
 0x19f   : > { %3302 = vmatpush3.bf16.msra.mxu0 %v4382_v54 }
 0x1a0   : > { %1328 = vmatprep.subr.bf16.mxu0 %v4064_v1  ;;  %v5741_v1 = vld [vmem:[#allocation3_spill] sm:$0xff] }
 0x1a2   : > { %3304 = vmatmul.mubr.bf16.vlgmr.msra.gmra.mrb[16].mxu0 %v1169_v24 }
 0x1a3   : > { %1329 = vmatpush1.bf16.msra.mxu0 %v4069_v2  ;;  %1360 = vmatprep.mubr.bf16.mxu0 %v5740_v28  ;;  %v4586_v2 = vld [vmem:[%s4048_s22 + $0x10] sm:$0xff] }
 0x1a4   : > { %1330 = vmatprep.subr.bf16.mxu0 %v4077_v5  ;;  %5742 = vst [vmem:[#allocation3_spill] sm:$0xff] %v4586_v2  ;;  %v4590_v5 = vpack.c.bf16 %v4586_v2, %v4586_v2 }
 0x1a7   : > { %1331 = vmatpush1.bf16.msra.mxu0 %v4085_v6  ;;  %v5743_v6 = vld [vmem:[#allocation4_spill] sm:$0xff] }
 0x1a8   : > { %1332 = vmatprep.subr.bf16.mxu0 %v4091_v7  ;;  %v5744_v7 = vld [vmem:[#allocation5_spill] sm:$0xff] }
 0x1ab   : > { %1333 = vmatpush1.bf16.msra.mxu0 %v4097_v8  ;;  %v5745_v8 = vld [vmem:[#allocation6_spill] sm:$0xff] }
 0x1ac   : > { %1334 = vmatprep.subr.bf16.mxu0 %v4103_v9  ;;  %v5746_v9 = vld [vmem:[#allocation7_spill] sm:$0xff] }
 0x1af   : > { %1335 = vmatpush1.bf16.msra.mxu0 %v4114_v11 }
 0x1b0   : > { %1336 = vmatprep.subr.bf16.mxu0 %v4120_v12 }
 0x1b3   : > { %1337 = vmatpush1.bf16.msra.mxu0 %v4133_v14 }
 0x1b4   : > { %1338 = vmatprep.subr.bf16.mxu0 %v4139_v15 }
 0x1b7   : > { %1339 = vmatpush1.bf16.msra.mxu0 %v4151_v17 }
 0x1b8   : > { %1340 = vmatprep.subr.bf16.mxu0 %v4157_v18 }
 0x1bb   : > { %1341 = vmatpush1.bf16.msra.mxu0 %v4171_v20 }
 0x1bc   : > { %1342 = vmatprep.subr.bf16.mxu0 %v4176_v21 }
 0x1bf   : > { %1343 = vmatpush1.bf16.msra.mxu0 %v4188_v23 }
 0x1c0   : > { %1410 = vmatprep.subr.bf16.mxu0 %v5741_v1 }
 0x1c2   : > { %1361 = vmatmul.mubr.bf16.vlgmr.msra.gmra.mrb[20].mxu0 %v4590_v5 }
 0x1c3   : > { %1411 = vmatpush1.bf16.msra.mxu0 %v5743_v6  ;;  %1442 = vmatprep.mubr.bf16.mxu0 %v5740_v28 }
 0x1c4   : > { %1412 = vmatprep.subr.bf16.mxu0 %v5744_v7 }
 0x1c7   : > { %1413 = vmatpush1.bf16.msra.mxu0 %v5745_v8 }
 0x1c8   : > { %1414 = vmatprep.subr.bf16.mxu0 %v5746_v9 }
 0x1cb   : > { %1415 = vmatpush1.bf16.msra.mxu0 %v5747_v34 }
 0x1cc   : > { %1416 = vmatprep.subr.bf16.mxu0 %v5748_v29 }
 0x1cf   : > { %1417 = vmatpush1.bf16.msra.mxu0 %v5749_v35 }
 0x1d0   : > { %1418 = vmatprep.subr.bf16.mxu0 %v5750_v46 }
 0x1d3   : > { %1419 = vmatpush1.bf16.msra.mxu0 %v5751_v25 }
 0x1d4   : > { %1420 = vmatprep.subr.bf16.mxu0 %v5752_v47  ;;  %v5758_v47 = vld [vmem:[#allocation2_spill] sm:$0xff] }
 0x1d7   : > { %1421 = vmatpush1.bf16.msra.mxu0 %v5753_v52 }
 0x1d8   : > { %1422 = vmatprep.subr.bf16.mxu0 %v5754_v4 }
 0x1db   : > { %1423 = vmatpush1.bf16.msra.mxu0 %v5755_v56 }
 0x1dc   : > { %1424 = vmatprep.subr.bf16.mxu0 %v5756_v44 }
 0x1df   : > { %1425 = vmatpush1.bf16.msra.mxu0 %v5757_v43 }
 0x1e0   : > { %3367 = vmatprep.subr.bf16.mxu0 %v5739_v49 }
 0x235   : > { %v1072_v24 = vpop.f32.mrb[8].mxu0 }
 0x236   : > { %v1073_v27 = vadd.f32 %v4613_v40, %v1072_v24  ;;  %v3265_v32 = vpop.f32.mrb[9].mxu0  ;;  %v1204_v2 = vpop.f32.mrb[12].mxu1 }
 0x237   : > { %v1251_v4 = vadd.f32 %v1204_v2, %v1122_v50  ;;  %v1075_v52 = vpop.f32.mrb[10].mxu0  ;;  %v1206_v56 = vpop.f32.mrb[13].mxu1 }
 0x238   : > { %v1078_v44 = vadd.f32 %v1073_v27, %v5758_v47  ;;  %v1252_v25 = vadd.f32 %v1206_v56, %v1124_v57  ;;  %v3266_v46 = vpop.f32.mrb[11].mxu0  ;;  %v1208_v43 = vpop.f32.mrb[14].mxu1 }
 0x239   : > { %v1209_v35 = vpop.f32.mrb[15].mxu1  ;;  %v1253_v29 = vadd.f32 %v1251_v4, %v4488_v37  ;;  %v1322_v43 = vstv %s1321_s28  ;;  %s2281_s28 = scalar_select %p2280_p11, 1, 0 }
 0x23a   : > { %1079 = vst [vmem:[%s4053_s25] sm:$0xff] %v1078_v44  ;;  %v1254_v24 = vadd.f32 %v1252_v25, %v4491_v41  ;;  %vm1323_vm2 = vcmp.eq.s32.totalorder %v1322_v43, 1  ;;  %v5775_v43 = vld [vmem:[#allocation19_spill] sm:$0xff] }
 0x23b   : > { %v2961_v7 = vmul.f32 -1.442695, %v1253_v29 }
 0x23c   : > { %v2962_v2 = vmul.f32 -1.442695, %v1254_v24 }
 0x23d   : > { %3796 = vpow2.f32 %v2961_v7 }
 0x23e   : > { %3798 = vpow2.f32 %v2962_v2 }
 0x247   : > { %v3797_v50 = vpop.eup %3796 }
 0x248   : > { %v1261_v52 = vadd.f32 1.0, %v3797_v50  ;;  %v3799_v46 = vpop.eup %3798 }
 0x249   : > { %v1262_v7 = vadd.f32 1.0, %v3799_v46  ;;  %v5770_v46 = vld [vmem:[#allocation14_spill] sm:$0xff] }
 0x24a   : > { %3800 = vrcp.f32 %v1261_v52  ;;  %v4741_v52 = vld [vmem:[%s4048_s22 + $0x18] sm:$0xff] }
 0x24b   : > { %5759 = vst [vmem:[#allocation2_spill] sm:$0xff] %v4741_v52 }
 0x254   : > { %v3801_v4 = vpop.eup %3800 }
 0x255   : > { %v1163_v34 = vpop.f32.mrb[12].mxu0 }
 0x256   : > { %v3285_v9 = vpop.f32.mrb[13].mxu0 }
 0x257   : > { %v1166_v8 = vpop.f32.mrb[14].mxu0 }
 0x258   : > { %v3286_v6 = vpop.f32.mrb[15].mxu0  ;;  %v1267_v8 = vadd.f32 %v4503_v31, %v1163_v34 }
 0x275   : > { %v1245_v57 = vpop.f32.mrb[16].mxu0 }
 0x276   : > { %v1268_v35 = vadd.f32 %v4497_v3, %v1245_v57  ;;  %v3305_v47 = vpop.f32.mrb[17].mxu0  ;;  %v5769_v57 = vld [vmem:[#allocation13_spill] sm:$0xff] }
 0x277   : > { %v1248_v56 = vpop.f32.mrb[18].mxu0  ;;  %v5772_v47 = vld [vmem:[#allocation16_spill] sm:$0xff] }
 0x278   : > { %v1269_v9 = vmul.f32 %v3801_v4, %v1268_v35  ;;  %v3306_v6 = vpop.f32.mrb[19].mxu0  ;;  %v5771_v35 = vld [vmem:[#allocation15_spill] sm:$0xff]  ;;  %v5773_v4 = vld [vmem:[#allocation17_spill] sm:$0xff]  ;;  %v5774_v56 = vld [vmem:[#allocation18_spill] sm:$0xff] }
 0x27a   : > { %v1270_v29 = vadd.f32 %v1269_v9, %v1267_v8 }
 0x27c   : > { %3802 = vtanh.f32 %v1270_v29 }
 0x27d   : > { %3804 = vrcp.f32 %v1262_v7 }
 0x286   : > { %v3803_v25 = vpop.eup %3802 }
 0x287   : > { %v1272_v44 = vsub.f32 %v4509_v38, %v3803_v25  ;;  %v3805_v27 = vpop.eup %3804 }
 0x289   : > { %v1273_v32 = vmul.f32 %v3805_v27, %v1272_v44 }
 0x28b   : > { %v1274_v24 = vadd.f32 %v3803_v25, %v1273_v32 }
 0x28d   : > { %v1275_v50 = vpack.c.bf16 %v1274_v24, %v1274_v24  ;;  %v4625_v34 = vsel %vm1323_vm2, %v1274_v24, %v4509_v38  ;;  %v4721_v38 = vld [vmem:[%s5633_s2 + $0x30] ss:$12 sps:$4 sm:$0xff]  }
 0x28e   : > { %v1409_v2 = vpack.c.bf16 %v4625_v34, %v4625_v34 }
 0x28f   : > { %3324 = vmatmul.mubr.bf16.vlgmr.msra.gmra.mrb[16].mxu1 %v1275_v50 }
 0x290   : > { %3328 = vmatpush3.bf16.msra.mxu1 %v4108_v10  ;;  %1443 = vmatmul.mubr.bf16.vlgmr.msra.gmra.mrb[24].mxu0 %v1409_v2 }
 0x291   : > { %3329 = vmatprep.subr.bf16.mxu1 %v5739_v49  ;;  %3343 = vmatprep.mubr.msk.bf16.mxu1 %vm3967_vm0, %v5739_v49 }
 0x292   : > { %3368 = vmatpush3.bf16.msra.mxu0 %v4407_v55  ;;  %3383 = vmatprep.mubr.msk.bf16.mxu0 %vm3967_vm0, %v5739_v49 }
 0x293   : > { %3369 = vmatprep.subr.bf16.mxu0 %v5739_v49 }
 0x294   : > { %3330 = vmatpush3.bf16.msra.mxu1 %v4126_v13 }
 0x295   : > { %3331 = vmatprep.subr.bf16.mxu1 %v5739_v49  ;;  %v4663_v10 = vpop.f32.mrb[20].mxu0 }
 0x296   : > { %3370 = vmatpush3.bf16.msra.mxu0 %v4422_v58  ;;  %v4667_v13 = vpop.f32.mrb[21].mxu0 }
 0x297   : > { %3371 = vmatprep.subr.bf16.mxu0 %v5739_v49 }
 0x298   : > { %3332 = vmatpush3.bf16.msra.mxu1 %v4145_v16  ;;  %v1366_v16 = vpop.f32.mrb[22].mxu0 }
 0x299   : > { %3333 = vmatprep.subr.bf16.mxu1 %v5739_v49 }
 0x29a   : > { %3372 = vmatpush3.bf16.msra.mxu0 %v4432_v59 }
 0x29b   : > { %3373 = vmatprep.subr.bf16.mxu0 %v5739_v49 }
 0x29c   : > { %3334 = vmatpush3.bf16.msra.mxu1 %v4164_v19  ;;  %v1367_v19 = vpop.f32.mrb[23].mxu0 }
 0x29d   : > { %3335 = vmatprep.subr.bf16.mxu1 %v5739_v49 }
 0x29e   : > { %3374 = vmatpush3.bf16.msra.mxu0 %v4441_v60 }
 0x29f   : > { %3375 = vmatprep.subr.bf16.mxu0 %v5739_v49 }
 0x2a0   : > { %3336 = vmatpush3.bf16.msra.mxu1 %v4183_v22  ;;  %v4690_v22 = vld [vmem:[%s5633_s2 + $0x4] ss:$12 sps:$4 sm:$0xff]  }
 0x2a1   : > { %3337 = vmatprep.subr.bf16.mxu1 %v5739_v49 }
 0x2a2   : > { %3376 = vmatpush3.bf16.msra.mxu0 %v4450_v61 }
 0x2a3   : > { %3377 = vmatprep.subr.bf16.mxu0 %v5739_v49 }
 0x2a4   : > { %3338 = vmatpush3.bf16.msra.mxu1 %v4205_v26  ;;  %v4696_v26 = vld [vmem:[%s5633_s2] ss:$12 sps:$4 sm:$0xff]  }
 0x2a5   : > { %3339 = vmatprep.subr.bf16.mxu1 %v5739_v49 }
 0x2a6   : > { %3378 = vmatpush3.bf16.msra.mxu0 %v4458_v62 }
 0x2a7   : > { %3379 = vmatprep.subr.bf16.mxu0 %v5739_v49 }
 0x2a8   : > { %3340 = vmatpush3.bf16.msra.mxu1 %v4226_v30  ;;  %v4703_v30 = vld [vmem:[%s5633_s2 + $0x1c] ss:$12 sps:$4 sm:$0xff]  }
 0x2a9   : > { %3341 = vmatprep.subr.bf16.mxu1 %v5739_v49 }
 0x2aa   : > { %3380 = vmatpush3.bf16.msra.mxu0 %v4467_v63 }
 0x2ab   : > { %3381 = vmatprep.subr.bf16.mxu0 %v5739_v49 }
 0x2ac   : > { %3342 = vmatpush3.bf16.msra.mxu1 %v4246_v33  ;;  %v4709_v33 = vld [vmem:[%s5633_s2 + $0x18] ss:$12 sps:$4 sm:$0xff]  }
 0x2ad   : > { %3347 = vmatprep.subr.bf16.mxu1 %v5739_v49 }
 0x2ae   : > { %3382 = vmatpush3.bf16.msra.mxu0 %v4476_v0 }
 0x2af   : > { %3344 = vmatmul.mubr.bf16.vlgmr.msra.gmra.mrb[20].mxu1 %v4590_v5  ;;  %3387 = vmatprep.subr.bf16.mxu0 %v5739_v49  ;;  %v4727_v5 = vld [vmem:[%s5633_s2 + $0x4c] ss:$12 sps:$4 sm:$0xff]  }
 0x2b0   : > { %3348 = vmatpush3.bf16.msra.mxu1 %v4262_v36  ;;  %3363 = vmatprep.mubr.msk.bf16.mxu1 %vm3967_vm0, %v5739_v49  ;;  %v4715_v36 = vld [vmem:[%s5633_s2 + $0x34] ss:$12 sps:$4 sm:$0xff]  }
 0x2b1   : > { %3349 = vmatprep.subr.bf16.mxu1 %v5739_v49 }
 0x2b4   : > { %3350 = vmatpush3.bf16.msra.mxu1 %v4284_v39 }
 0x2b5   : > { %3351 = vmatprep.subr.bf16.mxu1 %v5739_v49 }
 0x2b8   : > { %3352 = vmatpush3.bf16.msra.mxu1 %v4305_v42 }
 0x2b9   : > { %3353 = vmatprep.subr.bf16.mxu1 %v5739_v49 }
 0x2bc   : > { %3354 = vmatpush3.bf16.msra.mxu1 %v4324_v45 }
 0x2bd   : > { %3355 = vmatprep.subr.bf16.mxu1 %v5739_v49 }
 0x2c0   : > { %3356 = vmatpush3.bf16.msra.mxu1 %v4343_v48 }
 0x2c1   : > { %3357 = vmatprep.subr.bf16.mxu1 %v5739_v49 }
 0x2c4   : > { %3358 = vmatpush3.bf16.msra.mxu1 %v4362_v51 }
 0x2c5   : > { %3359 = vmatprep.subr.bf16.mxu1 %v5739_v49 }
 0x2c8   : > { %3360 = vmatpush3.bf16.msra.mxu1 %v4372_v53 }
 0x2c9   : > { %3361 = vmatprep.subr.bf16.mxu1 %v5739_v49 }
 0x2cc   : > { %3362 = vmatpush3.bf16.msra.mxu1 %v4382_v54 }
 0x2cd   : > { %1568 = vmatprep.subr.bf16.mxu1 %v4690_v22 }
 0x2cf   : > { %3364 = vmatmul.mubr.bf16.vlgmr.msra.gmra.mrb[24].mxu1 %v1409_v2 }
 0x2d0   : > { %1569 = vmatpush1.bf16.msra.mxu1 %v4696_v26  ;;  %1600 = vmatprep.mubr.bf16.mxu1 %v5740_v28 }
 0x2d1   : > { %1570 = vmatprep.subr.bf16.mxu1 %v4703_v30 }
 0x2d4   : > { %1571 = vmatpush1.bf16.msra.mxu1 %v4709_v33 }
 0x2d5   : > { %1572 = vmatprep.subr.bf16.mxu1 %v4715_v36 }
 0x2d8   : > { %1573 = vmatpush1.bf16.msra.mxu1 %v4721_v38 }
 0x2d9   : > { %1574 = vmatprep.subr.bf16.mxu1 %v4727_v5 }
 0x2dc   : > { %1575 = vmatpush1.bf16.msra.mxu1 %v4114_v11  ;;  %v4745_v11 = vpack.c.bf16 %v4741_v52, %v4741_v52 }
 0x2dd   : > { %1576 = vmatprep.subr.bf16.mxu1 %v4120_v12  ;;  %v5760_v12 = vld [vmem:[#allocation4_spill] sm:$0xff] }
 0x2e0   : > { %1577 = vmatpush1.bf16.msra.mxu1 %v4133_v14  ;;  %v5761_v14 = vld [vmem:[#allocation5_spill] sm:$0xff] }
 0x2e1   : > { %1578 = vmatprep.subr.bf16.mxu1 %v4139_v15  ;;  %v5762_v15 = vld [vmem:[#allocation6_spill] sm:$0xff] }
 0x2e4   : > { %1579 = vmatpush1.bf16.msra.mxu1 %v4151_v17  ;;  %v5763_v17 = vld [vmem:[#allocation7_spill] sm:$0xff] }
 0x2e5   : > { %1580 = vmatprep.subr.bf16.mxu1 %v4157_v18  ;;  %v5764_v18 = vld [vmem:[#allocation8_spill] sm:$0xff] }
 0x2e8   : > { %1581 = vmatpush1.bf16.msra.mxu1 %v4171_v20  ;;  %v5765_v20 = vld [vmem:[#allocation9_spill] sm:$0xff] }
 0x2e9   : > { %1582 = vmatprep.subr.bf16.mxu1 %v4176_v21  ;;  %v5766_v21 = vld [vmem:[#allocation10_spill] sm:$0xff] }
 0x2ec   : > { %1583 = vmatpush1.bf16.msra.mxu1 %v4188_v23  ;;  %v5767_v23 = vld [vmem:[#allocation11_spill] sm:$0xff] }
 0x2ed   : > { %1650 = vmatprep.subr.bf16.mxu1 %v5741_v1  ;;  %v5768_v1 = vld [vmem:[#allocation12_spill] sm:$0xff] }
 0x2ef   : > { %1601 = vmatmul.mubr.bf16.vlgmr.msra.gmra.mrb[28].mxu1 %v4745_v11 }
 0x2f0   : > { %1651 = vmatpush1.bf16.msra.mxu1 %v5760_v12  ;;  %1682 = vmatprep.mubr.bf16.mxu1 %v5740_v28 }
 0x2f1   : > { %1652 = vmatprep.subr.bf16.mxu1 %v5761_v14 }
 0x2f4   : > { %1653 = vmatpush1.bf16.msra.mxu1 %v5762_v15 }
 0x2f5   : > { %1654 = vmatprep.subr.bf16.mxu1 %v5763_v17 }
 0x2f8   : > { %1655 = vmatpush1.bf16.msra.mxu1 %v5764_v18 }
 0x2f9   : > { %1656 = vmatprep.subr.bf16.mxu1 %v5765_v20 }
 0x2fc   : > { %1657 = vmatpush1.bf16.msra.mxu1 %v5766_v21 }
 0x2fd   : > { %1658 = vmatprep.subr.bf16.mxu1 %v5767_v23 }
 0x300   : > { %1659 = vmatpush1.bf16.msra.mxu1 %v5768_v1 }
 0x301   : > { %1660 = vmatprep.subr.bf16.mxu1 %v5769_v57 }
 0x304   : > { %1661 = vmatpush1.bf16.msra.mxu1 %v5770_v46 }
 0x305   : > { %1662 = vmatprep.subr.bf16.mxu1 %v5771_v35 }
 0x308   : > { %1663 = vmatpush1.bf16.msra.mxu1 %v5772_v47 }
 0x309   : > { %1664 = vmatprep.subr.bf16.mxu1 %v5773_v4 }
 0x30c   : > { %1665 = vmatpush1.bf16.msra.mxu1 %v5774_v56 }
 0x30d   : > { %3427 = vmatprep.subr.bf16.mxu1 %v5739_v49 }
 0x362   : > { %v1310_v8 = vpop.f32.mrb[16].mxu1 }
 0x363   : > { %v1311_v9 = vadd.f32 %v4613_v40, %v1310_v8  ;;  %v3325_v6 = vpop.f32.mrb[17].mxu1  ;;  %v1444_v7 = vpop.f32.mrb[24].mxu0 }
 0x364   : > { %v1491_v29 = vadd.f32 %v1444_v7, %v4663_v10  ;;  %v1313_v25 = vpop.f32.mrb[18].mxu1  ;;  %v1446_v44 = vpop.f32.mrb[25].mxu0 }
 0x365   : > { %v1316_v27 = vadd.f32 %v5775_v43, %v1311_v9  ;;  %v1492_v32 = vadd.f32 %v1446_v44, %v4667_v13  ;;  %v3326_v24 = vpop.f32.mrb[19].mxu1  ;;  %v1448_v50 = vpop.f32.mrb[26].mxu0 }
 0x366   : > { %v1449_v2 = vpop.f32.mrb[27].mxu0  ;;  %v1493_v16 = vadd.f32 %v1491_v29, %v4488_v37  ;;  %v1562_v29 = vstv %s1561_s30  ;;  %v4786_v50 = vld [vmem:[%s5633_s2 + $0x8] ss:$12 sps:$4 sm:$0xff]   ;;  %s1801_s30 = scalar_select %p1800_p9, 1, 0 }
 0x367   : > { %2963 = vst [vmem:[%s4053_s25 + $0x8] sm:$0xff] %v1316_v27  ;;  %v1494_v10 = vadd.f32 %v1492_v32, %v4491_v41  ;;  %vm1563_vm3 = vcmp.eq.s32.totalorder %v1562_v29, 1  ;;  %v4818_v2 = vld [vmem:[%s5633_s2 + $0x50] ss:$12 sps:$4 sm:$0xff]  }
 0x368   : > { %v2965_v15 = vmul.f32 -1.442695, %v1493_v16 }
 0x369   : > { %v2966_v20 = vmul.f32 -1.442695, %v1494_v10  ;;  %v4967_v10 = vld [vmem:[%s5634_s3] ss:$12 sps:$4 sm:$0xff]  }
 0x36a   : > { %3806 = vpow2.f32 %v2965_v15  ;;  %v4957_v15 = vld [vmem:[%s4048_s22 + $0x20] sm:$0xff]  ;;  %5780 = vst [vmem:[#allocation8_spill] sm:$0xff] %v4967_v10 }
 0x36b   : > { %3808 = vpow2.f32 %v2966_v20  ;;  %5779 = vst [vmem:[#allocation7_spill] sm:$0xff] %v4957_v15  ;;  %v4980_v20 = vld [vmem:[%s5634_s3 + $0x18] ss:$12 sps:$4 sm:$0xff]  }
 0x36c   : > { %5782 = vst [vmem:[#allocation10_spill] sm:$0xff] %v4980_v20 }
 0x374   : > { %v3807_v18 = vpop.eup %3806 }
 0x375   : > { %v1501_v21 = vadd.f32 1.0, %v3807_v18  ;;  %v3809_v23 = vpop.eup %3808  ;;  %v4974_v18 = vld [vmem:[%s5634_s3 + $0x1c] ss:$12 sps:$4 sm:$0xff]  }
 0x376   : > { %v1502_v8 = vadd.f32 1.0, %v3809_v23  ;;  %5781 = vst [vmem:[#allocation9_spill] sm:$0xff] %v4974_v18  ;;  %v4998_v23 = vld [vmem:[%s5634_s3 + $0x4c] ss:$12 sps:$4 sm:$0xff]  }
 0x377   : > { %3810 = vrcp.f32 %v1501_v21  ;;  %v4986_v21 = vld [vmem:[%s5634_s3 + $0x34] ss:$12 sps:$4 sm:$0xff]   ;;  %5785 = vst [vmem:[#allocation13_spill] sm:$0xff] %v4998_v23 }
 0x378   : > { %5783 = vst [vmem:[#allocation11_spill] sm:$0xff] %v4986_v21 }
 0x381   : > { %v3811_v46 = vpop.eup %3810 }
 0x382   : > { %v1403_v19 = vpop.f32.mrb[20].mxu1 }
 0x383   : > { %v3345_v12 = vpop.f32.mrb[21].mxu1  ;;  %v1507_v47 = vadd.f32 %v4503_v31, %v1403_v19 }
 0x384   : > { %v1406_v14 = vpop.f32.mrb[22].mxu1  ;;  %v4947_v12 = vld [vmem:[%s5633_s2 + $0xa8] ss:$12 sps:$4 sm:$0xff]  }
 0x385   : > { %v3346_v17 = vpop.f32.mrb[23].mxu1  ;;  %5777 = vst [vmem:[#allocation5_spill] sm:$0xff] %v4947_v12  ;;  %v4953_v14 = vld [vmem:[%s5634_s3 + $0x4] ss:$12 sps:$4 sm:$0xff]  }
 0x386   : > { %5778 = vst [vmem:[#allocation6_spill] sm:$0xff] %v4953_v14  ;;  %v4961_v17 = vpack.c.bf16 %v4957_v15, %v4957_v15 }
 0x3a2   : > { %v1485_v13 = vpop.f32.mrb[24].mxu1 }
 0x3a3   : > { %v1508_v1 = vadd.f32 %v4497_v3, %v1485_v13  ;;  %v3365_v57 = vpop.f32.mrb[25].mxu1  ;;  %v4992_v13 = vld [vmem:[%s5634_s3 + $0x30] ss:$12 sps:$4 sm:$0xff]  }
 0x3a4   : > { %v1488_v35 = vpop.f32.mrb[26].mxu1  ;;  %5784 = vst [vmem:[#allocation12_spill] sm:$0xff] %v4992_v13  ;;  %v5010_v57 = vld [vmem:[%s5634_s3 + $0x64] ss:$12 sps:$4 sm:$0xff]  }
 0x3a5   : > { %v1509_v4 = vmul.f32 %v3811_v46, %v1508_v1  ;;  %v3366_v56 = vpop.f32.mrb[27].mxu1  ;;  %v5004_v1 = vld [vmem:[%s5634_s3 + $0x48] ss:$12 sps:$4 sm:$0xff]   ;;  %5787 = vst [vmem:[#allocation15_spill] sm:$0xff] %v5010_v57  ;;  %v5016_v46 = vld [vmem:[%s5634_s3 + $0x60] ss:$12 sps:$4 sm:$0xff]  }
 0x3a6   : > { %5786 = vst [vmem:[#allocation14_spill] sm:$0xff] %v5004_v1  ;;  %5788 = vst [vmem:[#allocation16_spill] sm:$0xff] %v5016_v46  ;;  %v5022_v35 = vld [vmem:[%s5634_s3 + $0x7c] ss:$12 sps:$4 sm:$0xff]  }
 0x3a7   : > { %v1510_v9 = vadd.f32 %v1509_v4, %v1507_v47  ;;  %5789 = vst [vmem:[#allocation17_spill] sm:$0xff] %v5022_v35  ;;  %v5028_v47 = vld [vmem:[%s5634_s3 + $0x78] ss:$12 sps:$4 sm:$0xff]   ;;  %v5034_v4 = vld [vmem:[%s5634_s3 + $0x94] ss:$12 sps:$4 sm:$0xff]  }
 0x3a8   : > { %5790 = vst [vmem:[#allocation18_spill] sm:$0xff] %v5028_v47  ;;  %5791 = vst [vmem:[#allocation19_spill] sm:$0xff] %v5034_v4  ;;  %v5040_v56 = vld [vmem:[%s5634_s3 + $0x90] ss:$12 sps:$4 sm:$0xff]  }
 0x3a9   : > { %3812 = vtanh.f32 %v1510_v9  ;;  %5792 = vst [vmem:[#allocation20_spill] sm:$0xff] %v5040_v56  ;;  %v5052_v9 = vld [vmem:[%s5634_s3 + $0xa8] ss:$12 sps:$4 sm:$0xff]  }
 0x3aa   : > { %3814 = vrcp.f32 %v1502_v8  ;;  %v5046_v8 = vld [vmem:[%s5634_s3 + $0xac] ss:$12 sps:$4 sm:$0xff]   ;;  %5794 = vst [vmem:[#allocation22_spill] sm:$0xff] %v5052_v9 }
 0x3ab   : > { %5793 = vst [vmem:[#allocation21_spill] sm:$0xff] %v5046_v8 }
 0x3b3   : > { %v3813_v6 = vpop.eup %3812 }
 0x3b4   : > { %v1512_v7 = vsub.f32 %v4625_v34, %v3813_v6  ;;  %v3815_v25 = vpop.eup %3814 }
 0x3b6   : > { %v1513_v44 = vmul.f32 %v3815_v25, %v1512_v7 }
 0x3b8   : > { %v1514_v43 = vadd.f32 %v3813_v6, %v1513_v44 }
 0x3ba   : > { %v1515_v27 = vpack.c.bf16 %v1514_v43, %v1514_v43  ;;  %v4777_v32 = vsel %vm1563_vm3, %v1514_v43, %v4625_v34  ;;  %v4800_v34 = vld [vmem:[%s5633_s2 + $0x20] ss:$12 sps:$4 sm:$0xff]  }
 0x3bb   : > { %v4781_v24 = vpack.c.bf16 %v4777_v32, %v4777_v32 }
 0x3bc   : > { %3384 = vmatmul.mubr.bf16.vlgmr.msra.gmra.mrb[28].mxu0 %v1515_v27 }
 0x3bd   : > { %3388 = vmatpush3.bf16.msra.mxu0 %v4786_v50  ;;  %1683 = vmatmul.mubr.bf16.vlgmr.msra.gmra.mrb[32].mxu1 %v4781_v24 }
 0x3be   : > { %3389 = vmatprep.subr.bf16.mxu0 %v5739_v49  ;;  %3403 = vmatprep.mubr.msk.bf16.mxu0 %vm3967_vm0, %v5739_v49 }
 0x3bf   : > { %3428 = vmatpush3.bf16.msra.mxu1 %v4407_v55  ;;  %3443 = vmatprep.mubr.msk.bf16.mxu1 %vm3967_vm0, %v5739_v49  ;;  %v4809_v55 = vld [vmem:[%s5633_s2 + $0x38] ss:$12 sps:$4 sm:$0xff]  }
 0x3c0   : > { %3429 = vmatprep.subr.bf16.mxu1 %v5739_v49 }
 0x3c1   : > { %3390 = vmatpush3.bf16.msra.mxu0 %v4800_v34 }
 0x3c2   : > { %3391 = vmatprep.subr.bf16.mxu0 %v5739_v49 }
 0x3c3   : > { %3430 = vmatpush3.bf16.msra.mxu1 %v4422_v58  ;;  %v4827_v58 = vld [vmem:[%s5633_s2 + $0x68] ss:$12 sps:$4 sm:$0xff]  }
 0x3c4   : > { %3431 = vmatprep.subr.bf16.mxu1 %v5739_v49 }
 0x3c5   : > { %3392 = vmatpush3.bf16.msra.mxu0 %v4809_v55 }
 0x3c6   : > { %3393 = vmatprep.subr.bf16.mxu0 %v5739_v49 }
 0x3c7   : > { %3432 = vmatpush3.bf16.msra.mxu1 %v4432_v59  ;;  %v4836_v59 = vld [vmem:[%s5633_s2 + $0x80] ss:$12 sps:$4 sm:$0xff]  }
 0x3c8   : > { %3433 = vmatprep.subr.bf16.mxu1 %v5739_v49 }
 0x3c9   : > { %3394 = vmatpush3.bf16.msra.mxu0 %v4818_v2 }
 0x3ca   : > { %3395 = vmatprep.subr.bf16.mxu0 %v5739_v49 }
 0x3cb   : > { %3434 = vmatpush3.bf16.msra.mxu1 %v4441_v60  ;;  %v4845_v60 = vld [vmem:[%s5633_s2 + $0x98] ss:$12 sps:$4 sm:$0xff]  }
 0x3cc   : > { %3435 = vmatprep.subr.bf16.mxu1 %v5739_v49 }
 0x3cd   : > { %3396 = vmatpush3.bf16.msra.mxu0 %v4827_v58 }
 0x3ce   : > { %3397 = vmatprep.subr.bf16.mxu0 %v5739_v49 }
 0x3cf   : > { %3436 = vmatpush3.bf16.msra.mxu1 %v4450_v61  ;;  %v4854_v61 = vld [vmem:[%s5633_s2 + $0xb0] ss:$12 sps:$4 sm:$0xff]  }
 0x3d0   : > { %3437 = vmatprep.subr.bf16.mxu1 %v5739_v49 }
 0x3d1   : > { %3398 = vmatpush3.bf16.msra.mxu0 %v4836_v59 }
 0x3d2   : > { %3399 = vmatprep.subr.bf16.mxu0 %v5739_v49 }
 0x3d3   : > { %3438 = vmatpush3.bf16.msra.mxu1 %v4458_v62  ;;  %v4858_v62 = vpop.f32.mrb[28].mxu1 }
 0x3d4   : > { %3439 = vmatprep.subr.bf16.mxu1 %v5739_v49  ;;  %v4862_v16 = vpop.f32.mrb[29].mxu1 }
 0x3d5   : > { %3400 = vmatpush3.bf16.msra.mxu0 %v4845_v60  ;;  %v1606_v19 = vpop.f32.mrb[30].mxu1 }
 0x3d6   : > { %3401 = vmatprep.subr.bf16.mxu0 %v5739_v49 }
 0x3d7   : > { %3440 = vmatpush3.bf16.msra.mxu1 %v4467_v63  ;;  %v4868_v63 = vld [vmem:[%s5634_s3 + $0x8] ss:$12 sps:$4 sm:$0xff]  }
 0x3d8   : > { %3441 = vmatprep.subr.bf16.mxu1 %v5739_v49 }
 0x3d9   : > { %3402 = vmatpush3.bf16.msra.mxu0 %v4854_v61 }
 0x3da   : > { %3407 = vmatprep.subr.bf16.mxu0 %v5739_v49 }
 0x3db   : > { %3442 = vmatpush3.bf16.msra.mxu1 %v4476_v0  ;;  %v1607_v0 = vpop.f32.mrb[31].mxu1 }
 0x3dc   : > { %3404 = vmatmul.mubr.bf16.vlgmr.msra.gmra.mrb[32].mxu0 %v4745_v11  ;;  %3447 = vmatprep.subr.bf16.mxu1 %v5739_v49  ;;  %v4941_v11 = vld [vmem:[%s5633_s2 + $0xac] ss:$12 sps:$4 sm:$0xff]  }
 0x3dd   : > { %3408 = vmatpush3.bf16.msra.mxu0 %v4868_v63  ;;  %3423 = vmatprep.mubr.msk.bf16.mxu0 %vm3967_vm0, %v5739_v49  ;;  %5776 = vst [vmem:[#allocation4_spill] sm:$0xff] %v4941_v11 }
 0x3de   : > { %3409 = vmatprep.subr.bf16.mxu0 %v5739_v49 }
 0x3e1   : > { %3410 = vmatpush3.bf16.msra.mxu0 %v4284_v39  ;;  %v4899_v39 = vld [vmem:[%s5633_s2 + $0x48] ss:$12 sps:$4 sm:$0xff]  }
 0x3e2   : > { %3411 = vmatprep.subr.bf16.mxu0 %v5739_v49 }
 0x3e5   : > { %3412 = vmatpush3.bf16.msra.mxu0 %v4305_v42  ;;  %v4905_v42 = vld [vmem:[%s5633_s2 + $0x64] ss:$12 sps:$4 sm:$0xff]  }
 0x3e6   : > { %3413 = vmatprep.subr.bf16.mxu0 %v5739_v49 }
 0x3e9   : > { %3414 = vmatpush3.bf16.msra.mxu0 %v4324_v45  ;;  %v4911_v45 = vld [vmem:[%s5633_s2 + $0x60] ss:$12 sps:$4 sm:$0xff]  }
 0x3ea   : > { %3415 = vmatprep.subr.bf16.mxu0 %v5739_v49 }
 0x3ed   : > { %3416 = vmatpush3.bf16.msra.mxu0 %v4343_v48  ;;  %v4917_v48 = vld [vmem:[%s5633_s2 + $0x7c] ss:$12 sps:$4 sm:$0xff]  }
 0x3ee   : > { %3417 = vmatprep.subr.bf16.mxu0 %v5739_v49 }
 0x3f1   : > { %3418 = vmatpush3.bf16.msra.mxu0 %v4362_v51  ;;  %v4923_v51 = vld [vmem:[%s5633_s2 + $0x78] ss:$12 sps:$4 sm:$0xff]  }
 0x3f2   : > { %3419 = vmatprep.subr.bf16.mxu0 %v5739_v49 }
 0x3f5   : > { %3420 = vmatpush3.bf16.msra.mxu0 %v4372_v53  ;;  %v4929_v53 = vld [vmem:[%s5633_s2 + $0x94] ss:$12 sps:$4 sm:$0xff]  }
 0x3f6   : > { %3421 = vmatprep.subr.bf16.mxu0 %v5739_v49 }
 0x3f9   : > { %3422 = vmatpush3.bf16.msra.mxu0 %v4382_v54  ;;  %v4935_v54 = vld [vmem:[%s5633_s2 + $0x90] ss:$12 sps:$4 sm:$0xff]  }
 0x3fa   : > { %1808 = vmatprep.subr.bf16.mxu0 %v4690_v22 }
 0x3fc   : > { %3424 = vmatmul.mubr.bf16.vlgmr.msra.gmra.mrb[36].mxu0 %v4781_v24  ;;  %v5795_v24 = vld [vmem:[#allocation3_spill] sm:$0xff] }
 0x3fd   : > { %1809 = vmatpush1.bf16.msra.mxu0 %v4696_v26  ;;  %1840 = vmatprep.mubr.bf16.mxu0 %v5740_v28 }
 0x3fe   : > { %1810 = vmatprep.subr.bf16.mxu0 %v4703_v30 }
 0x401   : > { %1811 = vmatpush1.bf16.msra.mxu0 %v4709_v33 }
 0x402   : > { %1812 = vmatprep.subr.bf16.mxu0 %v4715_v36 }
 0x405   : > { %1813 = vmatpush1.bf16.msra.mxu0 %v4721_v38 }
 0x406   : > { %1814 = vmatprep.subr.bf16.mxu0 %v4727_v5 }
 0x409   : > { %1815 = vmatpush1.bf16.msra.mxu0 %v4899_v39 }
 0x40a   : > { %1816 = vmatprep.subr.bf16.mxu0 %v4905_v42 }
 0x40d   : > { %1817 = vmatpush1.bf16.msra.mxu0 %v4911_v45 }
 0x40e   : > { %1818 = vmatprep.subr.bf16.mxu0 %v4917_v48 }
 0x411   : > { %1819 = vmatpush1.bf16.msra.mxu0 %v4923_v51 }
 0x412   : > { %1820 = vmatprep.subr.bf16.mxu0 %v4929_v53 }
 0x415   : > { %1821 = vmatpush1.bf16.msra.mxu0 %v4935_v54 }
 0x416   : > { %1822 = vmatprep.subr.bf16.mxu0 %v4941_v11 }
 0x419   : > { %1823 = vmatpush1.bf16.msra.mxu0 %v4947_v12 }
 0x41a   : > { %1890 = vmatprep.subr.bf16.mxu0 %v4953_v14 }
 0x41c   : > { %1841 = vmatmul.mubr.bf16.vlgmr.msra.gmra.mrb[40].mxu0 %v4961_v17 }
 0x41d   : > { %1891 = vmatpush1.bf16.msra.mxu0 %v4967_v10  ;;  %1922 = vmatprep.mubr.bf16.mxu0 %v5740_v28 }
 0x41e   : > { %1892 = vmatprep.subr.bf16.mxu0 %v4974_v18 }
 0x421   : > { %1893 = vmatpush1.bf16.msra.mxu0 %v4980_v20 }
 0x422   : > { %1894 = vmatprep.subr.bf16.mxu0 %v4986_v21 }
 0x425   : > { %1895 = vmatpush1.bf16.msra.mxu0 %v4992_v13 }
 0x426   : > { %1896 = vmatprep.subr.bf16.mxu0 %v4998_v23 }
 0x429   : > { %1897 = vmatpush1.bf16.msra.mxu0 %v5004_v1 }
 0x42a   : > { %1898 = vmatprep.subr.bf16.mxu0 %v5010_v57 }
 0x42d   : > { %1899 = vmatpush1.bf16.msra.mxu0 %v5016_v46 }
 0x42e   : > { %1900 = vmatprep.subr.bf16.mxu0 %v5022_v35 }
 0x431   : > { %1901 = vmatpush1.bf16.msra.mxu0 %v5028_v47 }
 0x432   : > { %1902 = vmatprep.subr.bf16.mxu0 %v5034_v4 }
 0x435   : > { %1903 = vmatpush1.bf16.msra.mxu0 %v5040_v56 }
 0x436   : > { %1904 = vmatprep.subr.bf16.mxu0 %v5046_v8 }
 0x439   : > { %1905 = vmatpush1.bf16.msra.mxu0 %v5052_v9 }
 0x43a   : > { %3487 = vmatprep.subr.bf16.mxu0 %v5739_v49 }
 0x48f   : > { %v1550_v6 = vpop.f32.mrb[28].mxu0 }
 0x490   : > { %v1551_v7 = vadd.f32 %v4613_v40, %v1550_v6  ;;  %v3385_v29 = vpop.f32.mrb[29].mxu0  ;;  %v1684_v25 = vpop.f32.mrb[32].mxu1 }
 0x491   : > { %v1731_v44 = vadd.f32 %v1684_v25, %v4858_v62  ;;  %v1553_v43 = vpop.f32.mrb[30].mxu0  ;;  %v1686_v27 = vpop.f32.mrb[33].mxu1 }
 0x492   : > { %v1556_v19 = vadd.f32 %v5795_v24, %v1551_v7  ;;  %v1732_v0 = vadd.f32 %v1686_v27, %v4862_v16  ;;  %v3386_v15 = vpop.f32.mrb[31].mxu0  ;;  %v1688_v52 = vpop.f32.mrb[34].mxu1 }
 0x493   : > { %v1689_v8 = vpop.f32.mrb[35].mxu1  ;;  %v1733_v9 = vadd.f32 %v1731_v44, %v4488_v37 }
 0x494   : > { %2967 = vst [vmem:[%s4053_s25 + $0x10] sm:$0xff] %v1556_v19  ;;  %v1734_v62 = vadd.f32 %v1732_v0, %v4491_v41 }
 0x495   : > { %v2969_v6 = vmul.f32 -1.442695, %v1733_v9 }
 0x496   : > { %v2970_v43 = vmul.f32 -1.442695, %v1734_v62 }
 0x497   : > { %3816 = vpow2.f32 %v2969_v6 }
 0x498   : > { %3818 = vpow2.f32 %v2970_v43 }
 0x4a1   : > { %v3817_v25 = vpop.eup %3816 }
 0x4a2   : > { %v1741_v7 = vadd.f32 1.0, %v3817_v25  ;;  %v3819_v52 = vpop.eup %3818 }
 0x4a3   : > { %v1742_v24 = vadd.f32 1.0, %v3819_v52  ;;  %v5111_v52 = vld [vmem:[%s5638_s7 + $0x18] sm:$0xff]  }
 0x4a4   : > { %3820 = vrcp.f32 %v1741_v7  ;;  %v5082_v7 = vld [vmem:[%s5638_s7] sm:$0xff]  }
 0x4ae   : > { %v3821_v44 = vpop.eup %3820 }
 0x4af   : > { %v1643_v56 = vpop.f32.mrb[32].mxu0 }
 0x4b0   : > { %v3405_v4 = vpop.f32.mrb[33].mxu0 }
 0x4b1   : > { %v1646_v47 = vpop.f32.mrb[34].mxu0 }
 0x4b2   : > { %v3406_v29 = vpop.f32.mrb[35].mxu0  ;;  %v1747_v47 = vadd.f32 %v4503_v31, %v1643_v56 }
 0x4b3   : > { %v1802_v29 = vstv %s1801_s30 }
 0x4b4   : > { %vm1803_vm4 = vcmp.eq.s32.totalorder %v1802_v29, 1  ;;  %v5191_v29 = vld [vmem:[%s5634_s3 + $0x80] ss:$12 sps:$4 sm:$0xff]  }
 0x4cf   : > { %v1725_v16 = vpop.f32.mrb[36].mxu0 }
 0x4d0   : > { %v1748_v15 = vadd.f32 %v4497_v3, %v1725_v16  ;;  %v3425_v8 = vpop.f32.mrb[37].mxu0  ;;  %v5102_v16 = vld [vmem:[%s5638_s7 + $0x10] sm:$0xff]  }
 0x4d1   : > { %v1728_v27 = vpop.f32.mrb[38].mxu0  ;;  %v5129_v8 = vld [vmem:[%s5638_s7 + $0x28] sm:$0xff]  }
 0x4d2   : > { %v1749_v4 = vmul.f32 %v3821_v44, %v1748_v15  ;;  %v3426_v9 = vpop.f32.mrb[39].mxu0  ;;  %v5120_v15 = vld [vmem:[%s5638_s7 + $0x20] sm:$0xff]   ;;  %v5138_v44 = vld [vmem:[%s5638_s7 + $0x30] sm:$0xff]  }
 0x4d4   : > { %v1750_v19 = vadd.f32 %v1749_v4, %v1747_v47  ;;  %v5149_v47 = vld [vmem:[%s5638_s7 + $0x38] sm:$0xff]  }
 0x4d6   : > { %3822 = vtanh.f32 %v1750_v19  ;;  %v5163_v19 = vld [vmem:[%s5634_s3 + $0x20] ss:$12 sps:$4 sm:$0xff]  }
 0x4d7   : > { %3824 = vrcp.f32 %v1742_v24 }
 0x4e0   : > { %v3823_v0 = vpop.eup %3822 }
 0x4e1   : > { %v1752_v6 = vsub.f32 %v4777_v32, %v3823_v0  ;;  %v3825_v62 = vpop.eup %3824 }
 0x4e3   : > { %v1753_v3 = vmul.f32 %v3825_v62, %v1752_v6  ;;  %v5184_v6 = vld [vmem:[%s5634_s3 + $0x68] ss:$12 sps:$4 sm:$0xff]   ;;  %v5198_v62 = vld [vmem:[%s5634_s3 + $0x98] ss:$12 sps:$4 sm:$0xff]  }
 0x4e5   : > { %v1754_v25 = vadd.f32 %v3823_v0, %v1753_v3  ;;  %v5177_v0 = vld [vmem:[%s5634_s3 + $0x50] ss:$12 sps:$4 sm:$0xff]  }
 0x4e6   : > { %v5205_v3 = vld [vmem:[%s5634_s3 + $0xb0] ss:$12 sps:$4 sm:$0xff]  }
 0x4e7   : > { %v1755_v43 = vpack.c.bf16 %v1754_v25, %v1754_v25  ;;  %v5068_v31 = vsel %vm1803_vm4, %v1754_v25, %v4777_v32  ;;  %v5093_v32 = vld [vmem:[%s5638_s7 + $0x8] sm:$0xff]  }
 0x4e8   : > { %v5072_v56 = vpack.c.bf16 %v5068_v31, %v5068_v31  ;;  %v5228_v25 = vld [vmem:[%s4048_s22 + $0x28] sm:$0xff] }
 0x4e9   : > { %3444 = vmatmul.mubr.bf16.vlgmr.msra.gmra.mrb[36].mxu1 %v1755_v43  ;;  %5796 = vst [vmem:[#allocation3_spill] sm:$0xff] %v5228_v25  ;;  %v5232_v43 = vpack.c.bf16 %v5228_v25, %v5228_v25  ;;  %v5800_v25 = vld [vmem:[#allocation21_spill] sm:$0xff] }
 0x4ea   : > { %3448 = vmatpush3.bf16.msra.mxu1 %v4786_v50  ;;  %1923 = vmatmul.mubr.bf16.vlgmr.msra.gmra.mrb[44].mxu0 %v5072_v56 }
 0x4eb   : > { %3449 = vmatprep.subr.bf16.mxu1 %v5739_v49  ;;  %3463 = vmatprep.mubr.msk.bf16.mxu1 %vm3967_vm0, %v5739_v49 }
 0x4ec   : > { %3488 = vmatpush3.bf16.msra.mxu0 %v5082_v7  ;;  %3503 = vmatprep.mubr.msk.bf16.mxu0 %vm3967_vm0, %v5739_v49 }
 0x4ed   : > { %3489 = vmatprep.subr.bf16.mxu0 %v5739_v49 }
 0x4ee   : > { %3450 = vmatpush3.bf16.msra.mxu1 %v4800_v34 }
 0x4ef   : > { %3451 = vmatprep.subr.bf16.mxu1 %v5739_v49  ;;  %v5144_v27 = vpop.f32.mrb[40].mxu0 }
 0x4f0   : > { %3490 = vmatpush3.bf16.msra.mxu0 %v5093_v32  ;;  %v5153_v4 = vpop.f32.mrb[41].mxu0 }
 0x4f1   : > { %3491 = vmatprep.subr.bf16.mxu0 %v5739_v49  ;;  %v1846_v9 = vpop.f32.mrb[42].mxu0 }
 0x4f2   : > { %3452 = vmatpush3.bf16.msra.mxu1 %v4809_v55  ;;  %v1847_v24 = vpop.f32.mrb[43].mxu0  ;;  %v5798_v9 = vld [vmem:[#allocation19_spill] sm:$0xff] }
 0x4f3   : > { %3453 = vmatprep.subr.bf16.mxu1 %v5739_v49  ;;  %v5799_v24 = vld [vmem:[#allocation20_spill] sm:$0xff] }
 0x4f4   : > { %3492 = vmatpush3.bf16.msra.mxu0 %v5102_v16 }
 0x4f5   : > { %3493 = vmatprep.subr.bf16.mxu0 %v5739_v49 }
 0x4f6   : > { %3454 = vmatpush3.bf16.msra.mxu1 %v4818_v2 }
 0x4f7   : > { %3455 = vmatprep.subr.bf16.mxu1 %v5739_v49 }
 0x4f8   : > { %3494 = vmatpush3.bf16.msra.mxu0 %v5111_v52 }
 0x4f9   : > { %3495 = vmatprep.subr.bf16.mxu0 %v5739_v49 }
 0x4fa   : > { %3456 = vmatpush3.bf16.msra.mxu1 %v4827_v58 }
 0x4fb   : > { %3457 = vmatprep.subr.bf16.mxu1 %v5739_v49 }
 0x4fc   : > { %3496 = vmatpush3.bf16.msra.mxu0 %v5120_v15 }
 0x4fd   : > { %3497 = vmatprep.subr.bf16.mxu0 %v5739_v49 }
 0x4fe   : > { %3458 = vmatpush3.bf16.msra.mxu1 %v4836_v59 }
 0x4ff   : > { %3459 = vmatprep.subr.bf16.mxu1 %v5739_v49 }
 0x500   : > { %3498 = vmatpush3.bf16.msra.mxu0 %v5129_v8 }
 0x501   : > { %3499 = vmatprep.subr.bf16.mxu0 %v5739_v49 }
 0x502   : > { %3460 = vmatpush3.bf16.msra.mxu1 %v4845_v60 }
 0x503   : > { %3461 = vmatprep.subr.bf16.mxu1 %v5739_v49 }
 0x504   : > { %3500 = vmatpush3.bf16.msra.mxu0 %v5138_v44 }
 0x505   : > { %3501 = vmatprep.subr.bf16.mxu0 %v5739_v49 }
 0x506   : > { %3462 = vmatpush3.bf16.msra.mxu1 %v4854_v61 }
 0x507   : > { %3467 = vmatprep.subr.bf16.mxu1 %v5739_v49 }
 0x508   : > { %3502 = vmatpush3.bf16.msra.mxu0 %v5149_v47 }
 0x509   : > { %3464 = vmatmul.mubr.bf16.vlgmr.msra.gmra.mrb[40].mxu1 %v4961_v17  ;;  %3507 = vmatprep.subr.bf16.mxu0 %v5739_v49  ;;  %v5170_v17 = vld [vmem:[%s5634_s3 + $0x38] ss:$12 sps:$4 sm:$0xff]  }
 0x50a   : > { %3468 = vmatpush3.bf16.msra.mxu1 %v4868_v63  ;;  %3483 = vmatprep.mubr.msk.bf16.mxu1 %vm3967_vm0, %v5739_v49 }
 0x50b   : > { %3469 = vmatprep.subr.bf16.mxu1 %v5739_v49 }
 0x50e   : > { %3470 = vmatpush3.bf16.msra.mxu1 %v5163_v19 }
 0x50f   : > { %3471 = vmatprep.subr.bf16.mxu1 %v5739_v49 }
 0x512   : > { %3472 = vmatpush3.bf16.msra.mxu1 %v5170_v17 }
 0x513   : > { %3473 = vmatprep.subr.bf16.mxu1 %v5739_v49 }
 0x516   : > { %3474 = vmatpush3.bf16.msra.mxu1 %v5177_v0 }
 0x517   : > { %3475 = vmatprep.subr.bf16.mxu1 %v5739_v49 }
 0x51a   : > { %3476 = vmatpush3.bf16.msra.mxu1 %v5184_v6 }
 0x51b   : > { %3477 = vmatprep.subr.bf16.mxu1 %v5739_v49 }
 0x51e   : > { %3478 = vmatpush3.bf16.msra.mxu1 %v5191_v29 }
 0x51f   : > { %3479 = vmatprep.subr.bf16.mxu1 %v5739_v49 }
 0x522   : > { %3480 = vmatpush3.bf16.msra.mxu1 %v5198_v62 }
 0x523   : > { %3481 = vmatprep.subr.bf16.mxu1 %v5739_v49 }
 0x526   : > { %3482 = vmatpush3.bf16.msra.mxu1 %v5205_v3 }
 0x527   : > { %2048 = vmatprep.subr.bf16.mxu1 %v4690_v22 }
 0x529   : > { %3484 = vmatmul.mubr.bf16.vlgmr.msra.gmra.mrb[44].mxu1 %v5072_v56  ;;  %v5797_v56 = vld [vmem:[#allocation18_spill] sm:$0xff] }
 0x52a   : > { %2049 = vmatpush1.bf16.msra.mxu1 %v4696_v26  ;;  %2080 = vmatprep.mubr.bf16.mxu1 %v5740_v28 }
 0x52b   : > { %2050 = vmatprep.subr.bf16.mxu1 %v4703_v30 }
 0x52e   : > { %2051 = vmatpush1.bf16.msra.mxu1 %v4709_v33 }
 0x52f   : > { %2052 = vmatprep.subr.bf16.mxu1 %v4715_v36 }
 0x532   : > { %2053 = vmatpush1.bf16.msra.mxu1 %v4721_v38 }
 0x533   : > { %2054 = vmatprep.subr.bf16.mxu1 %v4727_v5 }
 0x536   : > { %2055 = vmatpush1.bf16.msra.mxu1 %v4899_v39 }
 0x537   : > { %2056 = vmatprep.subr.bf16.mxu1 %v4905_v42 }
 0x53a   : > { %2057 = vmatpush1.bf16.msra.mxu1 %v4911_v45 }
 0x53b   : > { %2058 = vmatprep.subr.bf16.mxu1 %v4917_v48 }
 0x53e   : > { %2059 = vmatpush1.bf16.msra.mxu1 %v4923_v51 }
 0x53f   : > { %2060 = vmatprep.subr.bf16.mxu1 %v4929_v53 }
 0x542   : > { %2061 = vmatpush1.bf16.msra.mxu1 %v4935_v54 }
 0x543   : > { %2062 = vmatprep.subr.bf16.mxu1 %v4941_v11 }
 0x546   : > { %2063 = vmatpush1.bf16.msra.mxu1 %v4947_v12 }
 0x547   : > { %2130 = vmatprep.subr.bf16.mxu1 %v4953_v14 }
 0x549   : > { %2081 = vmatmul.mubr.bf16.vlgmr.msra.gmra.mrb[48].mxu1 %v5232_v43 }
 0x54a   : > { %2131 = vmatpush1.bf16.msra.mxu1 %v4967_v10  ;;  %2162 = vmatprep.mubr.bf16.mxu1 %v5740_v28 }
 0x54b   : > { %2132 = vmatprep.subr.bf16.mxu1 %v4974_v18 }
 0x54e   : > { %2133 = vmatpush1.bf16.msra.mxu1 %v4980_v20  ;;  %v5802_v20 = vld [vmem:[#allocation2_spill] sm:$0xff] }
 0x54f   : > { %2134 = vmatprep.subr.bf16.mxu1 %v4986_v21 }
 0x552   : > { %2135 = vmatpush1.bf16.msra.mxu1 %v4992_v13  ;;  %v5801_v13 = vld [vmem:[#allocation22_spill] sm:$0xff] }
 0x553   : > { %2136 = vmatprep.subr.bf16.mxu1 %v4998_v23 }
 0x556   : > { %2137 = vmatpush1.bf16.msra.mxu1 %v5004_v1 }
 0x557   : > { %2138 = vmatprep.subr.bf16.mxu1 %v5010_v57 }
 0x55a   : > { %2139 = vmatpush1.bf16.msra.mxu1 %v5016_v46 }
 0x55b   : > { %2140 = vmatprep.subr.bf16.mxu1 %v5022_v35 }
 0x55e   : > { %2141 = vmatpush1.bf16.msra.mxu1 %v5797_v56 }
 0x55f   : > { %2142 = vmatprep.subr.bf16.mxu1 %v5798_v9 }
 0x562   : > { %2143 = vmatpush1.bf16.msra.mxu1 %v5799_v24 }
 0x563   : > { %2144 = vmatprep.subr.bf16.mxu1 %v5800_v25 }
 0x566   : > { %2145 = vmatpush1.bf16.msra.mxu1 %v5801_v13 }
 0x567   : > { %3547 = vmatprep.subr.bf16.mxu1 %v5739_v49 }
 0x5bc   : > { %v1790_v1 = vpop.f32.mrb[36].mxu1 }
 0x5bd   : > { %v1791_v57 = vadd.f32 %v4613_v40, %v1790_v1  ;;  %v3445_v23 = vpop.f32.mrb[37].mxu1  ;;  %v1924_v46 = vpop.f32.mrb[44].mxu0 }
 0x5be   : > { %v1971_v35 = vadd.f32 %v1924_v46, %v5144_v27  ;;  %v1793_v21 = vpop.f32.mrb[38].mxu1  ;;  %v1926_v56 = vpop.f32.mrb[45].mxu0 }
 0x5bf   : > { %v1796_v9 = vadd.f32 %v5802_v20, %v1791_v57  ;;  %v1972_v24 = vadd.f32 %v1926_v56, %v5153_v4  ;;  %v3446_v18 = vpop.f32.mrb[39].mxu1  ;;  %v1928_v10 = vpop.f32.mrb[46].mxu0  ;;  %v5262_v20 = vld [vmem:[%s5637_s6] ss:$0 sm:$0xff] }
 0x5c0   : > { %v1929_v25 = vpop.f32.mrb[47].mxu0  ;;  %v1973_v13 = vadd.f32 %v1971_v35, %v4488_v37  ;;  %v5268_v35 = vld [vmem:[%s5636_s5] ss:$0 sm:$0xff] }
 0x5c1   : > { %2971 = vst [vmem:[%s4053_s25 + $0x18] sm:$0xff] %v1796_v9  ;;  %v1974_v1 = vadd.f32 %v1972_v24, %v4491_v41 }
 0x5c2   : > { %v2973_v40 = vmul.f32 -1.442695, %v1973_v13 }
 0x5c3   : > { %v2974_v46 = vmul.f32 -1.442695, %v1974_v1  ;;  %v2042_v1 = vstv %s2041_s23 }
 0x5c4   : > { %3826 = vpow2.f32 %v2973_v40  ;;  %vm2043_vm5 = vcmp.eq.s32.totalorder %v2042_v1, 1  ;;  %v5818_v1 = vld [vmem:[#allocation19_spill] sm:$0xff] }
 0x5c5   : > { %3828 = vpow2.f32 %v2974_v46 }
 0x5ce   : > { %v3827_v21 = vpop.eup %3826 }
 0x5cf   : > { %v1981_v27 = vadd.f32 1.0, %v3827_v21  ;;  %v3829_v10 = vpop.eup %3828 }
 0x5d0   : > { %v1982_v9 = vadd.f32 1.0, %v3829_v10 }
 0x5d1   : > { %3830 = vrcp.f32 %v1981_v27 }
 0x5db   : > { %v3831_v13 = vpop.eup %3830 }
 0x5dc   : > { %v1883_v14 = vpop.f32.mrb[40].mxu1 }
 0x5dd   : > { %v3465_v12 = vpop.f32.mrb[41].mxu1  ;;  %v1987_v4 = vadd.f32 %v5268_v35, %v1883_v14 }
 0x5de   : > { %v1886_v11 = vpop.f32.mrb[42].mxu1 }
 0x5df   : > { %v3466_v23 = vpop.f32.mrb[43].mxu1 }
 0x5fc   : > { %v1965_v18 = vpop.f32.mrb[44].mxu1 }
 0x5fd   : > { %v1988_v11 = vadd.f32 %v5262_v20, %v1965_v18  ;;  %v3485_v12 = vpop.f32.mrb[45].mxu1 }
 0x5fe   : > { %v1968_v57 = vpop.f32.mrb[46].mxu1 }
 0x5ff   : > { %v1989_v25 = vmul.f32 %v3831_v13, %v1988_v11  ;;  %v3486_v56 = vpop.f32.mrb[47].mxu1  ;;  %v5810_v57 = vld [vmem:[#allocation11_spill] sm:$0xff] }
 0x600   : > { %v5813_v56 = vld [vmem:[#allocation14_spill] sm:$0xff] }
 0x601   : > { %v1990_v24 = vadd.f32 %v1989_v25, %v1987_v4  ;;  %v5811_v4 = vld [vmem:[#allocation12_spill] sm:$0xff]  ;;  %v5812_v25 = vld [vmem:[#allocation13_spill] sm:$0xff] }
 0x603   : > { %3832 = vtanh.f32 %v1990_v24  ;;  %v5815_v24 = vld [vmem:[#allocation16_spill] sm:$0xff] }
 0x604   : > { %3834 = vrcp.f32 %v1982_v9  ;;  %v5814_v9 = vld [vmem:[#allocation15_spill] sm:$0xff] }
 0x60d   : > { %v3833_v40 = vpop.eup %3832 }
 0x60e   : > { %v1992_v23 = vsub.f32 %v5068_v31, %v3833_v40  ;;  %v3835_v21 = vpop.eup %3834 }
 0x610   : > { %v1993_v46 = vmul.f32 %v3835_v21, %v1992_v23  ;;  %v5817_v23 = vld [vmem:[#allocation18_spill] sm:$0xff]  ;;  %v5819_v21 = vld [vmem:[#allocation20_spill] sm:$0xff] }
 0x612   : > { %v1994_v27 = vadd.f32 %v3833_v40, %v1993_v46  ;;  %v5816_v40 = vld [vmem:[#allocation17_spill] sm:$0xff] }
 0x613   : > { %v5820_v46 = vld [vmem:[#allocation21_spill] sm:$0xff] }
 0x614   : > { %v1995_v18 = vpack.c.bf16 %v1994_v27, %v1994_v27  ;;  %v5274_v14 = vsel %vm2043_vm5, %v1994_v27, %v5068_v31  ;;  %v5821_v27 = vld [vmem:[#allocation22_spill] sm:$0xff] }
 0x615   : > { %v2129_v10 = vpack.c.bf16 %v5274_v14, %v5274_v14 }
 0x616   : > { %3504 = vmatmul.mubr.bf16.vlgmr.msra.gmra.mrb[48].mxu0 %v1995_v18 }
 0x617   : > { %3508 = vmatpush3.bf16.msra.mxu0 %v4786_v50  ;;  %2163 = vmatmul.mubr.bf16.vlgmr.msra.gmra.mrb[52].mxu1 %v2129_v10 }
 0x618   : > { %3509 = vmatprep.subr.bf16.mxu0 %v5739_v49  ;;  %3523 = vmatprep.mubr.msk.bf16.mxu0 %vm3967_vm0, %v5739_v49 }
 0x619   : > { %3548 = vmatpush3.bf16.msra.mxu1 %v5082_v7  ;;  %3563 = vmatprep.mubr.msk.bf16.mxu1 %vm3967_vm0, %v5739_v49 }
 0x61a   : > { %3549 = vmatprep.subr.bf16.mxu1 %v5739_v49 }
 0x61b   : > { %3510 = vmatpush3.bf16.msra.mxu0 %v4800_v34 }
 0x61c   : > { %3511 = vmatprep.subr.bf16.mxu0 %v5739_v49  ;;  %v5312_v31 = vpop.f32.mrb[48].mxu1 }
 0x61d   : > { %3550 = vmatpush3.bf16.msra.mxu1 %v5093_v32  ;;  %v5316_v11 = vpop.f32.mrb[49].mxu1 }
 0x61e   : > { %3551 = vmatprep.subr.bf16.mxu1 %v5739_v49  ;;  %v2086_v12 = vpop.f32.mrb[50].mxu1 }
 0x61f   : > { %3512 = vmatpush3.bf16.msra.mxu0 %v4809_v55  ;;  %v2087_v13 = vpop.f32.mrb[51].mxu1 }
 0x620   : > { %3513 = vmatprep.subr.bf16.mxu0 %v5739_v49 }
 0x621   : > { %3552 = vmatpush3.bf16.msra.mxu1 %v5102_v16 }
 0x622   : > { %3553 = vmatprep.subr.bf16.mxu1 %v5739_v49 }
 0x623   : > { %3514 = vmatpush3.bf16.msra.mxu0 %v4818_v2 }
 0x624   : > { %3515 = vmatprep.subr.bf16.mxu0 %v5739_v49 }
 0x625   : > { %3554 = vmatpush3.bf16.msra.mxu1 %v5111_v52 }
 0x626   : > { %3555 = vmatprep.subr.bf16.mxu1 %v5739_v49 }
 0x627   : > { %3516 = vmatpush3.bf16.msra.mxu0 %v4827_v58 }
 0x628   : > { %3517 = vmatprep.subr.bf16.mxu0 %v5739_v49 }
 0x629   : > { %3556 = vmatpush3.bf16.msra.mxu1 %v5120_v15 }
 0x62a   : > { %3557 = vmatprep.subr.bf16.mxu1 %v5739_v49 }
 0x62b   : > { %3518 = vmatpush3.bf16.msra.mxu0 %v4836_v59 }
 0x62c   : > { %3519 = vmatprep.subr.bf16.mxu0 %v5739_v49 }
 0x62d   : > { %3558 = vmatpush3.bf16.msra.mxu1 %v5129_v8 }
 0x62e   : > { %3559 = vmatprep.subr.bf16.mxu1 %v5739_v49 }
 0x62f   : > { %3520 = vmatpush3.bf16.msra.mxu0 %v4845_v60 }
 0x630   : > { %3521 = vmatprep.subr.bf16.mxu0 %v5739_v49 }
 0x631   : > { %3560 = vmatpush3.bf16.msra.mxu1 %v5138_v44 }
 0x632   : > { %3561 = vmatprep.subr.bf16.mxu1 %v5739_v49 }
 0x633   : > { %3522 = vmatpush3.bf16.msra.mxu0 %v4854_v61 }
 0x634   : > { %3527 = vmatprep.subr.bf16.mxu0 %v5739_v49 }
 0x635   : > { %3562 = vmatpush3.bf16.msra.mxu1 %v5149_v47 }
 0x636   : > { %3524 = vmatmul.mubr.bf16.vlgmr.msra.gmra.mrb[52].mxu0 %v5232_v43  ;;  %3567 = vmatprep.subr.bf16.mxu1 %v5739_v49  ;;  %v5809_v43 = vld [vmem:[#allocation10_spill] sm:$0xff] }
 0x637   : > { %3528 = vmatpush3.bf16.msra.mxu0 %v4868_v63  ;;  %3543 = vmatprep.mubr.msk.bf16.mxu0 %vm3967_vm0, %v5739_v49 }
 0x638   : > { %3529 = vmatprep.subr.bf16.mxu0 %v5739_v49 }
 0x63b   : > { %3530 = vmatpush3.bf16.msra.mxu0 %v5163_v19 }
 0x63c   : > { %3531 = vmatprep.subr.bf16.mxu0 %v5739_v49 }
 0x63f   : > { %3532 = vmatpush3.bf16.msra.mxu0 %v5170_v17 }
 0x640   : > { %3533 = vmatprep.subr.bf16.mxu0 %v5739_v49 }
 0x643   : > { %3534 = vmatpush3.bf16.msra.mxu0 %v5177_v0 }
 0x644   : > { %3535 = vmatprep.subr.bf16.mxu0 %v5739_v49 }
 0x647   : > { %3536 = vmatpush3.bf16.msra.mxu0 %v5184_v6 }
 0x648   : > { %3537 = vmatprep.subr.bf16.mxu0 %v5739_v49 }
 0x64b   : > { %3538 = vmatpush3.bf16.msra.mxu0 %v5191_v29 }
 0x64c   : > { %3539 = vmatprep.subr.bf16.mxu0 %v5739_v49 }
 0x64f   : > { %3540 = vmatpush3.bf16.msra.mxu0 %v5198_v62 }
 0x650   : > { %3541 = vmatprep.subr.bf16.mxu0 %v5739_v49 }
 0x653   : > { %3542 = vmatpush3.bf16.msra.mxu0 %v5205_v3 }
 0x654   : > { %2288 = vmatprep.subr.bf16.mxu0 %v4690_v22  ;;  %v5803_v22 = vld [vmem:[#allocation4_spill] sm:$0xff] }
 0x656   : > { %3544 = vmatmul.mubr.bf16.vlgmr.msra.gmra.mrb[56].mxu0 %v2129_v10  ;;  %v5382_v10 = vld [vmem:[%s5639_s8] ss:$0 sm:$0xff] }
 0x657   : > { %2289 = vmatpush1.bf16.msra.mxu0 %v4696_v26  ;;  %2320 = vmatprep.mubr.bf16.mxu0 %v5740_v28  ;;  %v5804_v26 = vld [vmem:[#allocation5_spill] sm:$0xff] }
 0x658   : > { %2290 = vmatprep.subr.bf16.mxu0 %v4703_v30  ;;  %v5805_v30 = vld [vmem:[#allocation6_spill] sm:$0xff] }
 0x65b   : > { %2291 = vmatpush1.bf16.msra.mxu0 %v4709_v33  ;;  %v5355_v33 = vld [vmem:[%s4048_s22 + $0x30] sm:$0xff] }
 0x65c   : > { %2292 = vmatprep.subr.bf16.mxu0 %v4715_v36  ;;  %5806 = vst [vmem:[#allocation2_spill] sm:$0xff] %v5355_v33  ;;  %v5359_v36 = vpack.c.bf16 %v5355_v33, %v5355_v33 }
 0x65f   : > { %2293 = vmatpush1.bf16.msra.mxu0 %v4721_v38  ;;  %v5807_v38 = vld [vmem:[#allocation8_spill] sm:$0xff] }
 0x660   : > { %2294 = vmatprep.subr.bf16.mxu0 %v4727_v5  ;;  %v5808_v5 = vld [vmem:[#allocation9_spill] sm:$0xff] }
 0x663   : > { %2295 = vmatpush1.bf16.msra.mxu0 %v4899_v39 }
 0x664   : > { %2296 = vmatprep.subr.bf16.mxu0 %v4905_v42 }
 0x667   : > { %2297 = vmatpush1.bf16.msra.mxu0 %v4911_v45 }
 0x668   : > { %2298 = vmatprep.subr.bf16.mxu0 %v4917_v48 }
 0x66b   : > { %2299 = vmatpush1.bf16.msra.mxu0 %v4923_v51 }
 0x66c   : > { %2300 = vmatprep.subr.bf16.mxu0 %v4929_v53 }
 0x66f   : > { %2301 = vmatpush1.bf16.msra.mxu0 %v4935_v54 }
 0x670   : > { %2302 = vmatprep.subr.bf16.mxu0 %v5803_v22 }
 0x673   : > { %2303 = vmatpush1.bf16.msra.mxu0 %v5804_v26 }
 0x674   : > { %2370 = vmatprep.subr.bf16.mxu0 %v5805_v30 }
 0x676   : > { %2321 = vmatmul.mubr.bf16.vlgmr.msra.gmra.mrb[60].mxu0 %v5359_v36 }
 0x677   : > { %2371 = vmatpush1.bf16.msra.mxu0 %v5807_v38  ;;  %2402 = vmatprep.mubr.bf16.mxu0 %v5740_v28 }
 0x678   : > { %2372 = vmatprep.subr.bf16.mxu0 %v5808_v5 }
 0x67b   : > { %2373 = vmatpush1.bf16.msra.mxu0 %v5809_v43 }
 0x67c   : > { %2374 = vmatprep.subr.bf16.mxu0 %v5810_v57 }
 0x67f   : > { %2375 = vmatpush1.bf16.msra.mxu0 %v5811_v4 }
 0x680   : > { %2376 = vmatprep.subr.bf16.mxu0 %v5812_v25 }
 0x683   : > { %2377 = vmatpush1.bf16.msra.mxu0 %v5813_v56 }
 0x684   : > { %2378 = vmatprep.subr.bf16.mxu0 %v5814_v9 }
 0x687   : > { %2379 = vmatpush1.bf16.msra.mxu0 %v5815_v24 }
 0x688   : > { %2380 = vmatprep.subr.bf16.mxu0 %v5816_v40 }
 0x68b   : > { %2381 = vmatpush1.bf16.msra.mxu0 %v5817_v23 }
 0x68c   : > { %2382 = vmatprep.subr.bf16.mxu0 %v5818_v1 }
 0x68f   : > { %2383 = vmatpush1.bf16.msra.mxu0 %v5819_v21 }
 0x690   : > { %2384 = vmatprep.subr.bf16.mxu0 %v5820_v46  ;;  %v5822_v46 = vld [vmem:[#allocation7_spill] sm:$0xff] }
 0x693   : > { %2385 = vmatpush1.bf16.msra.mxu0 %v5821_v27 }
 0x694   : > { %3607 = vmatprep.subr.bf16.mxu0 %v5739_v49 }
 0x6e9   : > { %v2030_v18 = vpop.f32.mrb[48].mxu0 }
 0x6ea   : > { %v2031_v12 = vadd.f32 %v5382_v10, %v2030_v18  ;;  %v3505_v13 = vpop.f32.mrb[49].mxu0  ;;  %v2164_v33 = vpop.f32.mrb[52].mxu1 }
 0x6eb   : > { %v2211_v1 = vadd.f32 %v2164_v33, %v5312_v31  ;;  %v2033_v21 = vpop.f32.mrb[50].mxu0  ;;  %v2166_v23 = vpop.f32.mrb[53].mxu1 }
 0x6ec   : > { %v2036_v40 = vadd.f32 %v5822_v46, %v2031_v12  ;;  %v2212_v27 = vadd.f32 %v2166_v23, %v5316_v11  ;;  %v3506_v24 = vpop.f32.mrb[51].mxu0  ;;  %v2168_v9 = vpop.f32.mrb[54].mxu1 }
 0x6ed   : > { %v2169_v56 = vpop.f32.mrb[55].mxu1  ;;  %v2213_v25 = vadd.f32 %v2211_v1, %v4488_v37 }
 0x6ee   : > { %2975 = vst [vmem:[%s4053_s25 + $0x20] sm:$0xff] %v2036_v40  ;;  %v2214_v31 = vadd.f32 %v2212_v27, %v4491_v41 }
 0x6ef   : > { %v2977_v18 = vmul.f32 -1.442695, %v2213_v25 }
 0x6f0   : > { %v2978_v21 = vmul.f32 -1.442695, %v2214_v31 }
 0x6f1   : > { %3836 = vpow2.f32 %v2977_v18 }
 0x6f2   : > { %3838 = vpow2.f32 %v2978_v21 }
 0x6fb   : > { %v3837_v33 = vpop.eup %3836 }
 0x6fc   : > { %v2221_v46 = vadd.f32 1.0, %v3837_v33  ;;  %v3839_v9 = vpop.eup %3838 }
 0x6fd   : > { %v2222_v1 = vadd.f32 1.0, %v3839_v9  ;;  %v5491_v9 = vld [vmem:[%s4048_s22 + $0x38] sm:$0xff]  ;;  %s2519_s22 = sadd.s32 6, %s4041_s17 }
 0x6fe   : > { %3840 = vrcp.f32 %v2221_v46  ;;  %p2520_p12 = scmp.lt.s32.totalorder %s2519_s22, 12 }
 0x700   : > { %s2521_s29 = scalar_select %p2520_p12, 1, 0 }
 0x708   : > { %v3841_v40 = vpop.eup %3840 }
 0x709   : > { %v2123_v4 = vpop.f32.mrb[52].mxu0 }
 0x70a   : > { %v3525_v57 = vpop.f32.mrb[53].mxu0 }
 0x70b   : > { %v2126_v43 = vpop.f32.mrb[54].mxu0 }
 0x70c   : > { %v3526_v13 = vpop.f32.mrb[55].mxu0  ;;  %v2227_v43 = vadd.f32 %v5268_v35, %v2123_v4 }
 0x70d   : > { %v2282_v13 = vstv %s2281_s28 }
 0x70e   : > { %vm2283_vm6 = vcmp.eq.s32.totalorder %v2282_v13, 1 }
 0x729   : > { %v2205_v11 = vpop.f32.mrb[56].mxu0 }
 0x72a   : > { %v2228_v56 = vadd.f32 %v5262_v20, %v2205_v11  ;;  %v3545_v24 = vpop.f32.mrb[57].mxu0 }
 0x72b   : > { %v2208_v23 = vpop.f32.mrb[58].mxu0 }
 0x72c   : > { %v2229_v57 = vmul.f32 %v3841_v40, %v2228_v56  ;;  %v3546_v25 = vpop.f32.mrb[59].mxu0  ;;  %v5835_v56 = vld [vmem:[#allocation22_spill] sm:$0xff] }
 0x72e   : > { %v2230_v12 = vadd.f32 %v2229_v57, %v2227_v43 }
 0x730   : > { %3842 = vtanh.f32 %v2230_v12  ;;  %v5836_v12 = vld [vmem:[#allocation3_spill] sm:$0xff] }
 0x731   : > { %3844 = vrcp.f32 %v2222_v1 }
 0x73a   : > { %v3843_v27 = vpop.eup %3842 }
 0x73b   : > { %v2232_v18 = vsub.f32 %v5274_v14, %v3843_v27  ;;  %v3845_v31 = vpop.eup %3844 }
 0x73d   : > { %v2233_v33 = vmul.f32 %v3845_v31, %v2232_v18 }
 0x73f   : > { %v2234_v21 = vadd.f32 %v3843_v27, %v2233_v33 }
 0x741   : > { %v2235_v46 = vpack.c.bf16 %v2234_v21, %v2234_v21  ;;  %v5396_v4 = vsel %vm2283_vm6, %v2234_v21, %v5274_v14  ;;  %v3930_v14 = vld [vmem:[%s5633_s2 + $0x30] ss:$12 sps:$4 sm:$0xff]  }
 0x742   : > { %v2369_v11 = vpack.c.bf16 %v5396_v4, %v5396_v4 }
 0x743   : > { %3564 = vmatmul.mubr.bf16.vlgmr.msra.gmra.mrb[56].mxu1 %v2235_v46 }
 0x744   : > { %3568 = vmatpush3.bf16.msra.mxu1 %v4786_v50  ;;  %2403 = vmatmul.mubr.bf16.vlgmr.msra.gmra.mrb[64].mxu0 %v2369_v11 }
 0x745   : > { %3569 = vmatprep.subr.bf16.mxu1 %v5739_v49  ;;  %3583 = vmatprep.mubr.msk.bf16.mxu1 %vm3967_vm0, %v5739_v49 }
 0x746   : > { %3608 = vmatpush3.bf16.msra.mxu0 %v5082_v7  ;;  %3623 = vmatprep.mubr.msk.bf16.mxu0 %vm3967_vm0, %v5739_v49 }
 0x747   : > { %3609 = vmatprep.subr.bf16.mxu0 %v5739_v49 }
 0x748   : > { %3570 = vmatpush3.bf16.msra.mxu1 %v4800_v34 }
 0x749   : > { %3571 = vmatprep.subr.bf16.mxu1 %v5739_v49  ;;  %v5434_v50 = vpop.f32.mrb[60].mxu0 }
 0x74a   : > { %3610 = vmatpush3.bf16.msra.mxu0 %v5093_v32  ;;  %v5438_v34 = vpop.f32.mrb[61].mxu0 }
 0x74b   : > { %3611 = vmatprep.subr.bf16.mxu0 %v5739_v49 }
 0x74c   : > { %3572 = vmatpush3.bf16.msra.mxu1 %v4809_v55  ;;  %v2326_v55 = vpop.f32.mrb[62].mxu0 }
 0x74d   : > { %3573 = vmatprep.subr.bf16.mxu1 %v5739_v49 }
 0x74e   : > { %3612 = vmatpush3.bf16.msra.mxu0 %v5102_v16 }
 0x74f   : > { %3613 = vmatprep.subr.bf16.mxu0 %v5739_v49 }
 0x750   : > { %3574 = vmatpush3.bf16.msra.mxu1 %v4818_v2  ;;  %v2327_v2 = vpop.f32.mrb[63].mxu0 }
 0x751   : > { %3575 = vmatprep.subr.bf16.mxu1 %v5739_v49 }
 0x752   : > { %3614 = vmatpush3.bf16.msra.mxu0 %v5111_v52 }
 0x753   : > { %3615 = vmatprep.subr.bf16.mxu0 %v5739_v49 }
 0x754   : > { %3576 = vmatpush3.bf16.msra.mxu1 %v4827_v58  ;;  %v3925_v58 = vld [vmem:[%s5633_s2 + $0x4] ss:$12 sps:$4 sm:$0xff]  }
 0x755   : > { %3577 = vmatprep.subr.bf16.mxu1 %v5739_v49 }
 0x756   : > { %3616 = vmatpush3.bf16.msra.mxu0 %v5120_v15 }
 0x757   : > { %3617 = vmatprep.subr.bf16.mxu0 %v5739_v49 }
 0x758   : > { %3578 = vmatpush3.bf16.msra.mxu1 %v4836_v59  ;;  %v3926_v59 = vld [vmem:[%s5633_s2] ss:$12 sps:$4 sm:$0xff]  }
 0x759   : > { %3579 = vmatprep.subr.bf16.mxu1 %v5739_v49 }
 0x75a   : > { %3618 = vmatpush3.bf16.msra.mxu0 %v5129_v8 }
 0x75b   : > { %3619 = vmatprep.subr.bf16.mxu0 %v5739_v49 }
 0x75c   : > { %3580 = vmatpush3.bf16.msra.mxu1 %v4845_v60  ;;  %v3927_v60 = vld [vmem:[%s5633_s2 + $0x1c] ss:$12 sps:$4 sm:$0xff]  }
 0x75d   : > { %3581 = vmatprep.subr.bf16.mxu1 %v5739_v49 }
 0x75e   : > { %3620 = vmatpush3.bf16.msra.mxu0 %v5138_v44 }
 0x75f   : > { %3621 = vmatprep.subr.bf16.mxu0 %v5739_v49 }
 0x760   : > { %3582 = vmatpush3.bf16.msra.mxu1 %v4854_v61  ;;  %v3928_v61 = vld [vmem:[%s5633_s2 + $0x18] ss:$12 sps:$4 sm:$0xff]  }
 0x761   : > { %3587 = vmatprep.subr.bf16.mxu1 %v5739_v49 }
 0x762   : > { %3622 = vmatpush3.bf16.msra.mxu0 %v5149_v47 }
 0x763   : > { %3584 = vmatmul.mubr.bf16.vlgmr.msra.gmra.mrb[60].mxu1 %v5359_v36  ;;  %3627 = vmatprep.subr.bf16.mxu0 %v5739_v49  ;;  %v3931_v36 = vld [vmem:[%s5633_s2 + $0x4c] ss:$12 sps:$4 sm:$0xff]  }
 0x764   : > { %3588 = vmatpush3.bf16.msra.mxu1 %v4868_v63  ;;  %3603 = vmatprep.mubr.msk.bf16.mxu1 %vm3967_vm0, %v5739_v49  ;;  %v3929_v63 = vld [vmem:[%s5633_s2 + $0x34] ss:$12 sps:$4 sm:$0xff]  }
 0x765   : > { %3589 = vmatprep.subr.bf16.mxu1 %v5739_v49 }
 0x768   : > { %3590 = vmatpush3.bf16.msra.mxu1 %v5163_v19 }
 0x769   : > { %3591 = vmatprep.subr.bf16.mxu1 %v5739_v49 }
 0x76c   : > { %3592 = vmatpush3.bf16.msra.mxu1 %v5170_v17 }
 0x76d   : > { %3593 = vmatprep.subr.bf16.mxu1 %v5739_v49 }
 0x770   : > { %3594 = vmatpush3.bf16.msra.mxu1 %v5177_v0 }
 0x771   : > { %3595 = vmatprep.subr.bf16.mxu1 %v5739_v49 }
 0x774   : > { %3596 = vmatpush3.bf16.msra.mxu1 %v5184_v6 }
 0x775   : > { %3597 = vmatprep.subr.bf16.mxu1 %v5739_v49 }
 0x778   : > { %3598 = vmatpush3.bf16.msra.mxu1 %v5191_v29 }
 0x779   : > { %3599 = vmatprep.subr.bf16.mxu1 %v5739_v49 }
 0x77c   : > { %3600 = vmatpush3.bf16.msra.mxu1 %v5198_v62 }
 0x77d   : > { %3601 = vmatprep.subr.bf16.mxu1 %v5739_v49 }
 0x780   : > { %3602 = vmatpush3.bf16.msra.mxu1 %v5205_v3 }
 0x781   : > { %2528 = vmatprep.subr.bf16.mxu1 %v3925_v58 }
 0x783   : > { %3604 = vmatmul.mubr.bf16.vlgmr.msra.gmra.mrb[64].mxu1 %v2369_v11 }
 0x784   : > { %2529 = vmatpush1.bf16.msra.mxu1 %v3926_v59  ;;  %2560 = vmatprep.mubr.bf16.mxu1 %v5740_v28 }
 0x785   : > { %2530 = vmatprep.subr.bf16.mxu1 %v3927_v60 }
 0x788   : > { %2531 = vmatpush1.bf16.msra.mxu1 %v3928_v61 }
 0x789   : > { %2532 = vmatprep.subr.bf16.mxu1 %v3929_v63 }
 0x78c   : > { %2533 = vmatpush1.bf16.msra.mxu1 %v3930_v14 }
 0x78d   : > { %2534 = vmatprep.subr.bf16.mxu1 %v3931_v36 }
 0x790   : > { %2535 = vmatpush1.bf16.msra.mxu1 %v4899_v39  ;;  %v5495_v39 = vpack.c.bf16 %v5491_v9, %v5491_v9 }
 0x791   : > { %2536 = vmatprep.subr.bf16.mxu1 %v4905_v42  ;;  %v5823_v42 = vld [vmem:[#allocation10_spill] sm:$0xff] }
 0x794   : > { %2537 = vmatpush1.bf16.msra.mxu1 %v4911_v45  ;;  %v5824_v45 = vld [vmem:[#allocation11_spill] sm:$0xff] }
 0x795   : > { %2538 = vmatprep.subr.bf16.mxu1 %v4917_v48  ;;  %v5825_v48 = vld [vmem:[#allocation12_spill] sm:$0xff] }
 0x798   : > { %2539 = vmatpush1.bf16.msra.mxu1 %v4923_v51  ;;  %v5826_v51 = vld [vmem:[#allocation13_spill] sm:$0xff] }
 0x799   : > { %2540 = vmatprep.subr.bf16.mxu1 %v4929_v53  ;;  %v5827_v53 = vld [vmem:[#allocation14_spill] sm:$0xff] }
 0x79c   : > { %2541 = vmatpush1.bf16.msra.mxu1 %v4935_v54  ;;  %v5828_v54 = vld [vmem:[#allocation15_spill] sm:$0xff] }
 0x79d   : > { %2542 = vmatprep.subr.bf16.mxu1 %v5803_v22  ;;  %v5829_v22 = vld [vmem:[#allocation16_spill] sm:$0xff] }
 0x7a0   : > { %2543 = vmatpush1.bf16.msra.mxu1 %v5804_v26  ;;  %v5830_v26 = vld [vmem:[#allocation17_spill] sm:$0xff] }
 0x7a1   : > { %2610 = vmatprep.subr.bf16.mxu1 %v5805_v30  ;;  %v5831_v30 = vld [vmem:[#allocation18_spill] sm:$0xff] }
 0x7a3   : > { %2561 = vmatmul.mubr.bf16.vlgmr.msra.gmra.mrb[68].mxu1 %v5495_v39 }
 0x7a4   : > { %2611 = vmatpush1.bf16.msra.mxu1 %v5807_v38  ;;  %2642 = vmatprep.mubr.bf16.mxu1 %v5740_v28  ;;  %v5832_v28 = vld [vmem:[#allocation19_spill] sm:$0xff]  ;;  %v5833_v38 = vld [vmem:[#allocation20_spill] sm:$0xff] }
 0x7a5   : > { %2612 = vmatprep.subr.bf16.mxu1 %v5808_v5  ;;  %v5834_v5 = vld [vmem:[#allocation21_spill] sm:$0xff] }
 0x7a8   : > { %2613 = vmatpush1.bf16.msra.mxu1 %v5823_v42 }
 0x7a9   : > { %2614 = vmatprep.subr.bf16.mxu1 %v5824_v45 }
 0x7ac   : > { %2615 = vmatpush1.bf16.msra.mxu1 %v5825_v48 }
 0x7ad   : > { %2616 = vmatprep.subr.bf16.mxu1 %v5826_v51 }
 0x7b0   : > { %2617 = vmatpush1.bf16.msra.mxu1 %v5827_v53 }
 0x7b1   : > { %2618 = vmatprep.subr.bf16.mxu1 %v5828_v54 }
 0x7b4   : > { %2619 = vmatpush1.bf16.msra.mxu1 %v5829_v22 }
 0x7b5   : > { %2620 = vmatprep.subr.bf16.mxu1 %v5830_v26 }
 0x7b8   : > { %2621 = vmatpush1.bf16.msra.mxu1 %v5831_v30 }
 0x7b9   : > { %2622 = vmatprep.subr.bf16.mxu1 %v5832_v28  ;;  %v2522_v28 = vstv %s2521_s29 }
 0x7ba   : > { %vm2523_vm7 = vcmp.eq.s32.totalorder %v2522_v28, 1 }
 0x7bc   : > { %2623 = vmatpush1.bf16.msra.mxu1 %v5833_v38 }
 0x7bd   : > { %2624 = vmatprep.subr.bf16.mxu1 %v5834_v5 }
 0x7c0   : > { %2625 = vmatpush1.bf16.msra.mxu1 %v5835_v56 }
 0x7c1   : > { %3667 = vmatprep.subr.bf16.mxu1 %v5739_v49 }
 0x816   : > { %v2270_v24 = vpop.f32.mrb[56].mxu1 }
 0x817   : > { %v2271_v40 = vadd.f32 %v5382_v10, %v2270_v24  ;;  %v3565_v23 = vpop.f32.mrb[57].mxu1  ;;  %v2404_v43 = vpop.f32.mrb[64].mxu0 }
 0x818   : > { %v2451_v57 = vadd.f32 %v2404_v43, %v5434_v50  ;;  %v2273_v25 = vpop.f32.mrb[58].mxu1  ;;  %v2406_v1 = vpop.f32.mrb[65].mxu0  ;;  %v3932_v43 = vld [vmem:[%s5633_s2 + $0x8] ss:$12 sps:$4 sm:$0xff]  }
 0x819   : > { %v2276_v27 = vadd.f32 %v5836_v12, %v2271_v40  ;;  %v2452_v18 = vadd.f32 %v2406_v1, %v5438_v34  ;;  %v3566_v13 = vpop.f32.mrb[59].mxu1  ;;  %v2408_v31 = vpop.f32.mrb[66].mxu0  ;;  %v3940_v1 = vld [vmem:[%s5634_s3 + $0x8] ss:$12 sps:$4 sm:$0xff]  }
 0x81a   : > { %v2409_v33 = vpop.f32.mrb[67].mxu0  ;;  %v2453_v21 = vadd.f32 %v2451_v57, %v4488_v37  ;;  %v3935_v57 = vld [vmem:[%s5633_s2 + $0x50] ss:$12 sps:$4 sm:$0xff]  }
 0x81b   : > { %2979 = vst [vmem:[%s4053_s25 + $0x28] sm:$0xff] %v2276_v27  ;;  %v2454_v50 = vadd.f32 %v2452_v18, %v4491_v41 }
 0x81c   : > { %v2981_v2 = vmul.f32 -1.442695, %v2453_v21 }
 0x81d   : > { %v2982_v60 = vmul.f32 -1.442695, %v2454_v50 }
 0x81e   : > { %3846 = vpow2.f32 %v2981_v2 }
 0x81f   : > { %3848 = vpow2.f32 %v2982_v60 }
 0x828   : > { %v3847_v59 = vpop.eup %3846 }
 0x829   : > { %v2461_v61 = vadd.f32 1.0, %v3847_v59  ;;  %v3849_v63 = vpop.eup %3848 }
 0x82a   : > { %v2462_v54 = vadd.f32 1.0, %v3849_v63 }
 0x82b   : > { %3850 = vrcp.f32 %v2461_v61 }
 0x835   : > { %v3851_v42 = vpop.eup %3850 }
 0x836   : > { %v2363_v46 = vpop.f32.mrb[60].mxu1 }
 0x837   : > { %v3585_v11 = vpop.f32.mrb[61].mxu1  ;;  %v2467_v48 = vadd.f32 %v5268_v35, %v2363_v46 }
 0x838   : > { %v2366_v55 = vpop.f32.mrb[62].mxu1 }
 0x839   : > { %v3586_v58 = vpop.f32.mrb[63].mxu1 }
 0x856   : > { %v2445_v34 = vpop.f32.mrb[64].mxu1 }
 0x857   : > { %v2468_v14 = vadd.f32 %v5262_v20, %v2445_v34  ;;  %v3605_v36 = vpop.f32.mrb[65].mxu1 }
 0x858   : > { %v2448_v45 = vpop.f32.mrb[66].mxu1 }
 0x859   : > { %v2469_v51 = vmul.f32 %v3851_v42, %v2468_v14  ;;  %v3606_v53 = vpop.f32.mrb[67].mxu1 }
 0x85b   : > { %v2470_v22 = vadd.f32 %v2469_v51, %v2467_v48 }
 0x85d   : > { %3852 = vtanh.f32 %v2470_v22 }
 0x85e   : > { %3854 = vrcp.f32 %v2462_v54  ;;  %v2762_v54 = vstv %s2761_s13 }
 0x85f   : > { %vm2763_vm8 = vcmp.eq.s32.totalorder %v2762_v54, 1 }
 0x867   : > { %v3853_v26 = vpop.eup %3852 }
 0x868   : > { %v2472_v30 = vsub.f32 %v5396_v4, %v3853_v26  ;;  %v3855_v38 = vpop.eup %3854 }
 0x86a   : > { %v2473_v5 = vmul.f32 %v3855_v38, %v2472_v30 }
 0x86c   : > { %v2474_v56 = vadd.f32 %v3853_v26, %v2473_v5 }
 0x86e   : > { %v2475_v24 = vpack.c.bf16 %v2474_v56, %v2474_v56  ;;  %v5527_v40 = vsel %vm2523_vm7, %v2474_v56, %v5396_v4  ;;  %v3933_v4 = vld [vmem:[%s5633_s2 + $0x20] ss:$12 sps:$4 sm:$0xff]  }
 0x86f   : > { %v5531_v23 = vpack.c.bf16 %v5527_v40, %v5527_v40 }
 0x870   : > { %3624 = vmatmul.mubr.bf16.vlgmr.msra.gmra.mrb[68].mxu0 %v2475_v24 }
 0x871   : > { %3628 = vmatpush3.bf16.msra.mxu0 %v3932_v43  ;;  %2643 = vmatmul.mubr.bf16.vlgmr.msra.gmra.mrb[72].mxu1 %v5531_v23 }
 0x872   : > { %3629 = vmatprep.subr.bf16.mxu0 %v5739_v49  ;;  %3643 = vmatprep.mubr.msk.bf16.mxu0 %vm3967_vm0, %v5739_v49 }
 0x873   : > { %3668 = vmatpush3.bf16.msra.mxu1 %v5082_v7  ;;  %3683 = vmatprep.mubr.msk.bf16.mxu1 %vm3967_vm0, %v5739_v49  ;;  %v3934_v7 = vld [vmem:[%s5633_s2 + $0x38] ss:$12 sps:$4 sm:$0xff]  }
 0x874   : > { %3669 = vmatprep.subr.bf16.mxu1 %v5739_v49 }
 0x875   : > { %3630 = vmatpush3.bf16.msra.mxu0 %v3933_v4 }
 0x876   : > { %3631 = vmatprep.subr.bf16.mxu0 %v5739_v49 }
 0x877   : > { %3670 = vmatpush3.bf16.msra.mxu1 %v5093_v32  ;;  %v3936_v32 = vld [vmem:[%s5633_s2 + $0x68] ss:$12 sps:$4 sm:$0xff]  }
 0x878   : > { %3671 = vmatprep.subr.bf16.mxu1 %v5739_v49 }
 0x879   : > { %3632 = vmatpush3.bf16.msra.mxu0 %v3934_v7 }
 0x87a   : > { %3633 = vmatprep.subr.bf16.mxu0 %v5739_v49 }
 0x87b   : > { %3672 = vmatpush3.bf16.msra.mxu1 %v5102_v16  ;;  %v3937_v16 = vld [vmem:[%s5633_s2 + $0x80] ss:$12 sps:$4 sm:$0xff]  }
 0x87c   : > { %3673 = vmatprep.subr.bf16.mxu1 %v5739_v49 }
 0x87d   : > { %3634 = vmatpush3.bf16.msra.mxu0 %v3935_v57 }
 0x87e   : > { %3635 = vmatprep.subr.bf16.mxu0 %v5739_v49 }
 0x87f   : > { %3674 = vmatpush3.bf16.msra.mxu1 %v5111_v52  ;;  %v3938_v52 = vld [vmem:[%s5633_s2 + $0x98] ss:$12 sps:$4 sm:$0xff]  }
 0x880   : > { %3675 = vmatprep.subr.bf16.mxu1 %v5739_v49 }
 0x881   : > { %3636 = vmatpush3.bf16.msra.mxu0 %v3936_v32 }
 0x882   : > { %3637 = vmatprep.subr.bf16.mxu0 %v5739_v49 }
 0x883   : > { %3676 = vmatpush3.bf16.msra.mxu1 %v5120_v15  ;;  %v3939_v15 = vld [vmem:[%s5633_s2 + $0xb0] ss:$12 sps:$4 sm:$0xff]  }
 0x884   : > { %3677 = vmatprep.subr.bf16.mxu1 %v5739_v49 }
 0x885   : > { %3638 = vmatpush3.bf16.msra.mxu0 %v3937_v16 }
 0x886   : > { %3639 = vmatprep.subr.bf16.mxu0 %v5739_v49 }
 0x887   : > { %3678 = vmatpush3.bf16.msra.mxu1 %v5129_v8  ;;  %v2562_v8 = vpop.f32.mrb[68].mxu1 }
 0x888   : > { %3679 = vmatprep.subr.bf16.mxu1 %v5739_v49  ;;  %v2564_v25 = vpop.f32.mrb[69].mxu1 }
 0x889   : > { %3640 = vmatpush3.bf16.msra.mxu0 %v3938_v52 }
 0x88a   : > { %3641 = vmatprep.subr.bf16.mxu0 %v5739_v49 }
 0x88b   : > { %3680 = vmatpush3.bf16.msra.mxu1 %v5138_v44  ;;  %v2566_v44 = vpop.f32.mrb[70].mxu1 }
 0x88c   : > { %3681 = vmatprep.subr.bf16.mxu1 %v5739_v49  ;;  %v2567_v12 = vpop.f32.mrb[71].mxu1 }
 0x88d   : > { %3642 = vmatpush3.bf16.msra.mxu0 %v3939_v15 }
 0x88e   : > { %3647 = vmatprep.subr.bf16.mxu0 %v5739_v49 }
 0x88f   : > { %3682 = vmatpush3.bf16.msra.mxu1 %v5149_v47 }
 0x890   : > { %3644 = vmatmul.mubr.bf16.vlgmr.msra.gmra.mrb[72].mxu0 %v5495_v39 }
 0x891   : > { %3648 = vmatpush3.bf16.msra.mxu0 %v3940_v1  ;;  %3663 = vmatprep.mubr.msk.bf16.mxu0 %vm3967_vm0, %v5739_v49 }
 0x892   : > { %3649 = vmatprep.subr.bf16.mxu0 %v5739_v49 }
 0x895   : > { %3650 = vmatpush3.bf16.msra.mxu0 %v5163_v19 }
 0x896   : > { %3651 = vmatprep.subr.bf16.mxu0 %v5739_v49 }
 0x899   : > { %3652 = vmatpush3.bf16.msra.mxu0 %v5170_v17 }
 0x89a   : > { %3653 = vmatprep.subr.bf16.mxu0 %v5739_v49 }
 0x89d   : > { %3654 = vmatpush3.bf16.msra.mxu0 %v5177_v0 }
 0x89e   : > { %3655 = vmatprep.subr.bf16.mxu0 %v5739_v49 }
 0x8a1   : > { %3656 = vmatpush3.bf16.msra.mxu0 %v5184_v6 }
 0x8a2   : > { %3657 = vmatprep.subr.bf16.mxu0 %v5739_v49 }
 0x8a5   : > { %3658 = vmatpush3.bf16.msra.mxu0 %v5191_v29  ;;  %v5837_v29 = vld [vmem:[#allocation2_spill] sm:$0xff] }
 0x8a6   : > { %3659 = vmatprep.subr.bf16.mxu0 %v5739_v49 }
 0x8a9   : > { %3660 = vmatpush3.bf16.msra.mxu0 %v5198_v62 }
 0x8aa   : > { %3661 = vmatprep.subr.bf16.mxu0 %v5739_v49 }
 0x8ad   : > { %3662 = vmatpush3.bf16.msra.mxu0 %v5205_v3 }
 0x8b0   : > { %3664 = vmatmul.mubr.bf16.vlgmr.msra.gmra.mrb[76].mxu0 %v5531_v23 }
 0x943   : > { %v2510_v47 = vpop.f32.mrb[68].mxu0 }
 0x944   : > { %v2511_v19 = vadd.f32 %v5382_v10, %v2510_v47  ;;  %v3625_v17 = vpop.f32.mrb[69].mxu0  ;;  %v2644_v0 = vpop.f32.mrb[72].mxu1 }
 0x945   : > { %v2691_v6 = vadd.f32 %v2644_v0, %v2562_v8  ;;  %v2513_v39 = vpop.f32.mrb[70].mxu0  ;;  %v2646_v27 = vpop.f32.mrb[73].mxu1 }
 0x946   : > { %v2516_v18 = vadd.f32 %v5837_v29, %v2511_v19  ;;  %v2692_v13 = vadd.f32 %v2646_v27, %v2564_v25  ;;  %v3626_v31 = vpop.f32.mrb[71].mxu0  ;;  %v2648_v62 = vpop.f32.mrb[74].mxu1 }
 0x947   : > { %v2649_v33 = vpop.f32.mrb[75].mxu1  ;;  %v2693_v49 = vadd.f32 %v2691_v6, %v4488_v37 }
 0x948   : > { %2983 = vst [vmem:[%s4053_s25 + $0x30] sm:$0xff] %v2516_v18  ;;  %v2694_v2 = vadd.f32 %v2692_v13, %v4491_v41 }
 0x949   : > { %v2985_v11 = vmul.f32 -1.442695, %v2693_v49 }
 0x94a   : > { %v2986_v50 = vmul.f32 -1.442695, %v2694_v2 }
 0x94b   : > { %3856 = vpow2.f32 %v2985_v11 }
 0x94c   : > { %3858 = vpow2.f32 %v2986_v50 }
 0x955   : > { %v3857_v58 = vpop.eup %3856 }
 0x956   : > { %v2701_v59 = vadd.f32 1.0, %v3857_v58  ;;  %v3859_v61 = vpop.eup %3858 }
 0x957   : > { %v2702_v48 = vadd.f32 1.0, %v3859_v61 }
 0x958   : > { %3860 = vrcp.f32 %v2701_v59 }
 0x962   : > { %v3861_v37 = vpop.eup %3860 }
 0x963   : > { %v2603_v3 = vpop.f32.mrb[72].mxu0 }
 0x964   : > { %v3645_v21 = vpop.f32.mrb[73].mxu0  ;;  %v2707_v36 = vadd.f32 %v5268_v35, %v2603_v3 }
 0x965   : > { %v2606_v46 = vpop.f32.mrb[74].mxu0 }
 0x966   : > { %v3646_v55 = vpop.f32.mrb[75].mxu0 }
 0x983   : > { %v2685_v60 = vpop.f32.mrb[76].mxu0 }
 0x984   : > { %v2708_v34 = vadd.f32 %v5262_v20, %v2685_v60  ;;  %v3665_v63 = vpop.f32.mrb[77].mxu0 }
 0x985   : > { %v2688_v14 = vpop.f32.mrb[78].mxu0 }
 0x986   : > { %v2709_v42 = vmul.f32 %v3861_v37, %v2708_v34  ;;  %v3666_v45 = vpop.f32.mrb[79].mxu0 }
 0x988   : > { %v2710_v51 = vadd.f32 %v2709_v42, %v2707_v36 }
 0x98a   : > { %3862 = vtanh.f32 %v2710_v51 }
 0x98b   : > { %3864 = vrcp.f32 %v2702_v48 }
 0x994   : > { %v3863_v41 = vpop.eup %3862 }
 0x995   : > { %v2712_v53 = vsub.f32 %v5527_v40, %v3863_v41  ;;  %v3865_v20 = vpop.eup %3864 }
 0x997   : > { %v2713_v22 = vmul.f32 %v3865_v20, %v2712_v53 }
 0x999   : > { %v2714_v26 = vadd.f32 %v3863_v41, %v2713_v22 }
 0x99b   : > { %v2715_v30 = vpack.c.bf16 %v2714_v26, %v2714_v26  ;;  %v2764_v35 = vsel %vm2763_vm8, %v2714_v26, %v5527_v40 }
 0x99c   : > { %2765 = vst [vmem:[%s5641_s10] sm:$0xff] %v2764_v35 }
 0x99d   : > { %3684 = vmatmul.mubr.bf16.vlgmr.msra.gmra.mrb[76].mxu1 %v2715_v30 }
 0xa70   : > { %v2750_v28 = vpop.f32.mrb[76].mxu1 }
 0xa71   : > { %v2751_v38 = vadd.f32 %v5382_v10, %v2750_v28  ;;  %v3685_v5 = vpop.f32.mrb[77].mxu1 }
 0xa72   : > { %v2753_v56 = vpop.f32.mrb[78].mxu1 }
 0xa73   : > { %v2756_v24 = vadd.f32 %v5491_v9, %v2751_v38  ;;  %v3686_v23 = vpop.f32.mrb[79].mxu1 }
 0xa75   : > { %2987 = vst [vmem:[%s4053_s25 + $0x38] sm:$0xff] %v2756_v24 }
 0xa76 PF: > { %s21_s15 = sadd.s32 1, %s3963_s15   ;;  %s5838_s13 = smov %s3959_s14 }
 0xa77   : > { %p18_p0 = scmp.ge.s32.totalorder %s21_s15, 4   ;;  %s5839_s14 = smov %s5841_s16 }
 0xa79   :  { %20 = sbr.rel (!%p18_p0) target bundleno = 2 (0x2), region = 119 }

</bundles_post_ra>
